<compile_context>
chip_gen: v5e
topology: v5e:2x2
jax: 0.10.0
libtpu: 0.0.40
codegen_flags: <defaults>
</compile_context>

<pallas_src>
import jax
import jax.numpy as jnp
from jax.experimental import pallas as pl
from jax.experimental.pallas import tpu as pltpu

LANES = 128   # TPU lane width: hidden/output dims are padded to this
K_IN = 8      # fc1 contraction dim: 4 input features zero-padded to 8


def iris_mlp_kernel(x_ref,
                    w1_ref, b1_ref,
                    w2_ref, b2_ref,
                    w3_ref, b3_ref,
                    w4_ref, b4_ref,
                    o_ref):
    """One batch tile of the fused 4-layer MLP. All weights are VMEM-resident
    and lane-padded to 128, so every layer is a clean MXU contraction."""
    hi = jax.lax.Precision.HIGHEST

    # fc1 + relu: (TB, 8) @ (8, 128)  (features 4 padded to 8, hidden 40 -> 128)
    h = jnp.dot(x_ref[...], w1_ref[...],
                preferred_element_type=jnp.float32, precision=hi) + b1_ref[...]
    h = jnp.maximum(h, 0.0)
    # dropout1(x) in the PyTorch forward is unassigned -> no-op

    # fc2 + relu: (TB, 128) @ (128, 128)
    h = jnp.dot(h, w2_ref[...],
                preferred_element_type=jnp.float32, precision=hi) + b2_ref[...]
    h = jnp.maximum(h, 0.0)
    # dropout2(x) no-op

    # fc3 + relu: (TB, 128) @ (128, 128)
    h = jnp.dot(h, w3_ref[...],
                preferred_element_type=jnp.float32, precision=hi) + b3_ref[...]
    h = jnp.maximum(h, 0.0)
    # dropout1(x) no-op

    # fc4: logits padded to 128 lanes (zero cols) -> dense (TB, 128) store
    out = jnp.dot(h, w4_ref[...],
                  preferred_element_type=jnp.float32, precision=hi) + b4_ref[...]
    o_ref[...] = out.astype(o_ref.dtype)


def init_params(key):
    """Deterministic init matching nn.Linear shapes (weights stored transposed:
    (in_features, out_features) so the math is x @ W + b)."""
    dims = [(4, 40), (40, 80), (80, 100), (100, 3)]
    params = []
    for fan_in, fan_out in dims:
        key, wk, bk = jax.random.split(key, 3)
        bound = 1.0 / jnp.sqrt(fan_in)  # PyTorch default U(-1/sqrt(in), 1/sqrt(in))
        w = jax.random.uniform(wk, (fan_in, fan_out), jnp.float32, -bound, bound)
        b = jax.random.uniform(bk, (1, fan_out), jnp.float32, -bound, bound)
        params.append((w, b))
    return params


def prepare_params(params):
    """Zero-pad every layer dim to lane-aligned sizes ONCE (hoisted out of the
    per-call path). Exact: zero weight rows/cols, zero bias, ReLU(0)=0."""
    (w1, b1), (w2, b2), (w3, b3), (w4, b4) = params

    def pad2(a, rows, cols):
        return jnp.pad(a, ((0, rows - a.shape[0]), (0, cols - a.shape[1])))

    return (
        pad2(w1, K_IN, LANES), pad2(b1, 1, LANES),
        pad2(w2, LANES, LANES), pad2(b2, 1, LANES),
        pad2(w3, LANES, LANES), pad2(b3, 1, LANES),
        pad2(w4, LANES, LANES), pad2(b4, 1, LANES),
    )


def _pick_tb(B, target=512):
    """Biggest tile <= target (amortize grid-step overhead), but keep >= 2 grid
    steps when the batch allows it so the parallel axis can use both v7x TCs."""
    half = ((pl.cdiv(B, 2) + LANES - 1) // LANES) * LANES
    return max(LANES, min(target, half))


def iris_forward(x, padded_params, *, out_dim=3, tb=None):
    """x: (B, 4) float32 -> logits (B, out_dim) float32."""
    B, F = x.shape
    if tb is None:
        tb = _pick_tb(B)
    b_pad = pl.cdiv(B, tb) * tb

    # Single conditional pad: batch -> b_pad rows, features 4 -> K_IN cols.
    if b_pad != B or F != K_IN:
        x = jnp.pad(x, ((0, b_pad - B), (0, K_IN - F)))

    # Weights/biases: full-array blocks, same block every grid step -> resident
    # in VMEM (single DMA), only x / logits tiles stream through the pipeline.
    resident = lambda a: pl.BlockSpec(a.shape, lambda i: (0, 0))

    out = pl.pallas_call(
        iris_mlp_kernel,
        out_shape=jax.ShapeDtypeStruct((b_pad, LANES), jnp.float32),
        grid=(b_pad // tb,),
        in_specs=[pl.BlockSpec((tb, K_IN), lambda i: (i, 0))]   # x: batch-tiled
                 + [resident(p) for p in padded_params],
        out_specs=pl.BlockSpec((tb, LANES), lambda i: (i, 0)),  # lane-dense out
        compiler_params=pltpu.CompilerParams(
            dimension_semantics=("parallel",)),                 # 2 TCs on v7x
    )(x, *padded_params)

    return out[:B, :out_dim]


def reference_forward(x, params):
    h = x
    for i, (w, b) in enumerate(params):
        h = jnp.dot(h, w, precision=jax.lax.Precision.HIGHEST) + b
        if i < len(params) - 1:
            h = jnp.maximum(h, 0.0)
    return h


if __name__ == "__main__":
    key = jax.random.PRNGKey(0)
    pkey, xkey = jax.random.split(key)
    params = init_params(pkey)
    padded_params = prepare_params(params)

    # Two cases: small multi-tile batch (tb=128, 2 grid steps) and a larger one
    # that exercises the tb=512 path (2 grid steps of 512).
    for B in (200, 1024):
        x = jax.random.normal(jax.random.fold_in(xkey, B), (B, 4), jnp.float32)
        out = iris_forward(x, padded_params)
        jax.block_until_ready(out)

        ref = reference_forward(x, params)
        assert out.shape == (B, 3), out.shape
        assert jnp.allclose(out, ref, atol=1e-5, rtol=1e-5), (
            B, float(jnp.max(jnp.abs(out - ref))))

    print("KERNEL_OK")
</pallas_src>

<mosaic_0001>
module attributes {stable_mosaic.version = 11 : i64} {
  func.func @iris_mlp_kernel(%arg0: i32, %arg1: memref<128x8xf32, #tpu.memory_space<vmem>>, %arg2: memref<8x128xf32, #tpu.memory_space<vmem>>, %arg3: memref<1x128xf32, #tpu.memory_space<vmem>>, %arg4: memref<128x128xf32, #tpu.memory_space<vmem>>, %arg5: memref<1x128xf32, #tpu.memory_space<vmem>>, %arg6: memref<128x128xf32, #tpu.memory_space<vmem>>, %arg7: memref<1x128xf32, #tpu.memory_space<vmem>>, %arg8: memref<128x128xf32, #tpu.memory_space<vmem>>, %arg9: memref<1x128xf32, #tpu.memory_space<vmem>>, %arg10: memref<128x128xf32, #tpu.memory_space<vmem>>) attributes {dimension_semantics = [#tpu.dimension_semantics<parallel>], iteration_bounds = array<i64: 2>, scalar_prefetch = 0 : i64, scratch_operands = 0 : i64, tpu.core_type = #tpu.core_type<tc>, window_params = [{transform_indices = @transform_0, window_bounds = array<i64: 128, 8>}, {pipeline_mode = #tpu.pipeline_mode<synchronous>, transform_indices = @transform_1, window_bounds = array<i64: 8, 128>}, {pipeline_mode = #tpu.pipeline_mode<synchronous>, transform_indices = @transform_2, window_bounds = array<i64: 1, 128>}, {pipeline_mode = #tpu.pipeline_mode<synchronous>, transform_indices = @transform_3, window_bounds = array<i64: 128, 128>}, {pipeline_mode = #tpu.pipeline_mode<synchronous>, transform_indices = @transform_4, window_bounds = array<i64: 1, 128>}, {pipeline_mode = #tpu.pipeline_mode<synchronous>, transform_indices = @transform_5, window_bounds = array<i64: 128, 128>}, {pipeline_mode = #tpu.pipeline_mode<synchronous>, transform_indices = @transform_6, window_bounds = array<i64: 1, 128>}, {pipeline_mode = #tpu.pipeline_mode<synchronous>, transform_indices = @transform_7, window_bounds = array<i64: 128, 128>}, {pipeline_mode = #tpu.pipeline_mode<synchronous>, transform_indices = @transform_8, window_bounds = array<i64: 1, 128>}, {transform_indices = @transform_9, window_bounds = array<i64: 128, 128>}]} {
    %c0 = arith.constant 0 : index
    %c0_0 = arith.constant 0 : index
    %0 = vector.load %arg1[%c0, %c0_0] : memref<128x8xf32, #tpu.memory_space<vmem>>, vector<128x8xf32>
    %c0_1 = arith.constant 0 : index
    %c0_2 = arith.constant 0 : index
    %1 = vector.load %arg2[%c0_1, %c0_2] : memref<8x128xf32, #tpu.memory_space<vmem>>, vector<8x128xf32>
    %cst = arith.constant dense<0.000000e+00> : vector<128x128xf32>
    %2 = tpu.matmul %0, %1, %cst {dimension_numbers = #tpu.dot_dimension_numbers<[1], [0], [0], [1], [0, 0, 1, 1], [], []>, precision = #tpu.contract_precision<fp32>} : vector<128x8xf32>, vector<8x128xf32>, vector<128x128xf32> -> vector<128x128xf32>
    %c0_3 = arith.constant 0 : index
    %c0_4 = arith.constant 0 : index
    %3 = vector.load %arg3[%c0_3, %c0_4] : memref<1x128xf32, #tpu.memory_space<vmem>>, vector<1x128xf32>
    %4 = vector.broadcast %3 : vector<1x128xf32> to vector<128x128xf32>
    %5 = arith.addf %2, %4 : vector<128x128xf32>
    %cst_5 = arith.constant 0.000000e+00 : f32
    %6 = vector.broadcast %cst_5 : f32 to vector<128x128xf32>
    %7 = arith.maximumf %5, %6 : vector<128x128xf32>
    %c0_6 = arith.constant 0 : index
    %c0_7 = arith.constant 0 : index
    %8 = vector.load %arg4[%c0_6, %c0_7] : memref<128x128xf32, #tpu.memory_space<vmem>>, vector<128x128xf32>
    %cst_8 = arith.constant dense<0.000000e+00> : vector<128x128xf32>
    %9 = tpu.matmul %7, %8, %cst_8 {dimension_numbers = #tpu.dot_dimension_numbers<[1], [0], [0], [1], [0, 0, 1, 1], [], []>, precision = #tpu.contract_precision<fp32>} : vector<128x128xf32>, vector<128x128xf32>, vector<128x128xf32> -> vector<128x128xf32>
    %c0_9 = arith.constant 0 : index
    %c0_10 = arith.constant 0 : index
    %10 = vector.load %arg5[%c0_9, %c0_10] : memref<1x128xf32, #tpu.memory_space<vmem>>, vector<1x128xf32>
    %11 = vector.broadcast %10 : vector<1x128xf32> to vector<128x128xf32>
    %12 = arith.addf %9, %11 : vector<128x128xf32>
    %cst_11 = arith.constant 0.000000e+00 : f32
    %13 = vector.broadcast %cst_11 : f32 to vector<128x128xf32>
    %14 = arith.maximumf %12, %13 : vector<128x128xf32>
    %c0_12 = arith.constant 0 : index
    %c0_13 = arith.constant 0 : index
    %15 = vector.load %arg6[%c0_12, %c0_13] : memref<128x128xf32, #tpu.memory_space<vmem>>, vector<128x128xf32>
    %cst_14 = arith.constant dense<0.000000e+00> : vector<128x128xf32>
    %16 = tpu.matmul %14, %15, %cst_14 {dimension_numbers = #tpu.dot_dimension_numbers<[1], [0], [0], [1], [0, 0, 1, 1], [], []>, precision = #tpu.contract_precision<fp32>} : vector<128x128xf32>, vector<128x128xf32>, vector<128x128xf32> -> vector<128x128xf32>
    %c0_15 = arith.constant 0 : index
    %c0_16 = arith.constant 0 : index
    %17 = vector.load %arg7[%c0_15, %c0_16] : memref<1x128xf32, #tpu.memory_space<vmem>>, vector<1x128xf32>
    %18 = vector.broadcast %17 : vector<1x128xf32> to vector<128x128xf32>
    %19 = arith.addf %16, %18 : vector<128x128xf32>
    %cst_17 = arith.constant 0.000000e+00 : f32
    %20 = vector.broadcast %cst_17 : f32 to vector<128x128xf32>
    %21 = arith.maximumf %19, %20 : vector<128x128xf32>
    %c0_18 = arith.constant 0 : index
    %c0_19 = arith.constant 0 : index
    %22 = vector.load %arg8[%c0_18, %c0_19] : memref<128x128xf32, #tpu.memory_space<vmem>>, vector<128x128xf32>
    %cst_20 = arith.constant dense<0.000000e+00> : vector<128x128xf32>
    %23 = tpu.matmul %21, %22, %cst_20 {dimension_numbers = #tpu.dot_dimension_numbers<[1], [0], [0], [1], [0, 0, 1, 1], [], []>, precision = #tpu.contract_precision<fp32>} : vector<128x128xf32>, vector<128x128xf32>, vector<128x128xf32> -> vector<128x128xf32>
    %c0_21 = arith.constant 0 : index
    %c0_22 = arith.constant 0 : index
    %24 = vector.load %arg9[%c0_21, %c0_22] : memref<1x128xf32, #tpu.memory_space<vmem>>, vector<1x128xf32>
    %25 = vector.broadcast %24 : vector<1x128xf32> to vector<128x128xf32>
    %26 = arith.addf %23, %25 : vector<128x128xf32>
    %c0_23 = arith.constant 0 : index
    %c0_24 = arith.constant 0 : index
    %27 = vector.load %arg10[%c0_23, %c0_24] : memref<128x128xf32, #tpu.memory_space<vmem>>, vector<128x128xf32>
    tpu.vector_store %arg10[%c0_23, %c0_24], %26 {strides = array<i32>} : memref<128x128xf32, #tpu.memory_space<vmem>>, vector<128x128xf32>,
    return
  }
  func.func @transform_0(%arg0: i32) -> (i32, i32) {
    %c0_i32 = arith.constant 0 : i32
    %c0_i32_0 = arith.constant 0 : i32
    return %arg0, %c0_i32 : i32, i32
  }
  func.func @transform_1(%arg0: i32) -> (i32, i32) {
    %c0_i32 = arith.constant 0 : i32
    %c0_i32_0 = arith.constant 0 : i32
    %c0_i32_1 = arith.constant 0 : i32
    return %c0_i32, %c0_i32_0 : i32, i32
  }
  func.func @transform_2(%arg0: i32) -> (i32, i32) {
    %c0_i32 = arith.constant 0 : i32
    %c0_i32_0 = arith.constant 0 : i32
    %c0_i32_1 = arith.constant 0 : i32
    return %c0_i32, %c0_i32_0 : i32, i32
  }
  func.func @transform_3(%arg0: i32) -> (i32, i32) {
    %c0_i32 = arith.constant 0 : i32
    %c0_i32_0 = arith.constant 0 : i32
    %c0_i32_1 = arith.constant 0 : i32
    return %c0_i32, %c0_i32_0 : i32, i32
  }
  func.func @transform_4(%arg0: i32) -> (i32, i32) {
    %c0_i32 = arith.constant 0 : i32
    %c0_i32_0 = arith.constant 0 : i32
    %c0_i32_1 = arith.constant 0 : i32
    return %c0_i32, %c0_i32_0 : i32, i32
  }
  func.func @transform_5(%arg0: i32) -> (i32, i32) {
    %c0_i32 = arith.constant 0 : i32
    %c0_i32_0 = arith.constant 0 : i32
    %c0_i32_1 = arith.constant 0 : i32
    return %c0_i32, %c0_i32_0 : i32, i32
  }
  func.func @transform_6(%arg0: i32) -> (i32, i32) {
    %c0_i32 = arith.constant 0 : i32
    %c0_i32_0 = arith.constant 0 : i32
    %c0_i32_1 = arith.constant 0 : i32
    return %c0_i32, %c0_i32_0 : i32, i32
  }
  func.func @transform_7(%arg0: i32) -> (i32, i32) {
    %c0_i32 = arith.constant 0 : i32
    %c0_i32_0 = arith.constant 0 : i32
    %c0_i32_1 = arith.constant 0 : i32
    return %c0_i32, %c0_i32_0 : i32, i32
  }
  func.func @transform_8(%arg0: i32) -> (i32, i32) {
    %c0_i32 = arith.constant 0 : i32
    %c0_i32_0 = arith.constant 0 : i32
    %c0_i32_1 = arith.constant 0 : i32
    return %c0_i32, %c0_i32_0 : i32, i32
  }
  func.func @transform_9(%arg0: i32) -> (i32, i32) {
    %c0_i32 = arith.constant 0 : i32
    %c0_i32_0 = arith.constant 0 : i32
    return %arg0, %c0_i32 : i32, i32
  }
}

</mosaic_0001>

<bundles_post_ra>
// kernel: tpu_custom_call.1
= control target key start
LH: loop header
LB: loop body
LE: loop exit
PB: predicated region body
PF: predicated region fallthrough
CT: control target
= control target key end

     0   :  { %14 = vsyncpa [#allocation3], 0  ;;  %s5640_s0 = inlined_call_operand.vmem [shape: f32[256,8], index: 0, kind: input, shape index: {}]   ;;  %s5641_s1 = inlined_call_operand.vmem [shape: f32[8,128], index: 1, kind: input, shape index: {}]   ;;  %s5642_s2 = inlined_call_operand.vmem [shape: f32[1,128], index: 2, kind: input, shape index: {}]   ;;  %s5643_s3 = inlined_call_operand.vmem [shape: f32[128,128], index: 3, kind: input, shape index: {}]   ;;  %s5644_s4 = inlined_call_operand.vmem [shape: f32[1,128], index: 4, kind: input, shape index: {}]   ;;  %s5645_s5 = inlined_call_operand.vmem [shape: f32[128,128], index: 5, kind: input, shape index: {}]   ;;  %s5646_s6 = inlined_call_operand.vmem [shape: f32[1,128], index: 6, kind: input, shape index: {}]   ;;  %s5647_s7 = inlined_call_operand.hbm [shape: f32[128,128], index: 7, kind: input, shape index: {}]   ;;  %s5648_s8 = inlined_call_operand.vmem [shape: f32[1,128], index: 8, kind: input, shape index: {}]   ;;  %s5649_s9 = inlined_call_operand.hbm [shape: f32[256,128], index: 9, kind: output, shape index: {}]  }
   0x1   :  { %15 = vsyncpa [#allocation4], 0 }
   0x2   :  { %17 = vsyncpa [#allocation4 + $0x1], 0  ;;  %s3890_s30 = smov 0   ;;  %s3892_s10 = smov 0  }
   0x3   :  { %s3894_s11 = smov 0   ;;  %s3896_s12 = smov 0  }
   0x4 LB: > { %s3911_s13 = sadd.s32 4294967295, %s3833_s12   ;;  %s3664_s14 = sadd.s32 4294967294, %s3833_s12   ;;  %s3833_s12 = sphi %s3896_s12, %s5797_s12   ;;  %s3829_s11 = sphi %s3894_s11, %s5796_s11   ;;  %s3825_s10 = sphi %s3892_s10, %s5795_s10   ;;  %s3821_s30 = sphi %s3890_s30, %s5794_s30  }
   0x5   : > { %s3915_s15 = sadd.s32 1, %s3833_s12   ;;  %s224_s16 = sadd.s32 1, %s3829_s11 }
   0x6   : > { %s221_s17 = ssub.s32 %s3833_s12, %s3915_s15  ;;  %p234_p0 = scmp.ne.s32.totalorder %s3829_s11, %s3825_s10 }
   0x7   : > { %p222_p1 = scmp.eq.s32.totalorder %s221_s17, 0  ;;  %p235_p2 = scmp.eq.s32.totalorder %s3911_s13, 1 }
   0x8   : > { %p240_p3 = scmp.ne.s32.totalorder %s3825_s10, %s3821_s30  ;;  %p241_p4 = scmp.eq.s32.totalorder %s3664_s14, 1 }
   0x9   : > { %s3926_s18 = scalar_select %p222_p1, %s3829_s11, %s224_s16  }
   0xa   : > { %p3928_p5 = por %p235_p2, %p234_p0  ;;  %p3932_p6 = por %p241_p4, %p240_p3 }
   0xb   : > { %p3665_p7 = scmp.ge.s32.totalorder %s3833_s12, 1  ;;  %p248_p8 = scmp.lt.s32.totalorder %s3833_s12, 3 }
   0xc   : > { %p3693_p9 = scmp.eq.s32.totalorder %s3911_s13, 0  ;;  %s277_s23 = sshll.u32 %s5647_s7, 4  ;;  %s278_s23 = int_to_ptr.hbm [resolvable:$true] %s277_s23 }
   0xd   : > { %p249_p10 = pnand %p3665_p7, %p248_p8  ;;  %s3835_s24 = smov [#allocation2]  }
   0xe   : > { %s279_s25 = sshll.u32 %s3835_s24, 4  ;;  %s3836_s26 = smov 128   ;;  %s280_s25 = int_to_ptr.vmem [resolvable:$true] %s279_s25 }
   0xf   : > { %p3685_p11 = pneg %p249_p10  ;;  %s3837_s27 = smov 8  }
  0x10   : > { %307 = sbr.rel (%p249_p10) target bundleno = 1244 (0x4dc), region = 56 }
  0x11   : > { %p3686_p12 = pnand %p3693_p9, %p3685_p11 }
  0x13   : > { %3688 = dma.hbm_to_vmem [thread:$0]  (!%p3686_p12), %s278_s23, 2048, %s280_s25, [#allocation3], %s3836_s26, %s3836_s26, %s3837_s27  }
  0x15   : > { %3812 = dma.done.wait (%p3693_p9), [#allocation3], 2048  }
  0x16   : > { %3814 = vsyncadd (%p3693_p9), [#allocation3], 4294965248  ;;  %s3671_s28 = sshll.u32 %s3911_s13, 4  ;;  %vm372_vm0 = vcmask 64512   ;;  %v367_v0 = vld [vmem:[%s5641_s1] sm:$0xff]  ;;  %s341_s23 = sand.u32 1, %s3825_s10  }
  0x17   : > { %p345_p13 = scmp.lt.s32.totalorder %s3671_s28, 31  ;;  %v436_v3 = vand.u32 4294901760, %v367_v0  ;;  %s3670_s24 = sshll.u32 %s341_s23, 7 }
  0x18   : > { %s5574_s25 = scalar_lea.vmem [#allocation5], %s3670_s24  ;;  %s3678_s26 = sshll.u32 %s3911_s13, 7 }
  0x19   : > { %s5799_s28 = smov (!%p345_p13, %s3671_s28), 31  ;;  %v583_v9 = vsub.f32 %v367_v0, %v436_v3  ;;  %437 = vmatpush.msra.mxu0 %v436_v3  ;;  %768 = vmatpush.msra.mxu3 %v436_v3  ;;  %s3587_s14 = sshll.u32 %s5574_s25, 4  ;;  %s3588_s14 = int_to_ptr.vmem [resolvable:$true] %s3587_s14 }
  0x1a   : > { %s3672_s29 = sshll.u32 %s5799_s28, 3  ;;  %s3575_s13 = scalar_lea.sflag [#allocation4], %s341_s23 }
  0x1b   : > { %s3952_s17 = scalar_lea.vmem %s5640_s0, %s3672_s29  ;;  %670 = vmatpush.msra.mxu2 %v583_v9  ;;  %v584_v12 = vand.u32 4294901760, %v583_v9  ;;  %s3586_s29 = scalar_lea.hbm %s5649_s9, %s3678_s26 }
  0x1c   : > { %v351_v1 = vld [vmem:[%s3952_s17] sm:$0xff]  ;;  %v352_v2 = vld [vmem:[%s3952_s17 + $0x8] sm:$0xff]  ;;  %v353_v8 = vld [vmem:[%s3952_s17 + $0x10] sm:$0xff]  ;;  %s3589_s16 = sshll.u32 %s3586_s29, 4  ;;  %s3787_s26 = scalar_lea.hbm %s5649_s9, 256  ;;  %s3590_s16 = int_to_ptr.hbm [resolvable:$true] %s3589_s16 }
  0x1d   : > { %v374_v4 = vsel %vm372_vm0, %v351_v1, 0  ;;  %v377_v5 = vsel %vm372_vm0, %v352_v2, 0  ;;  %v380_v13 = vsel %vm372_vm0, %v353_v8, 0  ;;  %884 = vmatpush.msrb.mxu0 %v584_v12  ;;  %v585_v15 = vsub.f32 %v583_v9, %v584_v12  ;;  %v354_v21 = vld [vmem:[%s3952_s17 + $0x18] sm:$0xff]  ;;  %v355_v28 = vld [vmem:[%s3952_s17 + $0x20] sm:$0xff]  ;;  %v356_v35 = vld [vmem:[%s3952_s17 + $0x28] sm:$0xff] }
  0x1e   : > { %v3961_v6 = vand.u32 4294901760, %v374_v4  ;;  %v3963_v7 = vand.u32 4294901760, %v377_v5  ;;  %v3969_v18 = vand.u32 4294901760, %v380_v13  ;;  %v383_v24 = vsel %vm372_vm0, %v354_v21, 0  ;;  %v357_v42 = vld [vmem:[%s3952_s17 + $0x30] sm:$0xff]  ;;  %v358_v49 = vld [vmem:[%s3952_s17 + $0x38] sm:$0xff] }
  0x1f   : > { %v586_v19 = vand.u32 4294901760, %v585_v15  ;;  %v3975_v27 = vand.u32 4294901760, %v383_v24  ;;  %v386_v31 = vsel %vm372_vm0, %v355_v28, 0  ;;  %v389_v38 = vsel %vm372_vm0, %v356_v35, 0  ;;  %v359_v56 = vld [vmem:[%s3952_s17 + $0x40] sm:$0xff]  ;;  %v360_v63 = vld [vmem:[%s3952_s17 + $0x48] sm:$0xff] }
  0x20   : > { %v439_v10 = vsub.f32 %v374_v4, %v3961_v6  ;;  %v447_v11 = vsub.f32 %v377_v5, %v3963_v7  ;;  %v455_v23 = vsub.f32 %v380_v13, %v3969_v18  ;;  %v3981_v34 = vand.u32 4294901760, %v386_v31  ;;  %v361_v8 = vld [vmem:[%s3952_s17 + $0x50] sm:$0xff]  ;;  %v362_v15 = vld [vmem:[%s3952_s17 + $0x58] sm:$0xff] }
  0x21   : > { %587 = vmatpush.msra.mxu1 %v586_v19  ;;  %v463_v30 = vsub.f32 %v383_v24, %v3975_v27  ;;  %v3987_v41 = vand.u32 4294901760, %v389_v38  ;;  %v392_v45 = vsel %vm372_vm0, %v357_v42, 0  ;;  %v395_v52 = vsel %vm372_vm0, %v358_v49, 0 }
  0x22   : > { %673 = vmatmul.f32.vlgmr.msra.gmra.mxu2 %v439_v10  ;;  %v440_v14 = vand.u32 4294901760, %v439_v10  ;;  %v448_v17 = vand.u32 4294901760, %v447_v11  ;;  %589 = vmatmul.f32.vlgmr.msra.gmra.mxu1 %v3961_v6  ;;  %v456_v26 = vand.u32 4294901760, %v455_v23  ;;  %v471_v37 = vsub.f32 %v386_v31, %v3981_v34  ;;  %v364_v31 = vld [vmem:[%s3952_s17 + $0x68] sm:$0xff] }
  0x23   : > { %966 = vmatpush.msrb.mxu1 %v436_v3  ;;  %v464_v33 = vand.u32 4294901760, %v463_v30  ;;  %v479_v44 = vsub.f32 %v389_v38, %v3987_v41  ;;  %v3993_v48 = vand.u32 4294901760, %v392_v45  ;;  %v3999_v55 = vand.u32 4294901760, %v395_v52 }
  0x24   : > { %v441_v16 = vsub.f32 %v439_v10, %v440_v14  ;;  %772 = vmatmul.f32.vlgmr.msra.gmra.mxu3 %v440_v14  ;;  %v449_v22 = vsub.f32 %v447_v11, %v448_v17  ;;  %v457_v29 = vsub.f32 %v455_v23, %v456_v26  ;;  %v472_v40 = vand.u32 4294901760, %v471_v37 }
  0x25   : > { %v465_v36 = vsub.f32 %v463_v30, %v464_v33  ;;  %v480_v47 = vand.u32 4294901760, %v479_v44  ;;  %v487_v51 = vsub.f32 %v392_v45, %v3993_v48  ;;  %v495_v58 = vsub.f32 %v395_v52, %v3999_v55 }
  0x26   : > { %v442_v20 = vand.u32 4294901760, %v441_v16  ;;  %v450_v25 = vand.u32 4294901760, %v449_v22  ;;  %v458_v32 = vand.u32 4294901760, %v457_v29  ;;  %v473_v43 = vsub.f32 %v471_v37, %v472_v40 }
  0x27   : > { %v466_v39 = vand.u32 4294901760, %v465_v36  ;;  %v481_v50 = vsub.f32 %v479_v44, %v480_v47  ;;  %v488_v54 = vand.u32 4294901760, %v487_v51  ;;  %v398_v59 = vsel %vm372_vm0, %v359_v56, 0 }
  0x28   : > { %443 = vmatmul.f32.vlgmr.msra.gmra.mxu0 %v442_v20  ;;  %v474_v46 = vand.u32 4294901760, %v473_v43  ;;  %v496_v61 = vand.u32 4294901760, %v495_v58  ;;  %v4005_v62 = vand.u32 4294901760, %v398_v59  ;;  %v401_v2 = vsel %vm372_vm0, %v360_v63, 0 }
  0x29   : > { %v482_v53 = vand.u32 4294901760, %v481_v50  ;;  %v489_v57 = vsub.f32 %v487_v51, %v488_v54  ;;  %v4011_v5 = vand.u32 4294901760, %v401_v2  ;;  %v407_v19 = vsel %vm372_vm0, %v362_v15, 0 }
  0x2a   : > { %678 = vmatmul.f32.gmra.mxu2 %v447_v11  ;;  %593 = vmatmul.f32.gmra.mxu1 %v3963_v7  ;;  %v497_v0 = vsub.f32 %v495_v58, %v496_v61  ;;  %v503_v1 = vsub.f32 %v398_v59, %v4005_v62  ;;  %v404_v11 = vsel %vm372_vm0, %v361_v8, 0  ;;  %v4023_v22 = vand.u32 4294901760, %v407_v19 }
  0x2b   : > { %v490_v60 = vand.u32 4294901760, %v489_v57  ;;  %v511_v10 = vsub.f32 %v401_v2, %v4011_v5  ;;  %v4017_v14 = vand.u32 4294901760, %v404_v11  ;;  %v413_v35 = vsel %vm372_vm0, %v364_v31, 0 }
  0x2c   : > { %778 = vmatmul.f32.gmra.mxu3 %v448_v17  ;;  %v498_v3 = vand.u32 4294901760, %v497_v0  ;;  %v504_v4 = vand.u32 4294901760, %v503_v1  ;;  %v4035_v38 = vand.u32 4294901760, %v413_v35 }
  0x2d   : > { %v512_v13 = vand.u32 4294901760, %v511_v10  ;;  %v519_v17 = vsub.f32 %v404_v11, %v4017_v14 }
  0x2e   : > { %v505_v9 = vsub.f32 %v503_v1, %v504_v4  ;;  %v543_v42 = vsub.f32 %v413_v35, %v4035_v38  ;;  %v1059_v35 = vld [vmem:[%s5643_s3 + $0x58] sm:$0xff] }
  0x2f   : > { %v513_v16 = vsub.f32 %v511_v10, %v512_v13  ;;  %v520_v21 = vand.u32 4294901760, %v519_v17 }
  0x30   : > { %451 = vmatmul.f32.gmra.mxu0 %v450_v25  ;;  %v506_v12 = vand.u32 4294901760, %v505_v9  ;;  %v527_v25 = vsub.f32 %v407_v19, %v4023_v22  ;;  %v544_v45 = vand.u32 4294901760, %v543_v42 }
  0x31   : > { %v514_v20 = vand.u32 4294901760, %v513_v16  ;;  %v521_v24 = vsub.f32 %v519_v17, %v520_v21  ;;  %v1061_v16 = vld [vmem:[%s5643_s3 + $0x68] sm:$0xff] }
  0x32   : > { %683 = vmatmul.f32.gmra.mxu2 %v455_v23  ;;  %597 = vmatmul.f32.gmra.mxu1 %v3969_v18  ;;  %v363_v23 = vld [vmem:[%s3952_s17 + $0x60] sm:$0xff]  ;;  %v528_v29 = vand.u32 4294901760, %v527_v25  ;;  %v545_v49 = vsub.f32 %v543_v42, %v544_v45  ;;  %v4090_v19 = vand.u32 4294901760, %v1061_v16 }
  0x33   : > { %v522_v28 = vand.u32 4294901760, %v521_v24 }
  0x34   : > { %784 = vmatmul.f32.gmra.mxu3 %v456_v26  ;;  %v410_v26 = vsel %vm372_vm0, %v363_v23, 0  ;;  %v546_v52 = vand.u32 4294901760, %v545_v49 }
  0x38   : > { %459 = vmatmul.f32.gmra.mxu0 %v458_v32  ;;  %v529_v32 = vsub.f32 %v527_v25, %v528_v29 }
  0x3a   : > { %688 = vmatmul.f32.gmra.mxu2 %v463_v30  ;;  %601 = vmatmul.f32.gmra.mxu1 %v3975_v27  ;;  %v4029_v30 = vand.u32 4294901760, %v410_v26  ;;  %v530_v36 = vand.u32 4294901760, %v529_v32 }
  0x3c   : > { %790 = vmatmul.f32.gmra.mxu3 %v464_v33  ;;  %v535_v33 = vsub.f32 %v410_v26, %v4029_v30 }
  0x40   : > { %467 = vmatmul.f32.gmra.mxu0 %v466_v39  ;;  %v365_v39 = vld [vmem:[%s3952_s17 + $0x70] sm:$0xff] }
  0x41   : > { %v416_v43 = vsel %vm372_vm0, %v365_v39, 0 }
  0x42   : > { %693 = vmatmul.f32.gmra.mxu2 %v471_v37  ;;  %605 = vmatmul.f32.gmra.mxu1 %v3981_v34  ;;  %v536_v37 = vand.u32 4294901760, %v535_v33 }
  0x44   : > { %796 = vmatmul.f32.gmra.mxu3 %v472_v40  ;;  %v537_v40 = vsub.f32 %v535_v33, %v536_v37 }
  0x48   : > { %475 = vmatmul.f32.gmra.mxu0 %v474_v46  ;;  %v4041_v46 = vand.u32 4294901760, %v416_v43 }
  0x4a   : > { %698 = vmatmul.f32.gmra.mxu2 %v479_v44  ;;  %609 = vmatmul.f32.gmra.mxu1 %v3987_v41  ;;  %v538_v44 = vand.u32 4294901760, %v537_v40  ;;  %v551_v50 = vsub.f32 %v416_v43, %v4041_v46 }
  0x4c   : > { %802 = vmatmul.f32.gmra.mxu3 %v480_v47  ;;  %v366_v47 = vld [vmem:[%s3952_s17 + $0x78] sm:$0xff]  ;;  %s3781_s17 = sshra.s32 %s3590_s16, 4  ;;  %s3782_s17 = int_to_ptr.hbm [resolvable:$true] %s3781_s17 }
  0x4d   : > { %s3783_s21 = scalar_lea.hbm %s3782_s17, 128  ;;  %p3788_p3 = scmp.lt.s32.totalorder %s3782_s17, %s5649_s9 }
  0x4e   : > { %p3784_p0 = scmp.ne.s32.totalorder %s3782_s17, %s3783_s21  ;;  %p3789_p4 = scmp.lt.s32.totalorder %s3787_s26, %s3783_s21 }
  0x50   : > { %483 = vmatmul.f32.gmra.mxu0 %v482_v53  ;;  %v552_v53 = vand.u32 4294901760, %v551_v50  ;;  %p3785_p1 = pnand %p3784_p0, %p3928_p5  ;;  %p3790_p7 = por %p3789_p4, %p3788_p3 }
  0x52   : > { %703 = vmatmul.f32.gmra.mxu2 %v487_v51  ;;  %613 = vmatmul.f32.gmra.mxu1 %v3993_v48  ;;  %v419_v51 = vsel %vm372_vm0, %v366_v47, 0  ;;  %v553_v56 = vsub.f32 %v551_v50, %v552_v53  ;;  %p3786_p2 = pneg %p3785_p1 }
  0x54   : > { %808 = vmatmul.f32.gmra.mxu3 %v488_v54  ;;  %v4047_v54 = vand.u32 4294901760, %v419_v51  ;;  %p3791_p8 = pnand %p3790_p7, %p3786_p2 }
  0x56   : > { %v559_v57 = vsub.f32 %v419_v51, %v4047_v54 }
  0x58   : > { %491 = vmatmul.f32.gmra.mxu0 %v490_v60  ;;  %v560_v59 = vand.u32 4294901760, %v559_v57  ;;  %v1063_v60 = vld [vmem:[%s5643_s3 + $0x78] sm:$0xff] }
  0x5a   : > { %708 = vmatmul.f32.gmra.mxu2 %v495_v58  ;;  %617 = vmatmul.f32.gmra.mxu1 %v3999_v55  ;;  %v554_v58 = vand.u32 4294901760, %v553_v56  ;;  %v561_v63 = vsub.f32 %v559_v57, %v560_v59 }
  0x5c   : > { %814 = vmatmul.f32.gmra.mxu3 %v496_v61  ;;  %v4054_v61 = vand.u32 4294901760, %v1063_v60  ;;  %v562_v2 = vand.u32 4294901760, %v561_v63 }
  0x5e   : > { %1069 = vmatpush.msrb.mxu2 %v4054_v61  ;;  %v4059_v0 = vsub.f32 %v1063_v60, %v4054_v61  ;;  %1520 = vmatpush.msra.mxu1 %v4054_v61 }
  0x60   : > { %499 = vmatmul.f32.gmra.mxu0 %v498_v3 }
  0x61   : > { %1392 = vmatpush.msra.mxu0 %v4059_v0 }
  0x62   : > { %713 = vmatmul.f32.gmra.mxu2 %v503_v1  ;;  %621 = vmatmul.f32.gmra.mxu1 %v4005_v62  ;;  %v5662_v1 = vand.u32 4294901760, %v4059_v0 }
  0x64   : > { %820 = vmatmul.f32.gmra.mxu3 %v504_v4  ;;  %v1232_v3 = vsub.f32 %v4059_v0, %v5662_v1  ;;  %v1062_v4 = vld [vmem:[%s5643_s3 + $0x70] sm:$0xff] }
  0x65   : > { %v4070_v9 = vand.u32 4294901760, %v1062_v4 }
  0x66   : > { %v1233_v8 = vand.u32 4294901760, %v1232_v3 }
  0x67   : > { %1071 = vmatpush.msrb.mxu2 %v4070_v9  ;;  %1522 = vmatpush.msra.mxu1 %v4070_v9 }
  0x68   : > { %507 = vmatmul.f32.gmra.mxu0 %v506_v12  ;;  %1234 = vmatpush.msrb.mxu3 %v1233_v8 }
  0x69   : > { %1073 = vmatpush.msrb.mxu2 %v4090_v19  ;;  %1524 = vmatpush.msra.mxu1 %v4090_v19 }
  0x6a   : > { %718 = vmatmul.f32.gmra.mxu2 %v511_v10  ;;  %625 = vmatmul.f32.gmra.mxu1 %v4011_v5  ;;  %v4075_v10 = vsub.f32 %v1062_v4, %v4070_v9 }
  0x6c   : > { %826 = vmatmul.f32.gmra.mxu3 %v512_v13  ;;  %v5661_v11 = vand.u32 4294901760, %v4075_v10  ;;  %1395 = vmatpush.msra.mxu0 %v4075_v10 }
  0x6e   : > { %v1238_v15 = vsub.f32 %v4075_v10, %v5661_v11 }
  0x70   : > { %515 = vmatmul.f32.gmra.mxu0 %v514_v20  ;;  %v4096_v20 = vsub.f32 %v1061_v16, %v4090_v19 }
  0x72   : > { %723 = vmatmul.f32.gmra.mxu2 %v519_v17  ;;  %629 = vmatmul.f32.gmra.mxu1 %v4017_v14  ;;  %v1239_v17 = vand.u32 4294901760, %v1238_v15 }
  0x73   : > { %1398 = vmatpush.msra.mxu0 %v4096_v20 }
  0x74   : > { %832 = vmatmul.f32.gmra.mxu3 %v520_v21  ;;  %v5659_v21 = vand.u32 4294901760, %v4096_v20 }
  0x75   : > { %1240 = vmatpush.msrb.mxu3 %v1239_v17 }
  0x78   : > { %523 = vmatmul.f32.gmra.mxu0 %v522_v28 }
  0x7a   : > { %728 = vmatmul.f32.gmra.mxu2 %v527_v25  ;;  %633 = vmatmul.f32.gmra.mxu1 %v4023_v22  ;;  %v1060_v25 = vld [vmem:[%s5643_s3 + $0x60] sm:$0xff] }
  0x7b   : > { %v4111_v28 = vand.u32 4294901760, %v1060_v25 }
  0x7c   : > { %838 = vmatmul.f32.gmra.mxu3 %v528_v29 }
  0x7d   : > { %1075 = vmatpush.msrb.mxu2 %v4111_v28  ;;  %v4117_v29 = vsub.f32 %v1060_v25, %v4111_v28  ;;  %1526 = vmatpush.msra.mxu1 %v4111_v28 }
  0x7f   : > { %v5658_v31 = vand.u32 4294901760, %v4117_v29  ;;  %1401 = vmatpush.msra.mxu0 %v4117_v29 }
  0x80   : > { %531 = vmatmul.f32.gmra.mxu0 %v530_v36 }
  0x82   : > { %733 = vmatmul.f32.gmra.mxu2 %v535_v33  ;;  %637 = vmatmul.f32.gmra.mxu1 %v4029_v30 }
  0x84   : > { %844 = vmatmul.f32.gmra.mxu3 %v536_v37  ;;  %v4132_v37 = vand.u32 4294901760, %v1059_v35 }
  0x86   : > { %1077 = vmatpush.msrb.mxu2 %v4132_v37  ;;  %v4138_v39 = vsub.f32 %v1059_v35, %v4132_v37  ;;  %1528 = vmatpush.msra.mxu1 %v4132_v37 }
  0x88   : > { %539 = vmatmul.f32.gmra.mxu0 %v538_v44  ;;  %v5657_v40 = vand.u32 4294901760, %v4138_v39  ;;  %v1058_v44 = vld [vmem:[%s5643_s3 + $0x50] sm:$0xff] }
  0x89   : > { %1404 = vmatpush.msra.mxu0 %v4138_v39  ;;  %v4153_v47 = vand.u32 4294901760, %v1058_v44 }
  0x8a   : > { %738 = vmatmul.f32.gmra.mxu2 %v543_v42  ;;  %641 = vmatmul.f32.gmra.mxu1 %v4035_v38 }
  0x8b   : > { %1079 = vmatpush.msrb.mxu2 %v4153_v47  ;;  %v4159_v49 = vsub.f32 %v1058_v44, %v4153_v47  ;;  %1530 = vmatpush.msra.mxu1 %v4153_v47  ;;  %v1054_v44 = vld [vmem:[%s5643_s3 + $0x30] sm:$0xff] }
  0x8c   : > { %850 = vmatmul.f32.gmra.mxu3 %v544_v45 }
  0x8d   : > { %1407 = vmatpush.msra.mxu0 %v4159_v49 }
  0x90   : > { %547 = vmatmul.f32.gmra.mxu0 %v546_v52 }
  0x92   : > { %743 = vmatmul.f32.gmra.mxu2 %v551_v50  ;;  %645 = vmatmul.f32.gmra.mxu1 %v4041_v46  ;;  %v5656_v50 = vand.u32 4294901760, %v4159_v49 }
  0x94   : > { %856 = vmatmul.f32.gmra.mxu3 %v552_v53  ;;  %v1057_v53 = vld [vmem:[%s5643_s3 + $0x48] sm:$0xff] }
  0x98   : > { %555 = vmatmul.f32.gmra.mxu0 %v554_v58 }
  0x9a   : > { %748 = vmatmul.f32.gmra.mxu2 %v559_v57  ;;  %649 = vmatmul.f32.gmra.mxu1 %v4047_v54  ;;  %v4174_v57 = vand.u32 4294901760, %v1057_v53 }
  0x9c   : > { %862 = vmatmul.f32.gmra.mxu3 %v560_v59  ;;  %1081 = vmatpush.msrb.mxu2 %v4174_v57  ;;  %v4180_v58 = vsub.f32 %v1057_v53, %v4174_v57 }
  0x9d   : > { %1532 = vmatpush.msra.mxu1 %v4174_v57 }
  0x9e   : > { %v5654_v59 = vand.u32 4294901760, %v4180_v58  ;;  %1410 = vmatpush.msra.mxu0 %v4180_v58 }
  0x9f   : > { %v4082_v13 = vpop.f32.mrf.mxu1 }
  0xa0   : > { %563 = vmatmul.f32.gmra.mxu0 %v562_v2  ;;  %v1056_v2 = vld [vmem:[%s5643_s3 + $0x40] sm:$0xff] }
  0xa1   : > { %v4195_v4 = vand.u32 4294901760, %v1056_v2 }
  0xa2   : > { %968 = vmatmul.f32.vlgmr.msrb.gmra.mxu1 %v3961_v6 }
  0xa3   : > { %1083 = vmatpush.msrb.mxu2 %v4195_v4  ;;  %v4201_v8 = vsub.f32 %v1056_v2, %v4195_v4  ;;  %1534 = vmatpush.msra.mxu1 %v4195_v4 }
  0xa5   : > { %v4080_v12 = vpop.f32.mrf.mxu0  ;;  %v5653_v15 = vand.u32 4294901760, %v4201_v8  ;;  %1413 = vmatpush.msra.mxu0 %v4201_v8 }
  0xa7   : > { %v4103_v24 = vpop.f32.mrf.mxu1  ;;  %v4336_v1 = vpop.f32.mrf.mxu3 }
  0xa8   : > { %886 = vmatmul.f32.vlgmr.msrb.gmra.mxu0 %v3961_v6  ;;  %v1244_v6 = vsub.f32 %v4096_v20, %v5659_v21  ;;  %v1049_v21 = vld [vmem:[%s5643_s3 + $0x8] sm:$0xff] }
  0xa9   : > { %v4334_v11 = vand.u32 4294901760, %v1049_v21 }
  0xaa   : > { %v1245_v26 = vand.u32 4294901760, %v1244_v6  ;;  %972 = vmatmul.f32.gmra.mxu1 %v3963_v7  ;;  %v1055_v6 = vld [vmem:[%s5643_s3 + $0x38] sm:$0xff] }
  0xac   : > { %1246 = vmatpush.msrb.mxu3 %v1245_v26  ;;  %v4216_v26 = vand.u32 4294901760, %v1055_v6 }
  0xad   : > { %v4101_v23 = vpop.f32.mrf.mxu0 }
  0xae   : > { %1085 = vmatpush.msrb.mxu2 %v4216_v26  ;;  %1536 = vmatpush.msra.mxu1 %v4216_v26 }
  0xaf   : > { %v4124_v33 = vpop.f32.mrf.mxu1 }
  0xb0   : > { %890 = vmatmul.f32.gmra.mxu0 %v3963_v7  ;;  %v1250_v7 = vsub.f32 %v4117_v29, %v5658_v31 }
  0xb2   : > { %v1251_v36 = vand.u32 4294901760, %v1250_v7  ;;  %976 = vmatmul.f32.gmra.mxu1 %v3969_v18  ;;  %v4222_v7 = vsub.f32 %v1055_v6, %v4216_v26 }
  0xb4   : > { %1252 = vmatpush.msrb.mxu3 %v1251_v36  ;;  %v5652_v35 = vand.u32 4294901760, %v4222_v7  ;;  %1416 = vmatpush.msra.mxu0 %v4222_v7 }
  0xb5   : > { %v4122_v32 = vpop.f32.mrf.mxu0 }
  0xb7   : > { %v4145_v43 = vpop.f32.mrf.mxu1 }
  0xb8   : > { %894 = vmatmul.f32.gmra.mxu0 %v3969_v18  ;;  %v1256_v18 = vsub.f32 %v4138_v39, %v5657_v40 }
  0xba   : > { %v1257_v45 = vand.u32 4294901760, %v1256_v18  ;;  %980 = vmatmul.f32.gmra.mxu1 %v3975_v27 }
  0xbc   : > { %1258 = vmatpush.msrb.mxu3 %v1257_v45 }
  0xbd   : > { %v4143_v42 = vpop.f32.mrf.mxu0 }
  0xbf   : > { %v4166_v52 = vpop.f32.mrf.mxu1 }
  0xc0   : > { %898 = vmatmul.f32.gmra.mxu0 %v3975_v27  ;;  %v1262_v27 = vsub.f32 %v4159_v49, %v5656_v50 }
  0xc2   : > { %v1263_v56 = vand.u32 4294901760, %v1262_v27  ;;  %984 = vmatmul.f32.gmra.mxu1 %v3981_v34  ;;  %v4237_v27 = vand.u32 4294901760, %v1054_v44 }
  0xc4   : > { %1264 = vmatpush.msrb.mxu3 %v1263_v56  ;;  %1087 = vmatpush.msrb.mxu2 %v4237_v27  ;;  %v4243_v53 = vsub.f32 %v1054_v44, %v4237_v27 }
  0xc5   : > { %v4164_v51 = vpop.f32.mrf.mxu0  ;;  %1538 = vmatpush.msra.mxu1 %v4237_v27 }
  0xc6   : > { %v5650_v56 = vand.u32 4294901760, %v4243_v53  ;;  %1419 = vmatpush.msra.mxu0 %v4243_v53 }
  0xc7   : > { %v4187_v63 = vpop.f32.mrf.mxu1 }
  0xc8   : > { %902 = vmatmul.f32.gmra.mxu0 %v3981_v34  ;;  %v1268_v34 = vsub.f32 %v4180_v58, %v5654_v59 }
  0xca   : > { %v1269_v3 = vand.u32 4294901760, %v1268_v34  ;;  %988 = vmatmul.f32.gmra.mxu1 %v3987_v41 }
  0xcc   : > { %1270 = vmatpush.msrb.mxu3 %v1269_v3  ;;  %v1053_v3 = vld [vmem:[%s5643_s3 + $0x28] sm:$0xff] }
  0xcd   : > { %v4185_v60 = vpop.f32.mrf.mxu0  ;;  %v4258_v6 = vand.u32 4294901760, %v1053_v3 }
  0xcf   : > { %v4208_v17 = vpop.f32.mrf.mxu1  ;;  %1089 = vmatpush.msrb.mxu2 %v4258_v6  ;;  %1540 = vmatpush.msra.mxu1 %v4258_v6 }
  0xd0   : > { %906 = vmatmul.f32.gmra.mxu0 %v3987_v41  ;;  %v1274_v41 = vsub.f32 %v4201_v8, %v5653_v15 }
  0xd2   : > { %v1275_v25 = vand.u32 4294901760, %v1274_v41  ;;  %992 = vmatmul.f32.gmra.mxu1 %v3993_v48 }
  0xd4   : > { %1276 = vmatpush.msrb.mxu3 %v1275_v25  ;;  %v4264_v25 = vsub.f32 %v1053_v3, %v4258_v6 }
  0xd5   : > { %v4206_v16 = vpop.f32.mrf.mxu0 }
  0xd6   : > { %1422 = vmatpush.msra.mxu0 %v4264_v25 }
  0xd7   : > { %v4229_v18 = vpop.f32.mrf.mxu1 }
  0xd8   : > { %910 = vmatmul.f32.gmra.mxu0 %v3993_v48  ;;  %5696 = vst [vmem:[#allocation8_spill] sm:$0xff] %v4229_v18  ;;  %v1280_v48 = vsub.f32 %v4222_v7, %v5652_v35 }
  0xda   : > { %v1281_v45 = vand.u32 4294901760, %v1280_v48  ;;  %996 = vmatmul.f32.gmra.mxu1 %v3999_v55  ;;  %v5651_v48 = vand.u32 4294901760, %v4264_v25 }
  0xdc   : > { %1282 = vmatpush.msrb.mxu3 %v1281_v45 }
  0xdd   : > { %v4227_v36 = vpop.f32.mrf.mxu0 }
  0xdf   : > { %v4250_v2 = vpop.f32.mrf.mxu1 }
  0xe0   : > { %914 = vmatmul.f32.gmra.mxu0 %v3999_v55  ;;  %5698 = vst [vmem:[#allocation10_spill] sm:$0xff] %v4250_v2  ;;  %v1286_v55 = vsub.f32 %v4243_v53, %v5650_v56  ;;  %v779_v2 = vpop.f32.mrf.mxu3 }
  0xe2   : > { %v1287_v41 = vand.u32 4294901760, %v1286_v55  ;;  %1000 = vmatmul.f32.gmra.mxu1 %v4005_v62  ;;  %v1052_v55 = vld [vmem:[%s5643_s3 + $0x20] sm:$0xff] }
  0xe4   : > { %1288 = vmatpush.msrb.mxu3 %v1287_v41  ;;  %v4279_v41 = vand.u32 4294901760, %v1052_v55 }
  0xe5   : > { %v4248_v34 = vpop.f32.mrf.mxu0 }
  0xe6   : > { %5697 = vst [vmem:[#allocation9_spill] sm:$0xff] %v4248_v34  ;;  %1091 = vmatpush.msrb.mxu2 %v4279_v41  ;;  %v4285_v56 = vsub.f32 %v1052_v55, %v4279_v41  ;;  %1542 = vmatpush.msra.mxu1 %v4279_v41 }
  0xe7   : > { %v4271_v45 = vpop.f32.mrf.mxu1 }
  0xe8   : > { %918 = vmatmul.f32.gmra.mxu0 %v4005_v62  ;;  %5700 = vst [vmem:[#allocation12_spill] sm:$0xff] %v4271_v45  ;;  %v1292_v62 = vsub.f32 %v4264_v25, %v5651_v48  ;;  %v5655_v48 = vand.u32 4294901760, %v4285_v56 }
  0xe9   : > { %1425 = vmatpush.msra.mxu0 %v4285_v56 }
  0xea   : > { %v1293_v3 = vand.u32 4294901760, %v1292_v62  ;;  %1004 = vmatmul.f32.gmra.mxu1 %v4011_v5 }
  0xec   : > { %1294 = vmatpush.msrb.mxu3 %v1293_v3  ;;  %v1051_v3 = vld [vmem:[%s5643_s3 + $0x18] sm:$0xff] }
  0xed   : > { %v4269_v44 = vpop.f32.mrf.mxu0  ;;  %v4300_v15 = vand.u32 4294901760, %v1051_v3 }
  0xee   : > { %5699 = vst [vmem:[#allocation11_spill] sm:$0xff] %v4269_v44 }
  0xef   : > { %v4292_v62 = vpop.f32.mrf.mxu1  ;;  %1093 = vmatpush.msrb.mxu2 %v4300_v15  ;;  %v4306_v59 = vsub.f32 %v1051_v3, %v4300_v15  ;;  %1544 = vmatpush.msra.mxu1 %v4300_v15  ;;  %v1050_v3 = vld [vmem:[%s5643_s3 + $0x10] sm:$0xff] }
  0xf0   : > { %922 = vmatmul.f32.gmra.mxu0 %v4011_v5  ;;  %5702 = vst [vmem:[#allocation14_spill] sm:$0xff] %v4292_v62  ;;  %v1298_v5 = vsub.f32 %v4285_v56, %v5655_v48  ;;  %v4323_v31 = vand.u32 4294901760, %v1050_v3 }
  0xf1   : > { %v5660_v48 = vand.u32 4294901760, %v4306_v59  ;;  %1428 = vmatpush.msra.mxu0 %v4306_v59 }
  0xf2   : > { %v1299_v55 = vand.u32 4294901760, %v1298_v5  ;;  %1008 = vmatmul.f32.gmra.mxu1 %v4017_v14  ;;  %1095 = vmatpush.msrb.mxu2 %v4323_v31 }
  0xf3   : > { %1546 = vmatpush.msra.mxu1 %v4323_v31 }
  0xf4   : > { %1300 = vmatpush.msrb.mxu3 %v1299_v55  ;;  %v4318_v55 = vpop.f32.mrf.mxu2  ;;  %1097 = vmatpush.msrb.mxu2 %v4334_v11 }
  0xf5   : > { %v4290_v35 = vpop.f32.mrf.mxu0  ;;  %1548 = vmatpush.msra.mxu1 %v4334_v11 }
  0xf6   : > { %5701 = vst [vmem:[#allocation13_spill] sm:$0xff] %v4290_v35 }
  0xf7   : > { %v4313_v5 = vpop.f32.mrf.mxu1 }
  0xf8   : > { %926 = vmatmul.f32.gmra.mxu0 %v4017_v14  ;;  %5704 = vst [vmem:[#allocation16_spill] sm:$0xff] %v4313_v5  ;;  %v1304_v14 = vsub.f32 %v4306_v59, %v5660_v48  ;;  %v4332_v48 = vsub.f32 %v1050_v3, %v4323_v31 }
  0xfa   : > { %v1305_v40 = vand.u32 4294901760, %v1304_v14  ;;  %1012 = vmatmul.f32.gmra.mxu1 %v4023_v22  ;;  %v1048_v14 = vld [vmem:[%s5643_s3] sm:$0xff]  ;;  %1431 = vmatpush.msra.mxu0 %v4332_v48 }
  0xfb   : > { %v4348_v3 = vand.u32 4294901760, %v1048_v14 }
  0xfc   : > { %1306 = vmatpush.msrb.mxu3 %v1305_v40  ;;  %v4345_v40 = vsub.f32 %v1049_v21, %v4334_v11  ;;  %v5707_v21 = vand.u32 4294901760, %v4059_v0 }
  0xfd   : > { %v4311_v50 = vpop.f32.mrf.mxu0  ;;  %v4360_v45 = vsub.f32 %v1048_v14, %v4348_v3  ;;  %1099 = vmatpush.msrb.mxu2 %v4348_v3  ;;  %1550 = vmatpush.msra.mxu1 %v4348_v3  ;;  %v4372_v14 = vpop.f32.mrf.mxu2 }
  0xfe   : > { %5703 = vst [vmem:[#allocation15_spill] sm:$0xff] %v4311_v50  ;;  %v5664_v35 = vand.u32 4294901760, %v4345_v40  ;;  %1434 = vmatpush.msra.mxu0 %v4345_v40 }
  0xff   : > { %v4353_v50 = vpop.f32.mrf.mxu1  ;;  %1651 = vmatpush.msra.mxu2 %v5707_v21 }
 0x100   : > { %930 = vmatmul.f32.gmra.mxu0 %v4023_v22  ;;  %v5663_v22 = vand.u32 4294901760, %v4332_v48  ;;  %5706 = vst [vmem:[#allocation18_spill] sm:$0xff] %v4353_v50  ;;  %v1316_v50 = vsub.f32 %v4345_v40, %v5664_v35  ;;  %v5709_v35 = vand.u32 4294901760, %v4096_v20 }
 0x101   : > { %1437 = vmatpush.msra.mxu0 %v4360_v45 }
 0x102   : > { %v1310_v62 = vsub.f32 %v4332_v48, %v5663_v22  ;;  %v1321_v22 = vand.u32 4294901760, %v4360_v45  ;;  %1016 = vmatmul.f32.gmra.mxu1 %v4029_v30  ;;  %v1317_v44 = vand.u32 4294901760, %v1316_v50  ;;  %v5711_v50 = vand.u32 4294901760, %v4138_v39 }
 0x104   : > { %v1322_v0 = vsub.f32 %v4360_v45, %v1321_v22 }
 0x105   : > { %v4351_v5 = vpop.f32.mrf.mxu0  ;;  %v684_v20 = vpop.f32.mrf.mxu2 }
 0x106   : > { %5705 = vst [vmem:[#allocation17_spill] sm:$0xff] %v4351_v5  ;;  %v1311_v5 = vand.u32 4294901760, %v1310_v62  ;;  %v5708_v62 = vand.u32 4294901760, %v4075_v10  ;;  %v1323_v21 = vand.u32 4294901760, %v1322_v0  ;;  %v5712_v10 = vand.u32 4294901760, %v4159_v49 }
 0x107   : > { %v4383_v18 = vpop.f32.mrf.mxu1 }
 0x108   : > { %934 = vmatmul.f32.gmra.mxu0 %v4029_v30  ;;  %1312 = vmatpush.msrb.mxu3 %v1311_v5  ;;  %v5710_v30 = vand.u32 4294901760, %v4117_v29  ;;  %v5713_v29 = vand.u32 4294901760, %v4180_v58  ;;  %v5717_v58 = vand.u32 4294901760, %v4264_v25 }
 0x109   : > { %1655 = vmatpush.msra.mxu2 %v5708_v62 }
 0x10a   : > { %1318 = vmatpush.msrb.mxu3 %v1317_v44  ;;  %1020 = vmatmul.f32.gmra.mxu1 %v4035_v38 }
 0x10b   : > { %1659 = vmatpush.msra.mxu2 %v5709_v35 }
 0x10c   : > { %1324 = vmatpush.msrb.mxu3 %v1323_v21 }
 0x10d   : > { %v4381_v34 = vpop.f32.mrf.mxu0  ;;  %1663 = vmatpush.msra.mxu2 %v5710_v30 }
 0x10e   : > { %1778 = vmatpush.msra.mxu3 %v4054_v61  ;;  %v4401_v61 = vld [vmem:[%s5642_s2] ss:$0 sm:$0xff] }
 0x10f   : > { %1667 = vmatpush.msra.mxu2 %v5711_v50  ;;  %v4405_v35 = vpop.f32.mrf.mxu1  ;;  %v445_v49 = vadd.f32 %v4401_v61, %v4080_v12 }
 0x110   : > { %938 = vmatmul.f32.gmra.mxu0 %v4035_v38  ;;  %1780 = vmatpush.msra.mxu3 %v4070_v9  ;;  %v5714_v38 = vand.u32 4294901760, %v4201_v8  ;;  %v785_v9 = vpop.f32.mrf.mxu3  ;;  %v689_v8 = vpop.f32.mrf.mxu2 }
 0x111   : > { %1671 = vmatpush.msra.mxu2 %v5712_v10 }
 0x112   : > { %1782 = vmatpush.msra.mxu3 %v4090_v19  ;;  %v5715_v19 = vand.u32 4294901760, %v4222_v7  ;;  %1024 = vmatmul.f32.gmra.mxu1 %v4041_v46 }
 0x113   : > { %1675 = vmatpush.msra.mxu2 %v5713_v29 }
 0x114   : > { %1784 = vmatpush.msra.mxu3 %v4111_v28  ;;  %v5716_v28 = vand.u32 4294901760, %v4243_v53 }
 0x115   : > { %v4403_v39 = vpop.f32.mrf.mxu0  ;;  %1679 = vmatpush.msra.mxu2 %v5714_v38 }
 0x116   : > { %1786 = vmatpush.msra.mxu3 %v4132_v37  ;;  %v591_v37 = vadd.f32 %v4082_v13, %v445_v49  ;;  %v453_v13 = vadd.f32 %v4401_v61, %v4101_v23 }
 0x117   : > { %1683 = vmatpush.msra.mxu2 %v5715_v19  ;;  %v4426_v12 = vpop.f32.mrf.mxu1  ;;  %v477_v19 = vadd.f32 %v4401_v61, %v4164_v51 }
 0x118   : > { %942 = vmatmul.f32.gmra.mxu0 %v4041_v46  ;;  %1788 = vmatpush.msra.mxu3 %v4153_v47  ;;  %v5718_v46 = vand.u32 4294901760, %v4285_v56  ;;  %v5719_v47 = vand.u32 4294901760, %v4306_v59  ;;  %v791_v53 = vpop.f32.mrf.mxu3  ;;  %v5721_v59 = vand.u32 4294901760, %v4345_v40  ;;  %v595_v56 = vadd.f32 %v4103_v24, %v453_v13 }
 0x119   : > { %1687 = vmatpush.msra.mxu2 %v5716_v28 }
 0x11a   : > { %1790 = vmatpush.msra.mxu3 %v4174_v57  ;;  %v675_v57 = vadd.f32 %v4318_v55, %v591_v37  ;;  %1028 = vmatmul.f32.gmra.mxu1 %v4047_v54 }
 0x11b   : > { %1691 = vmatpush.msra.mxu2 %v5717_v58 }
 0x11c   : > { %1792 = vmatpush.msra.mxu3 %v4195_v4  ;;  %v5720_v4 = vand.u32 4294901760, %v4332_v48 }
 0x11d   : > { %v4424_v7 = vpop.f32.mrf.mxu0  ;;  %1695 = vmatpush.msra.mxu2 %v5718_v46  ;;  %v607_v46 = vadd.f32 %v4166_v52, %v477_v19  ;;  %v5722_v19 = vld [vmem:[#allocation8_spill] sm:$0xff] }
 0x11e   : > { %1794 = vmatpush.msra.mxu3 %v4216_v26  ;;  %v774_v26 = vadd.f32 %v4336_v1, %v675_v57 }
 0x11f   : > { %1699 = vmatpush.msra.mxu2 %v5719_v47  ;;  %v969_v25 = vpop.f32.mrf.mxu1 }
 0x120   : > { %946 = vmatmul.f32.gmra.mxu0 %v4047_v54  ;;  %1796 = vmatpush.msra.mxu3 %v4237_v27  ;;  %v694_v54 = vpop.f32.mrf.mxu2  ;;  %v680_v27 = vadd.f32 %v4372_v14, %v595_v56  ;;  %v797_v1 = vpop.f32.mrf.mxu3  ;;  %v485_v56 = vadd.f32 %v4401_v61, %v4185_v60 }
 0x121   : > { %1703 = vmatpush.msra.mxu2 %v5720_v4 }
 0x122   : > { %1798 = vmatpush.msra.mxu3 %v4258_v6  ;;  %v461_v6 = vadd.f32 %v4401_v61, %v4122_v32  ;;  %v780_v24 = vadd.f32 %v779_v2, %v680_v27  ;;  %v611_v27 = vadd.f32 %v4187_v63, %v485_v56 }
 0x123   : > { %1707 = vmatpush.msra.mxu2 %v5721_v59 }
 0x124   : > { %1800 = vmatpush.msra.mxu3 %v4279_v41  ;;  %v599_v41 = vadd.f32 %v4124_v33, %v461_v6 }
 0x125   : > { %v887_v23 = vpop.f32.mrf.mxu0  ;;  %1711 = vmatpush.msra.mxu2 %v1321_v22 }
 0x126   : > { %v888_v44 = vadd.f32 %v887_v23, %v774_v26  ;;  %1802 = vmatpush.msra.mxu3 %v4300_v15  ;;  %v685_v32 = vadd.f32 %v684_v20, %v599_v41  ;;  %v695_v26 = vadd.f32 %v694_v54, %v607_v46 }
 0x127   : > { %v973_v22 = vpop.f32.mrf.mxu1 }
 0x128   : > { %v970_v48 = vadd.f32 %v969_v25, %v888_v44  ;;  %1804 = vmatpush.msra.mxu3 %v4323_v31  ;;  %v469_v31 = vadd.f32 %v4401_v61, %v4143_v42  ;;  %v699_v14 = vpop.f32.mrf.mxu2  ;;  %v786_v62 = vadd.f32 %v785_v9, %v685_v32  ;;  %v798_v44 = vadd.f32 %v797_v1, %v695_v26 }
 0x129   : > { %v700_v54 = vadd.f32 %v699_v14, %v611_v27 }
 0x12a   : > { %v1032_v45 = vmax.f32 %v970_v48, 0.0  ;;  %1806 = vmatpush.msra.mxu3 %v4334_v11  ;;  %v603_v21 = vadd.f32 %v4145_v43, %v469_v31 }
 0x12c   : > { %v4455_v5 = vand.u32 4294901760, %v1032_v45  ;;  %1808 = vmatpush.msra.mxu3 %v4348_v3  ;;  %v803_v3 = vpop.f32.mrf.mxu3  ;;  %v690_v38 = vadd.f32 %v689_v8, %v603_v21 }
 0x12d   : > { %v891_v55 = vpop.f32.mrf.mxu0  ;;  %v804_v31 = vadd.f32 %v803_v3, %v700_v54 }
 0x12e   : > { %v1101_v15 = vsub.f32 %v1032_v45, %v4455_v5  ;;  %v892_v40 = vadd.f32 %v891_v55, %v780_v24  ;;  %1326 = vmatmul.f32.vlgmr.msrb.gmra.mxu3 %v4455_v5  ;;  %v792_v37 = vadd.f32 %v791_v53, %v690_v38 }
 0x12f   : > { %v977_v29 = vpop.f32.mrf.mxu1 }
 0x130   : > { %v1102_v11 = vand.u32 4294901760, %v1101_v15  ;;  %v974_v2 = vadd.f32 %v973_v22, %v892_v40  ;;  %1440 = vmatmul.f32.vlgmr.msra.gmra.mxu0 %v1101_v15  ;;  %v704_v43 = vpop.f32.mrf.mxu2  ;;  %v493_v22 = vadd.f32 %v4401_v61, %v4206_v16 }
 0x132   : > { %v1033_v33 = vmax.f32 %v974_v2, 0.0  ;;  %1554 = vmatmul.f32.vlgmr.msra.gmra.mxu1 %v1102_v11  ;;  %v1103_v0 = vsub.f32 %v1101_v15, %v1102_v11  ;;  %v615_v11 = vadd.f32 %v4208_v17, %v493_v22 }
 0x134   : > { %v4463_v30 = vand.u32 4294901760, %v1033_v33  ;;  %v1104_v50 = vand.u32 4294901760, %v1103_v0  ;;  %v809_v59 = vpop.f32.mrf.mxu3 }
 0x135   : > { %v895_v10 = vpop.f32.mrf.mxu0 }
 0x136   : > { %v896_v20 = vadd.f32 %v895_v10, %v786_v62  ;;  %1105 = vmatmul.f32.vlgmr.msrb.gmra.mxu2 %v1104_v50  ;;  %1330 = vmatmul.f32.gmra.mxu3 %v4463_v30  ;;  %v1109_v42 = vsub.f32 %v1033_v33, %v4463_v30  ;;  %v705_v50 = vadd.f32 %v704_v43, %v615_v11 }
 0x137   : > { %v981_v4 = vpop.f32.mrf.mxu1  ;;  %v501_v10 = vadd.f32 %v4401_v61, %v4227_v36 }
 0x138   : > { %v978_v49 = vadd.f32 %v977_v29, %v896_v20  ;;  %1445 = vmatmul.f32.gmra.mxu0 %v1109_v42  ;;  %v1110_v9 = vand.u32 4294901760, %v1109_v42  ;;  %v709_v6 = vpop.f32.mrf.mxu2  ;;  %v810_v38 = vadd.f32 %v809_v59, %v705_v50 }
 0x13a   : > { %v1034_v28 = vmax.f32 %v978_v49, 0.0  ;;  %1560 = vmatmul.f32.gmra.mxu1 %v1110_v9  ;;  %v1111_v58 = vsub.f32 %v1109_v42, %v1110_v9  ;;  %v619_v49 = vadd.f32 %v5722_v19, %v501_v10  ;;  %v5727_v10 = vld [vmem:[#allocation13_spill] sm:$0xff]  ;;  %v5728_v19 = vld [vmem:[#allocation14_spill] sm:$0xff] }
 0x13c   : > { %v4470_v47 = vand.u32 4294901760, %v1034_v28  ;;  %v1112_v57 = vand.u32 4294901760, %v1111_v58  ;;  %v815_v15 = vpop.f32.mrf.mxu3  ;;  %v710_v43 = vadd.f32 %v709_v6, %v619_v49 }
 0x13d   : > { %v899_v13 = vpop.f32.mrf.mxu0 }
 0x13e   : > { %v900_v8 = vadd.f32 %v899_v13, %v792_v37  ;;  %1113 = vmatmul.f32.gmra.mxu2 %v1112_v57  ;;  %1334 = vmatmul.f32.gmra.mxu3 %v4470_v47  ;;  %v1117_v51 = vsub.f32 %v1034_v28, %v4470_v47  ;;  %v5723_v57 = vld [vmem:[#allocation9_spill] sm:$0xff]  ;;  %v816_v56 = vadd.f32 %v815_v15, %v710_v43 }
 0x13f   : > { %v985_v41 = vpop.f32.mrf.mxu1  ;;  %v509_v13 = vadd.f32 %v4401_v61, %v5723_v57 }
 0x140   : > { %v982_v23 = vadd.f32 %v981_v4, %v900_v8  ;;  %1450 = vmatmul.f32.gmra.mxu0 %v1117_v51  ;;  %v1118_v53 = vand.u32 4294901760, %v1117_v51  ;;  %v714_v21 = vpop.f32.mrf.mxu2 }
 0x142   : > { %v1035_v52 = vmax.f32 %v982_v23, 0.0  ;;  %1566 = vmatmul.f32.gmra.mxu1 %v1118_v53  ;;  %v1119_v25 = vsub.f32 %v1117_v51, %v1118_v53  ;;  %v5724_v23 = vld [vmem:[#allocation10_spill] sm:$0xff] }
 0x143   : > { %v623_v53 = vadd.f32 %v5724_v23, %v509_v13 }
 0x144   : > { %v4477_v48 = vand.u32 4294901760, %v1035_v52  ;;  %v1120_v45 = vand.u32 4294901760, %v1119_v25  ;;  %v821_v17 = vpop.f32.mrf.mxu3 }
 0x145   : > { %v903_v24 = vpop.f32.mrf.mxu0 }
 0x146   : > { %v904_v55 = vadd.f32 %v903_v24, %v798_v44  ;;  %1121 = vmatmul.f32.gmra.mxu2 %v1120_v45  ;;  %1338 = vmatmul.f32.gmra.mxu3 %v4477_v48  ;;  %v1125_v60 = vsub.f32 %v1035_v52, %v4477_v48 }
 0x147   : > { %v989_v62 = vpop.f32.mrf.mxu1 }
 0x148   : > { %v986_v1 = vadd.f32 %v985_v41, %v904_v55  ;;  %1455 = vmatmul.f32.gmra.mxu0 %v1125_v60  ;;  %v1126_v63 = vand.u32 4294901760, %v1125_v60  ;;  %v719_v4 = vpop.f32.mrf.mxu2  ;;  %v715_v41 = vadd.f32 %v714_v21, %v623_v53  ;;  %v5725_v55 = vld [vmem:[#allocation11_spill] sm:$0xff] }
 0x14a   : > { %v1036_v40 = vmax.f32 %v986_v1, 0.0  ;;  %1572 = vmatmul.f32.gmra.mxu1 %v1126_v63  ;;  %v1127_v32 = vsub.f32 %v1125_v60, %v1126_v63  ;;  %v517_v60 = vadd.f32 %v4401_v61, %v5725_v55 }
 0x14c   : > { %v4484_v2 = vand.u32 4294901760, %v1036_v40  ;;  %v1128_v33 = vand.u32 4294901760, %v1127_v32  ;;  %v827_v52 = vpop.f32.mrf.mxu3  ;;  %v5726_v32 = vld [vmem:[#allocation12_spill] sm:$0xff] }
 0x14d   : > { %v907_v0 = vpop.f32.mrf.mxu0 }
 0x14e   : > { %v908_v14 = vadd.f32 %v907_v0, %v804_v31  ;;  %1129 = vmatmul.f32.gmra.mxu2 %v1128_v33  ;;  %1342 = vmatmul.f32.gmra.mxu3 %v4484_v2  ;;  %v1133_v16 = vsub.f32 %v1036_v40, %v4484_v2  ;;  %v822_v40 = vadd.f32 %v821_v17, %v715_v41 }
 0x14f   : > { %v993_v37 = vpop.f32.mrf.mxu1  ;;  %v627_v31 = vadd.f32 %v5726_v32, %v517_v60 }
 0x150   : > { %v990_v29 = vadd.f32 %v989_v62, %v908_v14  ;;  %1460 = vmatmul.f32.gmra.mxu0 %v1133_v16  ;;  %v1134_v3 = vand.u32 4294901760, %v1133_v16  ;;  %v724_v15 = vpop.f32.mrf.mxu2 }
 0x151   : > { %v720_v50 = vadd.f32 %v719_v4, %v627_v31  ;;  %v5729_v4 = vld [vmem:[#allocation15_spill] sm:$0xff] }
 0x152   : > { %v1037_v20 = vmax.f32 %v990_v29, 0.0  ;;  %1578 = vmatmul.f32.gmra.mxu1 %v1134_v3  ;;  %v1135_v42 = vsub.f32 %v1133_v16, %v1134_v3  ;;  %v525_v29 = vadd.f32 %v4401_v61, %v5727_v10 }
 0x154   : > { %v4491_v9 = vand.u32 4294901760, %v1037_v20  ;;  %v1136_v28 = vand.u32 4294901760, %v1135_v42  ;;  %v833_v14 = vpop.f32.mrf.mxu3  ;;  %v631_v49 = vadd.f32 %v5728_v19, %v525_v29 }
 0x155   : > { %v911_v58 = vpop.f32.mrf.mxu0 }
 0x156   : > { %v912_v46 = vadd.f32 %v911_v58, %v810_v38  ;;  %1137 = vmatmul.f32.gmra.mxu2 %v1136_v28  ;;  %1346 = vmatmul.f32.gmra.mxu3 %v4491_v9  ;;  %v1141_v36 = vsub.f32 %v1037_v20, %v4491_v9  ;;  %v828_v38 = vadd.f32 %v827_v52, %v720_v50  ;;  %v5730_v52 = vld [vmem:[#allocation16_spill] sm:$0xff] }
 0x157   : > { %v997_v45 = vpop.f32.mrf.mxu1  ;;  %v725_v13 = vadd.f32 %v724_v15, %v631_v49 }
 0x158   : > { %v994_v8 = vadd.f32 %v993_v37, %v912_v46  ;;  %1465 = vmatmul.f32.gmra.mxu0 %v1141_v36  ;;  %v1142_v59 = vand.u32 4294901760, %v1141_v36  ;;  %v729_v28 = vpop.f32.mrf.mxu2 }
 0x159   : > { %v834_v53 = vadd.f32 %v833_v14, %v725_v13 }
 0x15a   : > { %v1038_v51 = vmax.f32 %v994_v8, 0.0  ;;  %1584 = vmatmul.f32.gmra.mxu1 %v1142_v59  ;;  %v1143_v26 = vsub.f32 %v1141_v36, %v1142_v59  ;;  %v533_v8 = vadd.f32 %v4401_v61, %v5729_v4 }
 0x15c   : > { %v4498_v25 = vand.u32 4294901760, %v1038_v51  ;;  %v1144_v44 = vand.u32 4294901760, %v1143_v26  ;;  %v839_v59 = vpop.f32.mrf.mxu3 }
 0x15d   : > { %v915_v27 = vpop.f32.mrf.mxu0 }
 0x15e   : > { %v916_v6 = vadd.f32 %v915_v27, %v816_v56  ;;  %1145 = vmatmul.f32.gmra.mxu2 %v1144_v44  ;;  %1350 = vmatmul.f32.gmra.mxu3 %v4498_v25  ;;  %v1149_v24 = vsub.f32 %v1038_v51, %v4498_v25  ;;  %v635_v44 = vadd.f32 %v5730_v52, %v533_v8 }
 0x15f   : > { %v1001_v62 = vpop.f32.mrf.mxu1 }
 0x160   : > { %v998_v54 = vadd.f32 %v997_v45, %v916_v6  ;;  %1470 = vmatmul.f32.gmra.mxu0 %v1149_v24  ;;  %v1150_v22 = vand.u32 4294901760, %v1149_v24  ;;  %v734_v41 = vpop.f32.mrf.mxu2 }
 0x162   : > { %v1039_v1 = vmax.f32 %v998_v54, 0.0  ;;  %1590 = vmatmul.f32.gmra.mxu1 %v1150_v22  ;;  %v1151_v63 = vsub.f32 %v1149_v24, %v1150_v22  ;;  %v730_v54 = vadd.f32 %v729_v28, %v635_v44  ;;  %v5731_v22 = vld [vmem:[#allocation17_spill] sm:$0xff] }
 0x163   : > { %v541_v15 = vadd.f32 %v4401_v61, %v5731_v22 }
 0x164   : > { %v4505_v11 = vand.u32 4294901760, %v1039_v1  ;;  %v1152_v33 = vand.u32 4294901760, %v1151_v63 }
 0x165   : > { %v919_v0 = vpop.f32.mrf.mxu0 }
 0x166   : > { %v920_v21 = vadd.f32 %v919_v0, %v822_v40  ;;  %1153 = vmatmul.f32.gmra.mxu2 %v1152_v33  ;;  %1354 = vmatmul.f32.gmra.mxu3 %v4505_v11  ;;  %v1157_v16 = vsub.f32 %v1039_v1, %v4505_v11  ;;  %v845_v40 = vpop.f32.mrf.mxu3  ;;  %v840_v33 = vadd.f32 %v839_v59, %v730_v54  ;;  %v5732_v0 = vld [vmem:[#allocation18_spill] sm:$0xff] }
 0x167   : > { %v1005_v36 = vpop.f32.mrf.mxu1  ;;  %v557_v59 = vadd.f32 %v4401_v61, %v4403_v39  ;;  %v565_v54 = vadd.f32 %v4401_v61, %v4424_v7 }
 0x168   : > { %v1002_v3 = vadd.f32 %v1001_v62, %v920_v21  ;;  %1475 = vmatmul.f32.gmra.mxu0 %v1157_v16  ;;  %v1158_v17 = vand.u32 4294901760, %v1157_v16  ;;  %v639_v62 = vadd.f32 %v5732_v0, %v541_v15 }
 0x169   : > { %v647_v52 = vadd.f32 %v4405_v35, %v557_v59 }
 0x16a   : > { %v1040_v20 = vmax.f32 %v1002_v3, 0.0  ;;  %1596 = vmatmul.f32.gmra.mxu1 %v1158_v17  ;;  %v1159_v42 = vsub.f32 %v1157_v16, %v1158_v17  ;;  %v735_v3 = vadd.f32 %v734_v41, %v639_v62  ;;  %v549_v17 = vadd.f32 %v4401_v61, %v4381_v34 }
 0x16c   : > { %v4512_v58 = vand.u32 4294901760, %v1040_v20  ;;  %v1160_v37 = vand.u32 4294901760, %v1159_v42  ;;  %v846_v28 = vadd.f32 %v845_v40, %v735_v3  ;;  %v651_v40 = vadd.f32 %v4426_v12, %v565_v54 }
 0x16d   : > { %v923_v46 = vpop.f32.mrf.mxu0 }
 0x16e   : > { %v924_v43 = vadd.f32 %v923_v46, %v828_v38  ;;  %1161 = vmatmul.f32.gmra.mxu2 %v1160_v37  ;;  %1358 = vmatmul.f32.gmra.mxu3 %v4512_v58  ;;  %v1165_v57 = vsub.f32 %v1040_v20, %v4512_v58  ;;  %v739_v20 = vpop.f32.mrf.mxu2  ;;  %v643_v37 = vadd.f32 %v4383_v18, %v549_v17  ;;  %v851_v46 = vpop.f32.mrf.mxu3 }
 0x16f   : > { %v1009_v24 = vpop.f32.mrf.mxu1 }
 0x170   : > { %v1006_v51 = vadd.f32 %v1005_v36, %v924_v43  ;;  %1480 = vmatmul.f32.gmra.mxu0 %v1165_v57  ;;  %v1166_v26 = vand.u32 4294901760, %v1165_v57  ;;  %v740_v8 = vadd.f32 %v739_v20, %v643_v37 }
 0x172   : > { %v1041_v56 = vmax.f32 %v1006_v51, 0.0  ;;  %1602 = vmatmul.f32.gmra.mxu1 %v1166_v26  ;;  %v1167_v23 = vsub.f32 %v1165_v57, %v1166_v26 }
 0x174   : > { %v4519_v27 = vand.u32 4294901760, %v1041_v56  ;;  %v1168_v45 = vand.u32 4294901760, %v1167_v23 }
 0x175   : > { %v927_v6 = vpop.f32.mrf.mxu0 }
 0x176   : > { %v928_v55 = vadd.f32 %v927_v6, %v834_v53  ;;  %1169 = vmatmul.f32.gmra.mxu2 %v1168_v45  ;;  %1362 = vmatmul.f32.gmra.mxu3 %v4519_v27  ;;  %v1173_v60 = vsub.f32 %v1041_v56, %v4519_v27  ;;  %v744_v18 = vpop.f32.mrf.mxu2  ;;  %v852_v53 = vadd.f32 %v851_v46, %v740_v8 }
 0x177   : > { %v1013_v50 = vpop.f32.mrf.mxu1 }
 0x178   : > { %v1010_v1 = vadd.f32 %v1009_v24, %v928_v55  ;;  %1485 = vmatmul.f32.gmra.mxu0 %v1173_v60  ;;  %v1174_v63 = vand.u32 4294901760, %v1173_v60  ;;  %v857_v55 = vpop.f32.mrf.mxu3 }
 0x17a   : > { %v1042_v32 = vmax.f32 %v1010_v1, 0.0  ;;  %1608 = vmatmul.f32.gmra.mxu1 %v1174_v63  ;;  %v1175_v31 = vsub.f32 %v1173_v60, %v1174_v63  ;;  %v745_v60 = vadd.f32 %v744_v18, %v647_v52  ;;  %v1904_v52 = vld [vmem:[%s5645_s5 + $0x70] sm:$0xff] }
 0x17c   : > { %v4526_v14 = vand.u32 4294901760, %v1042_v32  ;;  %v1176_v21 = vand.u32 4294901760, %v1175_v31  ;;  %v858_v63 = vadd.f32 %v857_v55, %v745_v60 }
 0x17d   : > { %v931_v16 = vpop.f32.mrf.mxu0 }
 0x17e   : > { %v932_v10 = vadd.f32 %v931_v16, %v840_v33  ;;  %1177 = vmatmul.f32.gmra.mxu2 %v1176_v21  ;;  %1366 = vmatmul.f32.gmra.mxu3 %v4526_v14  ;;  %v1181_v29 = vsub.f32 %v1042_v32, %v4526_v14  ;;  %v749_v32 = vpop.f32.mrf.mxu2 }
 0x17f   : > { %v1017_v13 = vpop.f32.mrf.mxu1  ;;  %v750_v7 = vadd.f32 %v749_v32, %v651_v40 }
 0x180   : > { %v1014_v42 = vadd.f32 %v1013_v50, %v932_v10  ;;  %1490 = vmatmul.f32.gmra.mxu0 %v1181_v29  ;;  %v1182_v38 = vand.u32 4294901760, %v1181_v29  ;;  %v863_v10 = vpop.f32.mrf.mxu3 }
 0x181   : > { %v864_v3 = vadd.f32 %v863_v10, %v750_v7 }
 0x182   : > { %v1043_v19 = vmax.f32 %v1014_v42, 0.0  ;;  %1614 = vmatmul.f32.gmra.mxu1 %v1182_v38  ;;  %v1183_v49 = vsub.f32 %v1181_v29, %v1182_v38 }
 0x184   : > { %v4533_v36 = vand.u32 4294901760, %v1043_v19  ;;  %v1184_v43 = vand.u32 4294901760, %v1183_v49 }
 0x185   : > { %v935_v57 = vpop.f32.mrf.mxu0 }
 0x186   : > { %v936_v4 = vadd.f32 %v935_v57, %v846_v28  ;;  %1185 = vmatmul.f32.gmra.mxu2 %v1184_v43  ;;  %1370 = vmatmul.f32.gmra.mxu3 %v4533_v36  ;;  %v1189_v34 = vsub.f32 %v1043_v19, %v4533_v36 }
 0x187   : > { %v1021_v24 = vpop.f32.mrf.mxu1 }
 0x188   : > { %v1018_v51 = vadd.f32 %v1017_v13, %v936_v4  ;;  %1495 = vmatmul.f32.gmra.mxu0 %v1189_v34  ;;  %v1190_v26 = vand.u32 4294901760, %v1189_v34 }
 0x18a   : > { %v1044_v56 = vmax.f32 %v1018_v51, 0.0  ;;  %1620 = vmatmul.f32.gmra.mxu1 %v1190_v26  ;;  %v1191_v23 = vsub.f32 %v1189_v34, %v1190_v26  ;;  %v1905_v51 = vld [vmem:[%s5645_s5 + $0x78] sm:$0xff] }
 0x18b   : > { %v4562_v26 = vand.u32 4294901760, %v1905_v51 }
 0x18c   : > { %v4540_v44 = vand.u32 4294901760, %v1044_v56  ;;  %v1192_v45 = vand.u32 4294901760, %v1191_v23 }
 0x18d   : > { %v939_v6 = vpop.f32.mrf.mxu0  ;;  %1911 = vmatpush.msrb.mxu0 %v4562_v26  ;;  %v4567_v18 = vsub.f32 %v1905_v51, %v4562_v26  ;;  %2362 = vmatpush.msrb.mxu3 %v4562_v26 }
 0x18e   : > { %v940_v41 = vadd.f32 %v939_v6, %v852_v53  ;;  %1193 = vmatmul.f32.gmra.mxu2 %v1192_v45  ;;  %1374 = vmatmul.f32.gmra.mxu3 %v4540_v44  ;;  %v1197_v39 = vsub.f32 %v1044_v56, %v4540_v44  ;;  %v4578_v6 = vand.u32 4294901760, %v1904_v52 }
 0x18f   : > { %v1025_v62 = vpop.f32.mrf.mxu1  ;;  %v5677_v23 = vand.u32 4294901760, %v4567_v18  ;;  %2234 = vmatpush.msrb.mxu2 %v4567_v18 }
 0x190   : > { %v1022_v22 = vadd.f32 %v1021_v24, %v940_v41  ;;  %1500 = vmatmul.f32.gmra.mxu0 %v1197_v39  ;;  %v1198_v15 = vand.u32 4294901760, %v1197_v39  ;;  %v4585_v24 = vld [vmem:[%s5644_s4] ss:$0 sm:$0xff]  ;;  %v4589_v41 = vsub.f32 %v1904_v52, %v4578_v6  ;;  %2364 = vmatpush.msrb.mxu3 %v4578_v6 }
 0x191   : > { %v2074_v53 = vsub.f32 %v4567_v18, %v5677_v23  ;;  %1913 = vmatpush.msrb.mxu0 %v4578_v6 }
 0x192   : > { %v1045_v35 = vmax.f32 %v1022_v22, 0.0  ;;  %1626 = vmatmul.f32.gmra.mxu1 %v1198_v15  ;;  %v1199_v1 = vsub.f32 %v1197_v39, %v1198_v15  ;;  %v5676_v60 = vand.u32 4294901760, %v4589_v41  ;;  %2237 = vmatpush.msrb.mxu2 %v4589_v41  ;;  %v1903_v15 = vld [vmem:[%s5645_s5 + $0x68] sm:$0xff] }
 0x193   : > { %v2075_v45 = vand.u32 4294901760, %v2074_v53 }
 0x194   : > { %v4547_v31 = vand.u32 4294901760, %v1045_v35  ;;  %v1200_v33 = vand.u32 4294901760, %v1199_v1  ;;  %v2080_v54 = vsub.f32 %v4589_v41, %v5676_v60  ;;  %v4603_v1 = vand.u32 4294901760, %v1903_v15 }
 0x195   : > { %v943_v0 = vpop.f32.mrf.mxu0  ;;  %2076 = vmatpush.msrb.mxu1 %v2075_v45  ;;  %v1899_v45 = vld [vmem:[%s5645_s5 + $0x48] sm:$0xff] }
 0x196   : > { %v944_v21 = vadd.f32 %v943_v0, %v858_v63  ;;  %1201 = vmatmul.f32.gmra.mxu2 %v1200_v33  ;;  %1378 = vmatmul.f32.gmra.mxu3 %v4547_v31  ;;  %v1205_v61 = vsub.f32 %v1045_v35, %v4547_v31  ;;  %v2081_v35 = vand.u32 4294901760, %v2080_v54  ;;  %v4609_v63 = vsub.f32 %v1903_v15, %v4603_v1 }
 0x197   : > { %v1029_v38 = vpop.f32.mrf.mxu1  ;;  %1915 = vmatpush.msrb.mxu0 %v4603_v1  ;;  %2366 = vmatpush.msrb.mxu3 %v4603_v1 }
 0x198   : > { %v1026_v16 = vadd.f32 %v1025_v62, %v944_v21  ;;  %1505 = vmatmul.f32.gmra.mxu0 %v1205_v61  ;;  %v1206_v50 = vand.u32 4294901760, %v1205_v61  ;;  %2082 = vmatpush.msrb.mxu1 %v2081_v35  ;;  %v5675_v33 = vand.u32 4294901760, %v4609_v63  ;;  %v1902_v21 = vld [vmem:[%s5645_s5 + $0x60] sm:$0xff] }
 0x199   : > { %2240 = vmatpush.msrb.mxu2 %v4609_v63  ;;  %v4623_v7 = vand.u32 4294901760, %v1902_v21 }
 0x19a   : > { %v1046_v29 = vmax.f32 %v1026_v16, 0.0  ;;  %1632 = vmatmul.f32.gmra.mxu1 %v1206_v50  ;;  %v1207_v12 = vsub.f32 %v1205_v61, %v1206_v50 }
 0x19b   : > { %1917 = vmatpush.msrb.mxu0 %v4623_v7  ;;  %v4629_v16 = vsub.f32 %v1902_v21, %v4623_v7  ;;  %2368 = vmatpush.msrb.mxu3 %v4623_v7 }
 0x19c   : > { %v4551_v17 = vand.u32 4294901760, %v1046_v29  ;;  %v1208_v20 = vand.u32 4294901760, %v1207_v12 }
 0x19d   : > { %v947_v42 = vpop.f32.mrf.mxu0  ;;  %2243 = vmatpush.msrb.mxu2 %v4629_v16 }
 0x19e   : > { %v948_v19 = vadd.f32 %v947_v42, %v864_v3  ;;  %1209 = vmatmul.f32.gmra.mxu2 %v1208_v20  ;;  %1382 = vmatmul.f32.gmra.mxu3 %v4551_v17  ;;  %v1213_v49 = vsub.f32 %v1046_v29, %v4551_v17  ;;  %v5674_v29 = vand.u32 4294901760, %v4629_v16  ;;  %v1901_v20 = vld [vmem:[%s5645_s5 + $0x58] sm:$0xff] }
 0x1a0   : > { %v1030_v28 = vadd.f32 %v1029_v38, %v948_v19  ;;  %1510 = vmatmul.f32.gmra.mxu0 %v1213_v49  ;;  %v1214_v37 = vand.u32 4294901760, %v1213_v49  ;;  %v4643_v38 = vand.u32 4294901760, %v1901_v20 }
 0x1a2   : > { %v1047_v46 = vmax.f32 %v1030_v28, 0.0  ;;  %1638 = vmatmul.f32.gmra.mxu1 %v1214_v37  ;;  %v1215_v43 = vsub.f32 %v1213_v49, %v1214_v37  ;;  %1919 = vmatpush.msrb.mxu0 %v4643_v38  ;;  %v4649_v19 = vsub.f32 %v1901_v20, %v4643_v38 }
 0x1a3   : > { %2370 = vmatpush.msrb.mxu3 %v4643_v38 }
 0x1a4   : > { %v4555_v57 = vand.u32 4294901760, %v1047_v46  ;;  %v1216_v13 = vand.u32 4294901760, %v1215_v43  ;;  %v5673_v37 = vand.u32 4294901760, %v4649_v19  ;;  %2246 = vmatpush.msrb.mxu2 %v4649_v19 }
 0x1a6   : > { %1217 = vmatmul.f32.gmra.mxu2 %v1216_v13  ;;  %1386 = vmatmul.f32.gmra.mxu3 %v4555_v57  ;;  %v1221_v4 = vsub.f32 %v1047_v46, %v4555_v57  ;;  %v1900_v13 = vld [vmem:[%s5645_s5 + $0x50] sm:$0xff] }
 0x1a8   : > { %1515 = vmatmul.f32.gmra.mxu0 %v1221_v4  ;;  %v1222_v34 = vand.u32 4294901760, %v1221_v4 }
 0x1aa   : > { %1644 = vmatmul.f32.gmra.mxu1 %v1222_v34  ;;  %v1223_v8 = vsub.f32 %v1221_v4, %v1222_v34  ;;  %v4663_v34 = vand.u32 4294901760, %v1900_v13 }
 0x1ac   : > { %v1224_v59 = vand.u32 4294901760, %v1223_v8  ;;  %1921 = vmatpush.msrb.mxu0 %v4663_v34  ;;  %v4669_v8 = vsub.f32 %v1900_v13, %v4663_v34  ;;  %2372 = vmatpush.msrb.mxu3 %v4663_v34 }
 0x1ae   : > { %1225 = vmatmul.f32.gmra.mxu2 %v1224_v59  ;;  %1810 = vmatmul.f32.vlgmr.msra.gmra.mxu3 %v4455_v5 }
 0x1af   : > { %2249 = vmatpush.msrb.mxu2 %v4669_v8 }
 0x1b1   : > { %v1327_v56 = vpop.f32.mrf.mxu3 }
 0x1b6   : > { %1713 = vmatmul.f32.vlgmr.msra.gmra.mxu2 %v4455_v5  ;;  %1814 = vmatmul.f32.gmra.mxu3 %v4463_v30 }
 0x1b9   : > { %v1106_v39 = vpop.f32.mrf.mxu2  ;;  %v1331_v55 = vpop.f32.mrf.mxu3 }
 0x1ba   : > { %v1107_v5 = vadd.f32 %v4585_v24, %v1106_v39 }
 0x1bc   : > { %v4598_v22 = vadd.f32 %v1327_v56, %v1107_v5  ;;  %v5672_v56 = vand.u32 4294901760, %v4669_v8 }
 0x1be   : > { %1717 = vmatmul.f32.gmra.mxu2 %v4463_v30  ;;  %1818 = vmatmul.f32.gmra.mxu3 %v4470_v47  ;;  %v2086_v30 = vsub.f32 %v4609_v63, %v5675_v33 }
 0x1c0   : > { %v2087_v61 = vand.u32 4294901760, %v2086_v30 }
 0x1c1   : > { %v1114_v40 = vpop.f32.mrf.mxu2  ;;  %v1335_v32 = vpop.f32.mrf.mxu3 }
 0x1c2   : > { %v1115_v0 = vadd.f32 %v4585_v24, %v1114_v40  ;;  %2088 = vmatpush.msrb.mxu1 %v2087_v61 }
 0x1c4   : > { %v4618_v62 = vadd.f32 %v1331_v55, %v1115_v0  ;;  %v4683_v55 = vand.u32 4294901760, %v1899_v45  ;;  %v1898_v0 = vld [vmem:[%s5645_s5 + $0x40] sm:$0xff] }
 0x1c5   : > { %v4703_v21 = vand.u32 4294901760, %v1898_v0 }
 0x1c6   : > { %1721 = vmatmul.f32.gmra.mxu2 %v4470_v47  ;;  %1822 = vmatmul.f32.gmra.mxu3 %v4477_v48  ;;  %v2092_v47 = vsub.f32 %v4629_v16, %v5674_v29  ;;  %v4689_v5 = vsub.f32 %v1899_v45, %v4683_v55 }
 0x1c7   : > { %1923 = vmatpush.msrb.mxu0 %v4683_v55  ;;  %2374 = vmatpush.msrb.mxu3 %v4683_v55  ;;  %v4709_v61 = vsub.f32 %v1898_v0, %v4703_v21 }
 0x1c8   : > { %v2093_v42 = vand.u32 4294901760, %v2092_v47  ;;  %v5671_v35 = vand.u32 4294901760, %v4689_v5  ;;  %2252 = vmatpush.msrb.mxu2 %v4689_v5 }
 0x1c9   : > { %v1122_v50 = vpop.f32.mrf.mxu2  ;;  %v1339_v10 = vpop.f32.mrf.mxu3  ;;  %1925 = vmatpush.msrb.mxu0 %v4703_v21  ;;  %2376 = vmatpush.msrb.mxu3 %v4703_v21 }
 0x1ca   : > { %v1123_v12 = vadd.f32 %v4585_v24, %v1122_v50  ;;  %2094 = vmatpush.msrb.mxu1 %v2093_v42  ;;  %2255 = vmatpush.msrb.mxu2 %v4709_v61  ;;  %v1897_v42 = vld [vmem:[%s5645_s5 + $0x38] sm:$0xff] }
 0x1cc   : > { %v4638_v3 = vadd.f32 %v1335_v32, %v1123_v12  ;;  %v5669_v12 = vand.u32 4294901760, %v4709_v61 }
 0x1ce   : > { %1725 = vmatmul.f32.gmra.mxu2 %v4477_v48  ;;  %1826 = vmatmul.f32.gmra.mxu3 %v4484_v2  ;;  %v2098_v48 = vsub.f32 %v4649_v19, %v5673_v37 }
 0x1d0   : > { %v2099_v4 = vand.u32 4294901760, %v2098_v48 }
 0x1d1   : > { %v1130_v49 = vpop.f32.mrf.mxu2  ;;  %v1343_v28 = vpop.f32.mrf.mxu3 }
 0x1d2   : > { %v1131_v46 = vadd.f32 %v4585_v24, %v1130_v49  ;;  %2100 = vmatpush.msrb.mxu1 %v2099_v4 }
 0x1d4   : > { %v4658_v43 = vadd.f32 %v1339_v10, %v1131_v46 }
 0x1d6   : > { %1729 = vmatmul.f32.gmra.mxu2 %v4484_v2  ;;  %1830 = vmatmul.f32.gmra.mxu3 %v4491_v9  ;;  %v2104_v2 = vsub.f32 %v4669_v8, %v5672_v56  ;;  %v4855_v56 = vpop.f32.mrf.mxu1 }
 0x1d8   : > { %v2105_v39 = vand.u32 4294901760, %v2104_v2 }
 0x1d9   : > { %v1138_v59 = vpop.f32.mrf.mxu2  ;;  %v1347_v51 = vpop.f32.mrf.mxu3 }
 0x1da   : > { %v1139_v53 = vadd.f32 %v4585_v24, %v1138_v59  ;;  %2106 = vmatpush.msrb.mxu1 %v2105_v39 }
 0x1dc   : > { %v4678_v52 = vadd.f32 %v1343_v28, %v1139_v53  ;;  %v4723_v28 = vand.u32 4294901760, %v1897_v42  ;;  %v1896_v53 = vld [vmem:[%s5645_s5 + $0x30] sm:$0xff] }
 0x1dd   : > { %v4745_v45 = vand.u32 4294901760, %v1896_v53 }
 0x1de   : > { %1733 = vmatmul.f32.gmra.mxu2 %v4491_v9  ;;  %1834 = vmatmul.f32.gmra.mxu3 %v4498_v25  ;;  %v2110_v9 = vsub.f32 %v4689_v5, %v5671_v35  ;;  %v4729_v46 = vsub.f32 %v1897_v42, %v4723_v28  ;;  %v1894_v42 = vld [vmem:[%s5645_s5 + $0x20] sm:$0xff] }
 0x1df   : > { %1927 = vmatpush.msrb.mxu0 %v4723_v28  ;;  %2378 = vmatpush.msrb.mxu3 %v4723_v28  ;;  %v4751_v39 = vsub.f32 %v1896_v53, %v4745_v45 }
 0x1e0   : > { %v2111_v30 = vand.u32 4294901760, %v2110_v9  ;;  %v5668_v4 = vand.u32 4294901760, %v4729_v46  ;;  %2258 = vmatpush.msrb.mxu2 %v4729_v46  ;;  %v1895_v9 = vld [vmem:[%s5645_s5 + $0x28] sm:$0xff] }
 0x1e1   : > { %v1146_v54 = vpop.f32.mrf.mxu2  ;;  %v1351_v15 = vpop.f32.mrf.mxu3  ;;  %1929 = vmatpush.msrb.mxu0 %v4745_v45  ;;  %2380 = vmatpush.msrb.mxu3 %v4745_v45 }
 0x1e2   : > { %v1147_v40 = vadd.f32 %v4585_v24, %v1146_v54  ;;  %2112 = vmatpush.msrb.mxu1 %v2111_v30  ;;  %2261 = vmatpush.msrb.mxu2 %v4751_v39  ;;  %v4766_v30 = vand.u32 4294901760, %v1895_v9 }
 0x1e4   : > { %v4698_v32 = vadd.f32 %v1347_v51, %v1147_v40  ;;  %v5667_v40 = vand.u32 4294901760, %v4751_v39  ;;  %1931 = vmatpush.msrb.mxu0 %v4766_v30  ;;  %2382 = vmatpush.msrb.mxu3 %v4766_v30 }
 0x1e6   : > { %1737 = vmatmul.f32.gmra.mxu2 %v4498_v25  ;;  %1838 = vmatmul.f32.gmra.mxu3 %v4505_v11  ;;  %v2116_v25 = vsub.f32 %v4709_v61, %v5669_v12 }
 0x1e8   : > { %v2117_v49 = vand.u32 4294901760, %v2116_v25 }
 0x1e9   : > { %v1154_v50 = vpop.f32.mrf.mxu2  ;;  %v1355_v10 = vpop.f32.mrf.mxu3 }
 0x1ea   : > { %v1155_v47 = vadd.f32 %v4585_v24, %v1154_v50  ;;  %2118 = vmatpush.msrb.mxu1 %v2117_v49  ;;  %v4772_v50 = vsub.f32 %v1895_v9, %v4766_v30 }
 0x1ec   : > { %v4718_v20 = vadd.f32 %v1351_v15, %v1155_v47  ;;  %v5666_v25 = vand.u32 4294901760, %v4772_v50  ;;  %2264 = vmatpush.msrb.mxu2 %v4772_v50 }
 0x1ee   : > { %1741 = vmatmul.f32.gmra.mxu2 %v4505_v11  ;;  %1842 = vmatmul.f32.gmra.mxu3 %v4512_v58  ;;  %v2122_v11 = vsub.f32 %v4729_v46, %v5668_v4 }
 0x1f0   : > { %v2123_v2 = vand.u32 4294901760, %v2122_v11 }
 0x1f1   : > { %v1162_v48 = vpop.f32.mrf.mxu2  ;;  %v4732_v13 = vpop.f32.mrf.mxu3 }
 0x1f2   : > { %v1163_v59 = vadd.f32 %v4585_v24, %v1162_v48  ;;  %2124 = vmatpush.msrb.mxu1 %v2123_v2  ;;  %v4787_v48 = vand.u32 4294901760, %v1894_v42 }
 0x1f4   : > { %v4740_v51 = vadd.f32 %v1355_v10, %v1163_v59  ;;  %1933 = vmatpush.msrb.mxu0 %v4787_v48  ;;  %v4793_v59 = vsub.f32 %v1894_v42, %v4787_v48  ;;  %2384 = vmatpush.msrb.mxu3 %v4787_v48 }
 0x1f6   : > { %1745 = vmatmul.f32.gmra.mxu2 %v4512_v58  ;;  %1846 = vmatmul.f32.gmra.mxu3 %v4519_v27  ;;  %v2128_v58 = vsub.f32 %v4751_v39, %v5667_v40  ;;  %v5665_v2 = vand.u32 4294901760, %v4793_v59 }
 0x1f7   : > { %2267 = vmatpush.msrb.mxu2 %v4793_v59 }
 0x1f8   : > { %v2129_v0 = vand.u32 4294901760, %v2128_v58  ;;  %v1893_v58 = vld [vmem:[%s5645_s5 + $0x18] sm:$0xff] }
 0x1f9   : > { %v4754_v54 = vpop.f32.mrf.mxu2  ;;  %v4756_v15 = vpop.f32.mrf.mxu3 }
 0x1fa   : > { %2130 = vmatpush.msrb.mxu1 %v2129_v0  ;;  %v4808_v0 = vand.u32 4294901760, %v1893_v58 }
 0x1fc   : > { %1935 = vmatpush.msrb.mxu0 %v4808_v0  ;;  %2386 = vmatpush.msrb.mxu3 %v4808_v0 }
 0x1fe   : > { %1749 = vmatmul.f32.gmra.mxu2 %v4519_v27  ;;  %1850 = vmatmul.f32.gmra.mxu3 %v4526_v14  ;;  %v2134_v27 = vsub.f32 %v4772_v50, %v5666_v25  ;;  %v1891_v25 = vld [vmem:[%s5645_s5 + $0x8] sm:$0xff] }
 0x1ff   : > { %v4840_v12 = vand.u32 4294901760, %v1891_v25 }
 0x200   : > { %v2135_v49 = vand.u32 4294901760, %v2134_v27  ;;  %v4814_v27 = vsub.f32 %v1893_v58, %v4808_v0 }
 0x201   : > { %v4775_v10 = vpop.f32.mrf.mxu2  ;;  %v4777_v47 = vpop.f32.mrf.mxu3 }
 0x202   : > { %2136 = vmatpush.msrb.mxu1 %v2135_v49  ;;  %2270 = vmatpush.msrb.mxu2 %v4814_v27 }
 0x206   : > { %1753 = vmatmul.f32.gmra.mxu2 %v4526_v14  ;;  %1854 = vmatmul.f32.gmra.mxu3 %v4533_v36  ;;  %v2140_v14 = vsub.f32 %v4793_v59, %v5665_v2  ;;  %v4831_v2 = vpop.f32.mrf.mxu0 }
 0x208   : > { %v2141_v9 = vand.u32 4294901760, %v2140_v14  ;;  %v5670_v14 = vand.u32 4294901760, %v4814_v27 }
 0x209   : > { %v4796_v11 = vpop.f32.mrf.mxu2  ;;  %v4798_v53 = vpop.f32.mrf.mxu3 }
 0x20a   : > { %5733 = vst [vmem:[#allocation8_spill] sm:$0xff] %v4798_v53  ;;  %2142 = vmatpush.msrb.mxu1 %v2141_v9  ;;  %v2146_v9 = vsub.f32 %v4814_v27, %v5670_v14  ;;  %v1890_v14 = vld [vmem:[%s5645_s5] sm:$0xff] }
 0x20b   : > { %v4853_v35 = vand.u32 4294901760, %v1890_v14 }
 0x20c   : > { %v2147_v40 = vand.u32 4294901760, %v2146_v9 }
 0x20e   : > { %1757 = vmatmul.f32.gmra.mxu2 %v4533_v36  ;;  %1858 = vmatmul.f32.gmra.mxu3 %v4540_v44  ;;  %v1892_v36 = vld [vmem:[%s5645_s5 + $0x10] sm:$0xff] }
 0x20f   : > { %v4829_v58 = vand.u32 4294901760, %v1892_v36  ;;  %2148 = vmatpush.msrb.mxu1 %v2147_v40 }
 0x211   : > { %v4817_v42 = vpop.f32.mrf.mxu2  ;;  %v4819_v49 = vpop.f32.mrf.mxu3  ;;  %1937 = vmatpush.msrb.mxu0 %v4829_v58  ;;  %v4838_v4 = vsub.f32 %v1892_v36, %v4829_v58  ;;  %2388 = vmatpush.msrb.mxu3 %v4829_v58  ;;  %v4851_v36 = vsub.f32 %v1891_v25, %v4840_v12  ;;  %v2162_v25 = vsub.f32 %v1890_v14, %v4853_v35 }
 0x212   : > { %5734 = vst [vmem:[#allocation9_spill] sm:$0xff] %v4819_v49  ;;  %v1446_v14 = vpop.f32.mrf.mxu0 }
 0x213   : > { %v5678_v9 = vand.u32 4294901760, %v4838_v4  ;;  %1939 = vmatpush.msrb.mxu0 %v4840_v12  ;;  %2273 = vmatpush.msrb.mxu2 %v4838_v4  ;;  %v2157_v29 = vand.u32 4294901760, %v4851_v36  ;;  %v2163_v23 = vand.u32 4294901760, %v2162_v25 }
 0x214   : > { %2390 = vmatpush.msrb.mxu3 %v4840_v12 }
 0x215   : > { %v2152_v40 = vsub.f32 %v4838_v4, %v5678_v9  ;;  %1941 = vmatpush.msrb.mxu0 %v4853_v35  ;;  %2276 = vmatpush.msrb.mxu2 %v4851_v36  ;;  %v2158_v60 = vsub.f32 %v4851_v36, %v2157_v29  ;;  %v2164_v49 = vsub.f32 %v2162_v25, %v2163_v23  ;;  %v5739_v36 = vand.u32 4294901760, %v4609_v63 }
 0x216   : > { %1761 = vmatmul.f32.gmra.mxu2 %v4540_v44  ;;  %1862 = vmatmul.f32.gmra.mxu3 %v4547_v31  ;;  %v5743_v63 = vand.u32 4294901760, %v4689_v5 }
 0x217   : > { %2392 = vmatpush.msrb.mxu3 %v4853_v35  ;;  %v2153_v33 = vand.u32 4294901760, %v2152_v40  ;;  %2279 = vmatpush.msrb.mxu2 %v2162_v25  ;;  %v2159_v9 = vand.u32 4294901760, %v2158_v60  ;;  %v2165_v40 = vand.u32 4294901760, %v2164_v49  ;;  %v5740_v60 = vand.u32 4294901760, %v4629_v16 }
 0x219   : > { %v4859_v44 = vpop.f32.mrf.mxu2  ;;  %v4861_v37 = vpop.f32.mrf.mxu3  ;;  %2154 = vmatpush.msrb.mxu1 %v2153_v33  ;;  %v5742_v33 = vand.u32 4294901760, %v4669_v8 }
 0x21a   : > { %5735 = vst [vmem:[#allocation10_spill] sm:$0xff] %v4859_v44  ;;  %v5738_v44 = vand.u32 4294901760, %v4589_v41  ;;  %v1561_v41 = vpop.f32.mrf.mxu1  ;;  %v1451_v16 = vpop.f32.mrf.mxu0 }
 0x21b   : > { %5736 = vst [vmem:[#allocation11_spill] sm:$0xff] %v4861_v37  ;;  %v5737_v37 = vand.u32 4294901760, %v4567_v18  ;;  %2160 = vmatpush.msrb.mxu1 %v2159_v9  ;;  %v1452_v49 = vadd.f32 %v1451_v16, %v4638_v3 }
 0x21d   : > { %2493 = vmatpush.msra.mxu0 %v5737_v37  ;;  %2166 = vmatpush.msrb.mxu1 %v2165_v40 }
 0x21e   : > { %1765 = vmatmul.f32.gmra.mxu2 %v4547_v31  ;;  %1866 = vmatmul.f32.gmra.mxu3 %v4551_v17  ;;  %v5741_v31 = vand.u32 4294901760, %v4649_v19 }
 0x21f   : > { %2497 = vmatpush.msra.mxu0 %v5738_v44  ;;  %2620 = vmatpush.msra.mxu1 %v4562_v26 }
 0x221   : > { %2501 = vmatpush.msra.mxu0 %v5739_v36  ;;  %v4880_v53 = vpop.f32.mrf.mxu2  ;;  %v4882_v18 = vpop.f32.mrf.mxu3  ;;  %2622 = vmatpush.msra.mxu1 %v4578_v6  ;;  %v5744_v6 = vand.u32 4294901760, %v4709_v61 }
 0x222   : > { %v1567_v19 = vpop.f32.mrf.mxu1  ;;  %v1456_v61 = vpop.f32.mrf.mxu0 }
 0x223   : > { %2505 = vmatpush.msra.mxu0 %v5740_v60  ;;  %2624 = vmatpush.msra.mxu1 %v4603_v1  ;;  %v5746_v1 = vand.u32 4294901760, %v4751_v39 }
 0x225   : > { %2509 = vmatpush.msra.mxu0 %v5741_v31  ;;  %2626 = vmatpush.msra.mxu1 %v4623_v7  ;;  %v5747_v7 = vand.u32 4294901760, %v4772_v50 }
 0x226   : > { %1769 = vmatmul.f32.gmra.mxu2 %v4551_v17  ;;  %1870 = vmatmul.f32.gmra.mxu3 %v4555_v57  ;;  %v5745_v17 = vand.u32 4294901760, %v4729_v46 }
 0x227   : > { %2513 = vmatpush.msra.mxu0 %v5742_v33  ;;  %2628 = vmatpush.msra.mxu1 %v4643_v38  ;;  %v5748_v38 = vand.u32 4294901760, %v4793_v59  ;;  %v1457_v33 = vadd.f32 %v1456_v61, %v4658_v43 }
 0x229   : > { %2517 = vmatpush.msra.mxu0 %v5743_v63  ;;  %v4897_v37 = vpop.f32.mrf.mxu2  ;;  %v4899_v26 = vpop.f32.mrf.mxu3  ;;  %2630 = vmatpush.msra.mxu1 %v4663_v34  ;;  %v5749_v34 = vand.u32 4294901760, %v4814_v27 }
 0x22a   : > { %v1573_v46 = vpop.f32.mrf.mxu1 }
 0x22b   : > { %2521 = vmatpush.msra.mxu0 %v5744_v6  ;;  %2632 = vmatpush.msra.mxu1 %v4683_v55  ;;  %v5750_v55 = vand.u32 4294901760, %v4838_v4 }
 0x22d   : > { %2525 = vmatpush.msra.mxu0 %v5745_v17  ;;  %2634 = vmatpush.msra.mxu1 %v4703_v21 }
 0x22e   : > { %1773 = vmatmul.f32.gmra.mxu2 %v4555_v57  ;;  %v1442_v57 = vadd.f32 %v4831_v2, %v4598_v22  ;;  %v1461_v22 = vpop.f32.mrf.mxu0 }
 0x22f   : > { %2529 = vmatpush.msra.mxu0 %v5746_v1  ;;  %2636 = vmatpush.msra.mxu1 %v4723_v28  ;;  %v1462_v61 = vadd.f32 %v1461_v22, %v4678_v52 }
 0x230   : > { %v1556_v21 = vadd.f32 %v4855_v56, %v1442_v57 }
 0x231   : > { %2533 = vmatpush.msra.mxu0 %v5747_v7  ;;  %v4914_v8 = vpop.f32.mrf.mxu2  ;;  %v1811_v5 = vpop.f32.mrf.mxu3  ;;  %2638 = vmatpush.msra.mxu1 %v4745_v45  ;;  %v1447_v45 = vadd.f32 %v1446_v14, %v4618_v62  ;;  %v1568_v14 = vadd.f32 %v1567_v19, %v1452_v49  ;;  %v1574_v19 = vadd.f32 %v1573_v46, %v1457_v33 }
 0x233   : > { %2537 = vmatpush.msra.mxu0 %v5748_v38  ;;  %2640 = vmatpush.msra.mxu1 %v4766_v30  ;;  %v1562_v56 = vadd.f32 %v1561_v41, %v1447_v45 }
 0x235   : > { %2541 = vmatpush.msra.mxu0 %v5749_v34  ;;  %2642 = vmatpush.msra.mxu1 %v4787_v48 }
 0x237   : > { %2545 = vmatpush.msra.mxu0 %v5750_v55  ;;  %2644 = vmatpush.msra.mxu1 %v4808_v0 }
 0x239   : > { %2549 = vmatpush.msra.mxu0 %v2157_v29  ;;  %v1714_v39 = vpop.f32.mrf.mxu2  ;;  %v1815_v50 = vpop.f32.mrf.mxu3  ;;  %2646 = vmatpush.msra.mxu1 %v4829_v58 }
 0x23a   : > { %v1715_v28 = vadd.f32 %v1714_v39, %v1556_v21  ;;  %v1579_v29 = vpop.f32.mrf.mxu1  ;;  %v1466_v58 = vpop.f32.mrf.mxu0 }
 0x23b   : > { %2553 = vmatpush.msra.mxu0 %v2163_v23  ;;  %2648 = vmatpush.msra.mxu1 %v4840_v12  ;;  %v1580_v46 = vadd.f32 %v1579_v29, %v1462_v61  ;;  %v1467_v52 = vadd.f32 %v1466_v58, %v4698_v32 }
 0x23c   : > { %v1812_v59 = vadd.f32 %v1811_v5, %v1715_v28 }
 0x23d   : > { %2650 = vmatpush.msra.mxu1 %v4853_v35 }
 0x23e   : > { %v1874_v4 = vmax.f32 %v1812_v59, 0.0 }
 0x240   : > { %v4934_v30 = vand.u32 4294901760, %v1874_v4 }
 0x241   : > { %v1718_v2 = vpop.f32.mrf.mxu2  ;;  %v1819_v27 = vpop.f32.mrf.mxu3 }
 0x242   : > { %v1943_v23 = vsub.f32 %v1874_v4, %v4934_v30  ;;  %v1719_v48 = vadd.f32 %v1718_v2, %v1562_v56  ;;  %2168 = vmatmul.f32.vlgmr.msrb.gmra.mxu1 %v4934_v30  ;;  %v1585_v36 = vpop.f32.mrf.mxu1  ;;  %v1471_v6 = vpop.f32.mrf.mxu0 }
 0x243   : > { %v1472_v58 = vadd.f32 %v1471_v6, %v4718_v20 }
 0x244   : > { %v1944_v0 = vand.u32 4294901760, %v1943_v23  ;;  %v1816_v62 = vadd.f32 %v1815_v50, %v1719_v48  ;;  %2282 = vmatmul.f32.vlgmr.msrb.gmra.mxu2 %v1943_v23 }
 0x246   : > { %v1945_v12 = vsub.f32 %v1943_v23, %v1944_v0  ;;  %v1875_v9 = vmax.f32 %v1816_v62, 0.0  ;;  %2396 = vmatmul.f32.vlgmr.msrb.gmra.mxu3 %v1944_v0  ;;  %v1586_v62 = vadd.f32 %v1585_v36, %v1467_v52 }
 0x248   : > { %v1946_v44 = vand.u32 4294901760, %v1945_v12  ;;  %v4940_v25 = vand.u32 4294901760, %v1875_v9 }
 0x249   : > { %v1722_v40 = vpop.f32.mrf.mxu2  ;;  %v1823_v35 = vpop.f32.mrf.mxu3 }
 0x24a   : > { %v1723_v60 = vadd.f32 %v1722_v40, %v1568_v14  ;;  %1947 = vmatmul.f32.vlgmr.msrb.gmra.mxu0 %v1946_v44  ;;  %2172 = vmatmul.f32.gmra.mxu1 %v4940_v25  ;;  %v1951_v41 = vsub.f32 %v1875_v9, %v4940_v25  ;;  %v1591_v57 = vpop.f32.mrf.mxu1  ;;  %v1476_v4 = vpop.f32.mrf.mxu0 }
 0x24c   : > { %v1820_v31 = vadd.f32 %v1819_v27, %v1723_v60  ;;  %2287 = vmatmul.f32.gmra.mxu2 %v1951_v41  ;;  %v1952_v3 = vand.u32 4294901760, %v1951_v41 }
 0x24e   : > { %v1876_v63 = vmax.f32 %v1820_v31, 0.0  ;;  %2402 = vmatmul.f32.gmra.mxu3 %v1952_v3  ;;  %v1953_v16 = vsub.f32 %v1951_v41, %v1952_v3  ;;  %v1592_v3 = vadd.f32 %v1591_v57, %v1472_v58 }
 0x250   : > { %v4945_v17 = vand.u32 4294901760, %v1876_v63  ;;  %v1954_v1 = vand.u32 4294901760, %v1953_v16 }
 0x251   : > { %v1726_v7 = vpop.f32.mrf.mxu2  ;;  %v1827_v5 = vpop.f32.mrf.mxu3 }
 0x252   : > { %v1727_v38 = vadd.f32 %v1726_v7, %v1574_v19  ;;  %1955 = vmatmul.f32.gmra.mxu0 %v1954_v1  ;;  %2176 = vmatmul.f32.gmra.mxu1 %v4945_v17  ;;  %v1959_v34 = vsub.f32 %v1876_v63, %v4945_v17  ;;  %v1597_v22 = vpop.f32.mrf.mxu1  ;;  %v1481_v40 = vpop.f32.mrf.mxu0  ;;  %v1171_v7 = vadd.f32 %v4585_v24, %v4754_v54 }
 0x254   : > { %v1824_v55 = vadd.f32 %v1823_v35, %v1727_v38  ;;  %2292 = vmatmul.f32.gmra.mxu2 %v1959_v34  ;;  %v1960_v43 = vand.u32 4294901760, %v1959_v34 }
 0x256   : > { %v1877_v21 = vmax.f32 %v1824_v55, 0.0  ;;  %2408 = vmatmul.f32.gmra.mxu3 %v1960_v43  ;;  %v1961_v39 = vsub.f32 %v1959_v34, %v1960_v43  ;;  %v1360_v55 = vadd.f32 %v4732_v13, %v1171_v7 }
 0x258   : > { %v4950_v50 = vand.u32 4294901760, %v1877_v21  ;;  %v1962_v28 = vand.u32 4294901760, %v1961_v39  ;;  %v1482_v13 = vadd.f32 %v1481_v40, %v1360_v55 }
 0x259   : > { %v1730_v59 = vpop.f32.mrf.mxu2  ;;  %v1831_v45 = vpop.f32.mrf.mxu3 }
 0x25a   : > { %v1731_v56 = vadd.f32 %v1730_v59, %v1580_v46  ;;  %1963 = vmatmul.f32.gmra.mxu0 %v1962_v28  ;;  %2180 = vmatmul.f32.gmra.mxu1 %v4950_v50  ;;  %v1967_v2 = vsub.f32 %v1877_v21, %v4950_v50  ;;  %v1603_v31 = vpop.f32.mrf.mxu1  ;;  %v1486_v38 = vpop.f32.mrf.mxu0 }
 0x25c   : > { %v1828_v27 = vadd.f32 %v1827_v5, %v1731_v56  ;;  %2297 = vmatmul.f32.gmra.mxu2 %v1967_v2  ;;  %v1968_v23 = vand.u32 4294901760, %v1967_v2  ;;  %v1477_v5 = vadd.f32 %v1476_v4, %v4740_v51  ;;  %v1179_v51 = vadd.f32 %v4585_v24, %v4775_v10 }
 0x25e   : > { %v1878_v48 = vmax.f32 %v1828_v27, 0.0  ;;  %2414 = vmatmul.f32.gmra.mxu3 %v1968_v23  ;;  %v1969_v0 = vsub.f32 %v1967_v2, %v1968_v23  ;;  %v1598_v61 = vadd.f32 %v1597_v22, %v1477_v5  ;;  %v1364_v23 = vadd.f32 %v4756_v15, %v1179_v51  ;;  %v5751_v5 = vld [vmem:[#allocation8_spill] sm:$0xff] }
 0x25f   : > { %v1604_v22 = vadd.f32 %v1603_v31, %v1482_v13 }
 0x260   : > { %v4955_v29 = vand.u32 4294901760, %v1878_v48  ;;  %v1970_v49 = vand.u32 4294901760, %v1969_v0 }
 0x261   : > { %v1734_v12 = vpop.f32.mrf.mxu2  ;;  %v1835_v9 = vpop.f32.mrf.mxu3 }
 0x262   : > { %v1735_v44 = vadd.f32 %v1734_v12, %v1586_v62  ;;  %1971 = vmatmul.f32.gmra.mxu0 %v1970_v49  ;;  %2184 = vmatmul.f32.gmra.mxu1 %v4955_v29  ;;  %v1975_v14 = vsub.f32 %v1878_v48, %v4955_v29  ;;  %v1609_v59 = vpop.f32.mrf.mxu1  ;;  %v1491_v27 = vpop.f32.mrf.mxu0  ;;  %v1187_v12 = vadd.f32 %v4585_v24, %v4796_v11 }
 0x264   : > { %v1832_v35 = vadd.f32 %v1831_v45, %v1735_v44  ;;  %2302 = vmatmul.f32.gmra.mxu2 %v1975_v14  ;;  %v1976_v32 = vand.u32 4294901760, %v1975_v14 }
 0x266   : > { %v1879_v60 = vmax.f32 %v1832_v35, 0.0  ;;  %2420 = vmatmul.f32.gmra.mxu3 %v1976_v32  ;;  %v1977_v41 = vsub.f32 %v1975_v14, %v1976_v32  ;;  %v1487_v14 = vadd.f32 %v1486_v38, %v1364_v23  ;;  %v1368_v32 = vadd.f32 %v4777_v47, %v1187_v12 }
 0x268   : > { %v4960_v36 = vand.u32 4294901760, %v1879_v60  ;;  %v1978_v33 = vand.u32 4294901760, %v1977_v41  ;;  %v1492_v47 = vadd.f32 %v1491_v27, %v1368_v32  ;;  %v5754_v32 = vld [vmem:[#allocation11_spill] sm:$0xff] }
 0x269   : > { %v1738_v63 = vpop.f32.mrf.mxu2  ;;  %v1839_v16 = vpop.f32.mrf.mxu3 }
 0x26a   : > { %v1739_v19 = vadd.f32 %v1738_v63, %v1592_v3  ;;  %1979 = vmatmul.f32.gmra.mxu0 %v1978_v33  ;;  %2188 = vmatmul.f32.gmra.mxu1 %v4960_v36  ;;  %v1983_v1 = vsub.f32 %v1879_v60, %v4960_v36  ;;  %v1615_v15 = vpop.f32.mrf.mxu1  ;;  %v1610_v60 = vadd.f32 %v1609_v59, %v1487_v14  ;;  %v1496_v63 = vpop.f32.mrf.mxu0 }
 0x26c   : > { %v1836_v20 = vadd.f32 %v1835_v9, %v1739_v19  ;;  %2307 = vmatmul.f32.gmra.mxu2 %v1983_v1  ;;  %v1984_v6 = vand.u32 4294901760, %v1983_v1 }
 0x26e   : > { %v1880_v34 = vmax.f32 %v1836_v20, 0.0  ;;  %2426 = vmatmul.f32.gmra.mxu3 %v1984_v6  ;;  %v1985_v57 = vsub.f32 %v1983_v1, %v1984_v6 }
 0x270   : > { %v4968_v43 = vand.u32 4294901760, %v1880_v34  ;;  %v1986_v21 = vand.u32 4294901760, %v1985_v57  ;;  %v1616_v57 = vadd.f32 %v1615_v15, %v1492_v47 }
 0x271   : > { %v1742_v39 = vpop.f32.mrf.mxu2  ;;  %v1843_v46 = vpop.f32.mrf.mxu3 }
 0x272   : > { %v1743_v28 = vadd.f32 %v1742_v39, %v1598_v61  ;;  %1987 = vmatmul.f32.gmra.mxu0 %v1986_v21  ;;  %2192 = vmatmul.f32.gmra.mxu1 %v4968_v43  ;;  %v1991_v54 = vsub.f32 %v1880_v34, %v4968_v43  ;;  %v1621_v6 = vpop.f32.mrf.mxu1 }
 0x274   : > { %v1840_v45 = vadd.f32 %v1839_v16, %v1743_v28  ;;  %2312 = vmatmul.f32.gmra.mxu2 %v1991_v54  ;;  %v1992_v4 = vand.u32 4294901760, %v1991_v54  ;;  %v1195_v16 = vadd.f32 %v4585_v24, %v4817_v42 }
 0x276   : > { %v1881_v56 = vmax.f32 %v1840_v45, 0.0  ;;  %2432 = vmatmul.f32.gmra.mxu3 %v1992_v4  ;;  %v1993_v2 = vsub.f32 %v1991_v54, %v1992_v4  ;;  %v1372_v38 = vadd.f32 %v5751_v5, %v1195_v16  ;;  %v1501_v45 = vpop.f32.mrf.mxu0  ;;  %v1219_v16 = vadd.f32 %v4585_v24, %v4897_v37 }
 0x278   : > { %v4975_v52 = vand.u32 4294901760, %v1881_v56  ;;  %v1994_v48 = vand.u32 4294901760, %v1993_v2  ;;  %v1497_v51 = vadd.f32 %v1496_v63, %v1372_v38  ;;  %v1384_v5 = vadd.f32 %v4882_v18, %v1219_v16  ;;  %v2747_v16 = vld [vmem:[#allocation2 + $0x78] sm:$0xff] }
 0x279   : > { %v1746_v0 = vpop.f32.mrf.mxu2  ;;  %v1847_v62 = vpop.f32.mrf.mxu3 }
 0x27a   : > { %v1747_v49 = vadd.f32 %v1746_v0, %v1604_v22  ;;  %1995 = vmatmul.f32.gmra.mxu0 %v1994_v48  ;;  %2196 = vmatmul.f32.gmra.mxu1 %v4975_v52  ;;  %v1999_v10 = vsub.f32 %v1881_v56, %v4975_v52  ;;  %v5753_v56 = vld [vmem:[#allocation9_spill] sm:$0xff]  ;;  %v1622_v23 = vadd.f32 %v1621_v6, %v1497_v51  ;;  %v1627_v48 = vpop.f32.mrf.mxu1 }
 0x27c   : > { %v1844_v9 = vadd.f32 %v1843_v46, %v1747_v49  ;;  %2317 = vmatmul.f32.gmra.mxu2 %v1999_v10  ;;  %v2000_v44 = vand.u32 4294901760, %v1999_v10  ;;  %v5752_v46 = vld [vmem:[#allocation10_spill] sm:$0xff] }
 0x27d   : > { %v1203_v28 = vadd.f32 %v4585_v24, %v5752_v46 }
 0x27e   : > { %v1882_v40 = vmax.f32 %v1844_v9, 0.0  ;;  %2438 = vmatmul.f32.gmra.mxu3 %v2000_v44  ;;  %v2001_v35 = vsub.f32 %v1999_v10, %v2000_v44  ;;  %v1211_v10 = vadd.f32 %v4585_v24, %v4880_v53 }
 0x27f   : > { %v1376_v2 = vadd.f32 %v5753_v56, %v1203_v28 }
 0x280   : > { %v4982_v58 = vand.u32 4294901760, %v1882_v40  ;;  %v2002_v41 = vand.u32 4294901760, %v2001_v35  ;;  %v1506_v35 = vpop.f32.mrf.mxu0 }
 0x281   : > { %v1750_v31 = vpop.f32.mrf.mxu2  ;;  %v1851_v3 = vpop.f32.mrf.mxu3  ;;  %v1502_v44 = vadd.f32 %v1501_v45, %v1376_v2 }
 0x282   : > { %v1751_v33 = vadd.f32 %v1750_v31, %v1610_v60  ;;  %2003 = vmatmul.f32.gmra.mxu0 %v2002_v41  ;;  %2200 = vmatmul.f32.gmra.mxu1 %v4982_v58  ;;  %v2007_v11 = vsub.f32 %v1882_v40, %v4982_v58  ;;  %v1380_v60 = vadd.f32 %v5754_v32, %v1211_v10  ;;  %v1633_v63 = vpop.f32.mrf.mxu1 }
 0x283   : > { %v1628_v31 = vadd.f32 %v1627_v48, %v1502_v44 }
 0x284   : > { %v1848_v19 = vadd.f32 %v1847_v62, %v1751_v33  ;;  %2322 = vmatmul.f32.gmra.mxu2 %v2007_v11  ;;  %v2008_v1 = vand.u32 4294901760, %v2007_v11  ;;  %v1507_v47 = vadd.f32 %v1506_v35, %v1380_v60 }
 0x286   : > { %v1883_v7 = vmax.f32 %v1848_v19, 0.0  ;;  %2444 = vmatmul.f32.gmra.mxu3 %v2008_v1  ;;  %v2009_v20 = vsub.f32 %v2007_v11, %v2008_v1 }
 0x288   : > { %v4989_v34 = vand.u32 4294901760, %v1883_v7  ;;  %v2010_v55 = vand.u32 4294901760, %v2009_v20 }
 0x289   : > { %v1754_v61 = vpop.f32.mrf.mxu2  ;;  %v1855_v39 = vpop.f32.mrf.mxu3 }
 0x28a   : > { %v1755_v21 = vadd.f32 %v1754_v61, %v1616_v57  ;;  %2011 = vmatmul.f32.gmra.mxu0 %v2010_v55  ;;  %2204 = vmatmul.f32.gmra.mxu1 %v4989_v34  ;;  %v2015_v42 = vsub.f32 %v1883_v7, %v4989_v34  ;;  %v1634_v57 = vadd.f32 %v1633_v63, %v1507_v47  ;;  %v1511_v61 = vpop.f32.mrf.mxu0  ;;  %v1639_v18 = vpop.f32.mrf.mxu1 }
 0x28c   : > { %v1852_v54 = vadd.f32 %v1851_v3, %v1755_v21  ;;  %2327 = vmatmul.f32.gmra.mxu2 %v2015_v42  ;;  %v2016_v59 = vand.u32 4294901760, %v2015_v42 }
 0x28e   : > { %v1884_v4 = vmax.f32 %v1852_v54, 0.0  ;;  %2450 = vmatmul.f32.gmra.mxu3 %v2016_v59  ;;  %v2017_v13 = vsub.f32 %v2015_v42, %v2016_v59  ;;  %v1512_v54 = vadd.f32 %v1511_v61, %v1384_v5 }
 0x290   : > { %v4996_v27 = vand.u32 4294901760, %v1884_v4  ;;  %v2018_v22 = vand.u32 4294901760, %v2017_v13  ;;  %v1640_v13 = vadd.f32 %v1639_v18, %v1512_v54 }
 0x291   : > { %v1758_v0 = vpop.f32.mrf.mxu2  ;;  %v1859_v14 = vpop.f32.mrf.mxu3 }
 0x292   : > { %v1759_v62 = vadd.f32 %v1758_v0, %v1622_v23  ;;  %2019 = vmatmul.f32.gmra.mxu0 %v2018_v22  ;;  %2208 = vmatmul.f32.gmra.mxu1 %v4996_v27  ;;  %v2023_v49 = vsub.f32 %v1884_v4, %v4996_v27  ;;  %v1645_v10 = vpop.f32.mrf.mxu1 }
 0x294   : > { %v1856_v12 = vadd.f32 %v1855_v39, %v1759_v62  ;;  %2332 = vmatmul.f32.gmra.mxu2 %v2023_v49  ;;  %v2024_v9 = vand.u32 4294901760, %v2023_v49  ;;  %v1227_v39 = vadd.f32 %v4585_v24, %v4914_v8  ;;  %v1516_v8 = vpop.f32.mrf.mxu0 }
 0x296   : > { %v1885_v15 = vmax.f32 %v1856_v12, 0.0  ;;  %2456 = vmatmul.f32.gmra.mxu3 %v2024_v9  ;;  %v2025_v40 = vsub.f32 %v2023_v49, %v2024_v9  ;;  %v1388_v45 = vadd.f32 %v4899_v26, %v1227_v39 }
 0x298   : > { %v5003_v41 = vand.u32 4294901760, %v1885_v15  ;;  %v2026_v3 = vand.u32 4294901760, %v2025_v40  ;;  %v1517_v62 = vadd.f32 %v1516_v8, %v1388_v45 }
 0x299   : > { %v1762_v33 = vpop.f32.mrf.mxu2  ;;  %v1863_v6 = vpop.f32.mrf.mxu3 }
 0x29a   : > { %v1763_v11 = vadd.f32 %v1762_v33, %v1628_v31  ;;  %2027 = vmatmul.f32.gmra.mxu0 %v2026_v3  ;;  %2212 = vmatmul.f32.gmra.mxu1 %v5003_v41  ;;  %v2031_v53 = vsub.f32 %v1885_v15, %v5003_v41  ;;  %v1646_v9 = vadd.f32 %v1645_v10, %v1517_v62 }
 0x29c   : > { %v1860_v19 = vadd.f32 %v1859_v14, %v1763_v11  ;;  %2337 = vmatmul.f32.gmra.mxu2 %v2031_v53  ;;  %v2032_v1 = vand.u32 4294901760, %v2031_v53 }
 0x29e   : > { %v1886_v7 = vmax.f32 %v1860_v19, 0.0  ;;  %2462 = vmatmul.f32.gmra.mxu3 %v2032_v1  ;;  %v2033_v20 = vsub.f32 %v2031_v53, %v2032_v1  ;;  %v5029_v19 = vand.u32 4294901760, %v2747_v16 }
 0x2a0   : > { %v5010_v38 = vand.u32 4294901760, %v1886_v7  ;;  %v2034_v55 = vand.u32 4294901760, %v2033_v20  ;;  %2753 = vmatpush.msra.mxu2 %v5029_v19  ;;  %3204 = vmatpush.msrb.mxu1 %v5029_v19 }
 0x2a1   : > { %v1766_v21 = vpop.f32.mrf.mxu2  ;;  %v1867_v2 = vpop.f32.mrf.mxu3 }
 0x2a2   : > { %v1767_v42 = vadd.f32 %v1766_v21, %v1634_v57  ;;  %2035 = vmatmul.f32.gmra.mxu0 %v2034_v55  ;;  %2216 = vmatmul.f32.gmra.mxu1 %v5010_v38  ;;  %v2039_v37 = vsub.f32 %v1886_v7, %v5010_v38  ;;  %v5035_v7 = vsub.f32 %v2747_v16, %v5029_v19  ;;  %v2746_v57 = vld [vmem:[#allocation2 + $0x70] sm:$0xff] }
 0x2a3   : > { %v5044_v61 = vand.u32 4294901760, %v2746_v57 }
 0x2a4   : > { %v1864_v46 = vadd.f32 %v1863_v6, %v1767_v42  ;;  %2342 = vmatmul.f32.gmra.mxu2 %v2039_v37  ;;  %v2040_v28 = vand.u32 4294901760, %v2039_v37  ;;  %v5690_v6 = vand.u32 4294901760, %v5035_v7  ;;  %3076 = vmatpush.msrb.mxu0 %v5035_v7 }
 0x2a5   : > { %2755 = vmatpush.msra.mxu2 %v5044_v61  ;;  %3206 = vmatpush.msrb.mxu1 %v5044_v61 }
 0x2a6   : > { %v1887_v59 = vmax.f32 %v1864_v46, 0.0  ;;  %2468 = vmatmul.f32.gmra.mxu3 %v2040_v28  ;;  %v2041_v51 = vsub.f32 %v2039_v37, %v2040_v28  ;;  %v2916_v5 = vsub.f32 %v5035_v7, %v5690_v6  ;;  %v5052_v37 = vsub.f32 %v2746_v57, %v5044_v61  ;;  %v2745_v28 = vld [vmem:[#allocation2 + $0x68] sm:$0xff] }
 0x2a7   : > { %v5062_v18 = vand.u32 4294901760, %v2745_v28 }
 0x2a8   : > { %v5017_v4 = vand.u32 4294901760, %v1887_v59  ;;  %v2042_v56 = vand.u32 4294901760, %v2041_v51  ;;  %v2917_v55 = vand.u32 4294901760, %v2916_v5  ;;  %v5689_v39 = vand.u32 4294901760, %v5052_v37  ;;  %3079 = vmatpush.msrb.mxu0 %v5052_v37  ;;  %v2740_v5 = vld [vmem:[#allocation2 + $0x40] sm:$0xff] }
 0x2a9   : > { %v1770_v23 = vpop.f32.mrf.mxu2  ;;  %v1871_v35 = vpop.f32.mrf.mxu3  ;;  %2757 = vmatpush.msra.mxu2 %v5062_v18  ;;  %v5070_v45 = vsub.f32 %v2745_v28, %v5062_v18  ;;  %3208 = vmatpush.msrb.mxu1 %v5062_v18 }
 0x2aa   : > { %v1771_v22 = vadd.f32 %v1770_v23, %v1640_v13  ;;  %2043 = vmatmul.f32.gmra.mxu0 %v2042_v56  ;;  %2220 = vmatmul.f32.gmra.mxu1 %v5017_v4  ;;  %v2047_v24 = vsub.f32 %v1887_v59, %v5017_v4  ;;  %v2922_v46 = vsub.f32 %v5052_v37, %v5689_v39  ;;  %v2744_v56 = vld [vmem:[#allocation2 + $0x60] sm:$0xff] }
 0x2ab   : > { %2918 = vmatpush.msra.mxu3 %v2917_v55  ;;  %3082 = vmatpush.msrb.mxu0 %v5070_v45  ;;  %v5080_v23 = vand.u32 4294901760, %v2744_v56  ;;  %v5152_v55 = vand.u32 4294901760, %v2740_v5 }
 0x2ac   : > { %v1868_v48 = vadd.f32 %v1867_v2, %v1771_v22  ;;  %2347 = vmatmul.f32.gmra.mxu2 %v2047_v24  ;;  %v2048_v0 = vand.u32 4294901760, %v2047_v24  ;;  %v2923_v54 = vand.u32 4294901760, %v2922_v46 }
 0x2ad   : > { %2759 = vmatpush.msra.mxu2 %v5080_v23  ;;  %v5088_v8 = vsub.f32 %v2744_v56, %v5080_v23  ;;  %3210 = vmatpush.msrb.mxu1 %v5080_v23  ;;  %v2739_v56 = vld [vmem:[#allocation2 + $0x38] sm:$0xff] }
 0x2ae   : > { %v1888_v49 = vmax.f32 %v1868_v48, 0.0  ;;  %2474 = vmatmul.f32.gmra.mxu3 %v2048_v0  ;;  %v2049_v26 = vsub.f32 %v2047_v24, %v2048_v0  ;;  %v2743_v0 = vld [vmem:[#allocation2 + $0x58] sm:$0xff] }
 0x2af   : > { %2924 = vmatpush.msra.mxu3 %v2923_v54  ;;  %3085 = vmatpush.msrb.mxu0 %v5088_v8  ;;  %v5160_v54 = vsub.f32 %v2740_v5, %v5152_v55 }
 0x2b0   : > { %v5021_v12 = vand.u32 4294901760, %v1888_v49  ;;  %v2050_v44 = vand.u32 4294901760, %v2049_v26 }
 0x2b1   : > { %v1774_v14 = vpop.f32.mrf.mxu2 }
 0x2b2   : > { %v1775_v15 = vadd.f32 %v1774_v14, %v1646_v9  ;;  %2051 = vmatmul.f32.gmra.mxu0 %v2050_v44  ;;  %2224 = vmatmul.f32.gmra.mxu1 %v5021_v12  ;;  %v2055_v40 = vsub.f32 %v1888_v49, %v5021_v12  ;;  %v5098_v49 = vand.u32 4294901760, %v2743_v0  ;;  %v2742_v14 = vld [vmem:[#allocation2 + $0x50] sm:$0xff] }
 0x2b4   : > { %v1872_v32 = vadd.f32 %v1871_v35, %v1775_v15  ;;  %2352 = vmatmul.f32.gmra.mxu2 %v2055_v40  ;;  %v2056_v60 = vand.u32 4294901760, %v2055_v40  ;;  %v5106_v9 = vsub.f32 %v2743_v0, %v5098_v49  ;;  %3212 = vmatpush.msrb.mxu1 %v5098_v49 }
 0x2b5   : > { %2761 = vmatpush.msra.mxu2 %v5098_v49 }
 0x2b6   : > { %v1889_v31 = vmax.f32 %v1872_v32, 0.0  ;;  %2480 = vmatmul.f32.gmra.mxu3 %v2056_v60  ;;  %v2057_v3 = vsub.f32 %v2055_v40, %v2056_v60  ;;  %3088 = vmatpush.msrb.mxu0 %v5106_v9  ;;  %v5116_v40 = vand.u32 4294901760, %v2742_v14 }
 0x2b8   : > { %v5025_v33 = vand.u32 4294901760, %v1889_v31  ;;  %v2058_v11 = vand.u32 4294901760, %v2057_v3  ;;  %2763 = vmatpush.msra.mxu2 %v5116_v40  ;;  %v5124_v60 = vsub.f32 %v2742_v14, %v5116_v40  ;;  %3214 = vmatpush.msrb.mxu1 %v5116_v40  ;;  %v2741_v3 = vld [vmem:[#allocation2 + $0x48] sm:$0xff] }
 0x2ba   : > { %2059 = vmatmul.f32.gmra.mxu0 %v2058_v11  ;;  %2228 = vmatmul.f32.gmra.mxu1 %v5025_v33  ;;  %v2063_v53 = vsub.f32 %v1889_v31, %v5025_v33 }
 0x2bb   : > { %3091 = vmatpush.msrb.mxu0 %v5124_v60 }
 0x2bc   : > { %2357 = vmatmul.f32.gmra.mxu2 %v2063_v53  ;;  %v2064_v63 = vand.u32 4294901760, %v2063_v53 }
 0x2be   : > { %2486 = vmatmul.f32.gmra.mxu3 %v2064_v63  ;;  %v2065_v1 = vsub.f32 %v2063_v53, %v2064_v63  ;;  %v5134_v53 = vand.u32 4294901760, %v2741_v3 }
 0x2bf   : > { %v5031_v47 = vpop.f32.mrf.mxu1 }
 0x2c0   : > { %v2066_v20 = vand.u32 4294901760, %v2065_v1  ;;  %2765 = vmatpush.msra.mxu2 %v5134_v53  ;;  %v5142_v1 = vsub.f32 %v2741_v3, %v5134_v53  ;;  %3216 = vmatpush.msrb.mxu1 %v5134_v53 }
 0x2c2   : > { %2067 = vmatmul.f32.gmra.mxu0 %v2066_v20  ;;  %2652 = vmatmul.f32.vlgmr.msra.gmra.mxu1 %v4934_v30 }
 0x2c3   : > { %3094 = vmatpush.msrb.mxu0 %v5142_v1  ;;  %2767 = vmatpush.msra.mxu2 %v5152_v55 }
 0x2c4   : > { %3218 = vmatpush.msrb.mxu1 %v5152_v55 }
 0x2c5   : > { %3097 = vmatpush.msrb.mxu0 %v5160_v54 }
 0x2c7   : > { %v5046_v21 = vpop.f32.mrf.mxu0  ;;  %v5048_v42 = vpop.f32.mrf.mxu1 }
 0x2ca   : > { %2555 = vmatmul.f32.vlgmr.msra.gmra.mxu0 %v4934_v30  ;;  %2656 = vmatmul.f32.gmra.mxu1 %v4940_v25  ;;  %v5687_v30 = vand.u32 4294901760, %v5070_v45 }
 0x2cc   : > { %v2928_v13 = vsub.f32 %v5070_v45, %v5687_v30  ;;  %v2734_v30 = vld [vmem:[#allocation2 + $0x10] sm:$0xff] }
 0x2ce   : > { %v2929_v2 = vand.u32 4294901760, %v2928_v13 }
 0x2cf   : > { %v5064_v59 = vpop.f32.mrf.mxu0  ;;  %v5066_v51 = vpop.f32.mrf.mxu1 }
 0x2d0   : > { %2930 = vmatpush.msra.mxu3 %v2929_v2 }
 0x2d2   : > { %2559 = vmatmul.f32.gmra.mxu0 %v4940_v25  ;;  %2660 = vmatmul.f32.gmra.mxu1 %v4945_v17  ;;  %v5686_v25 = vand.u32 4294901760, %v5088_v8 }
 0x2d4   : > { %v2934_v48 = vsub.f32 %v5088_v8, %v5686_v25 }
 0x2d6   : > { %v2935_v62 = vand.u32 4294901760, %v2934_v48  ;;  %v5170_v48 = vand.u32 4294901760, %v2739_v56 }
 0x2d7   : > { %v5082_v22 = vpop.f32.mrf.mxu0  ;;  %v5084_v24 = vpop.f32.mrf.mxu1 }
 0x2d8   : > { %2936 = vmatpush.msra.mxu3 %v2935_v62  ;;  %2769 = vmatpush.msra.mxu2 %v5170_v48 }
 0x2d9   : > { %3220 = vmatpush.msrb.mxu1 %v5170_v48 }
 0x2da   : > { %2563 = vmatmul.f32.gmra.mxu0 %v4945_v17  ;;  %2664 = vmatmul.f32.gmra.mxu1 %v4950_v50  ;;  %v5685_v17 = vand.u32 4294901760, %v5106_v9 }
 0x2dc   : > { %v2940_v44 = vsub.f32 %v5106_v9, %v5685_v17 }
 0x2de   : > { %v2941_v15 = vand.u32 4294901760, %v2940_v44  ;;  %v5178_v44 = vsub.f32 %v2739_v56, %v5170_v48 }
 0x2df   : > { %v5100_v26 = vpop.f32.mrf.mxu0  ;;  %v5102_v10 = vpop.f32.mrf.mxu1 }
 0x2e0   : > { %2942 = vmatpush.msra.mxu3 %v2941_v15  ;;  %3100 = vmatpush.msrb.mxu0 %v5178_v44  ;;  %v2738_v15 = vld [vmem:[#allocation2 + $0x30] sm:$0xff] }
 0x2e1   : > { %v5188_v3 = vand.u32 4294901760, %v2738_v15 }
 0x2e2   : > { %2567 = vmatmul.f32.gmra.mxu0 %v4950_v50  ;;  %2668 = vmatmul.f32.gmra.mxu1 %v4955_v29  ;;  %v5684_v50 = vand.u32 4294901760, %v5124_v60 }
 0x2e3   : > { %2771 = vmatpush.msra.mxu2 %v5188_v3  ;;  %v5196_v5 = vsub.f32 %v2738_v15, %v5188_v3  ;;  %3222 = vmatpush.msrb.mxu1 %v5188_v3 }
 0x2e4   : > { %v2946_v31 = vsub.f32 %v5124_v60, %v5684_v50 }
 0x2e5   : > { %3103 = vmatpush.msrb.mxu0 %v5196_v5 }
 0x2e6   : > { %v2947_v11 = vand.u32 4294901760, %v2946_v31 }
 0x2e7   : > { %v5118_v35 = vpop.f32.mrf.mxu0  ;;  %v5120_v32 = vpop.f32.mrf.mxu1 }
 0x2e8   : > { %2948 = vmatpush.msra.mxu3 %v2947_v11 }
 0x2ea   : > { %2571 = vmatmul.f32.gmra.mxu0 %v4955_v29  ;;  %2672 = vmatmul.f32.gmra.mxu1 %v4960_v36  ;;  %v5682_v29 = vand.u32 4294901760, %v5142_v1 }
 0x2ec   : > { %v2952_v20 = vsub.f32 %v5142_v1, %v5682_v29 }
 0x2ee   : > { %v2953_v57 = vand.u32 4294901760, %v2952_v20 }
 0x2ef   : > { %v5136_v63 = vpop.f32.mrf.mxu0  ;;  %v5138_v16 = vpop.f32.mrf.mxu1 }
 0x2f0   : > { %2954 = vmatpush.msra.mxu3 %v2953_v57 }
 0x2f2   : > { %2575 = vmatmul.f32.gmra.mxu0 %v4960_v36  ;;  %2676 = vmatmul.f32.gmra.mxu1 %v4968_v43  ;;  %v5681_v36 = vand.u32 4294901760, %v5160_v54 }
 0x2f4   : > { %v2958_v13 = vsub.f32 %v5160_v54, %v5681_v36 }
 0x2f6   : > { %v2959_v2 = vand.u32 4294901760, %v2958_v13  ;;  %v2737_v13 = vld [vmem:[#allocation2 + $0x28] sm:$0xff] }
 0x2f7   : > { %v5154_v46 = vpop.f32.mrf.mxu0  ;;  %v5156_v28 = vpop.f32.mrf.mxu1 }
 0x2f8   : > { %5755 = vst [vmem:[#allocation12_spill] sm:$0xff] %v5156_v28  ;;  %2960 = vmatpush.msra.mxu3 %v2959_v2  ;;  %v5206_v2 = vand.u32 4294901760, %v2737_v13 }
 0x2fa   : > { %2579 = vmatmul.f32.gmra.mxu0 %v4968_v43  ;;  %2680 = vmatmul.f32.gmra.mxu1 %v4975_v52  ;;  %v5680_v43 = vand.u32 4294901760, %v5178_v44 }
 0x2fb   : > { %2773 = vmatpush.msra.mxu2 %v5206_v2  ;;  %3224 = vmatpush.msrb.mxu1 %v5206_v2 }
 0x2fc   : > { %v2964_v14 = vsub.f32 %v5178_v44, %v5680_v43 }
 0x2fe   : > { %v2965_v31 = vand.u32 4294901760, %v2964_v14 }
 0x2ff   : > { %v5172_v0 = vpop.f32.mrf.mxu0  ;;  %v5174_v62 = vpop.f32.mrf.mxu1 }
 0x300   : > { %5756 = vst [vmem:[#allocation13_spill] sm:$0xff] %v5174_v62  ;;  %2966 = vmatpush.msra.mxu3 %v2965_v31  ;;  %v5214_v31 = vsub.f32 %v2737_v13, %v5206_v2 }
 0x302   : > { %2583 = vmatmul.f32.gmra.mxu0 %v4975_v52  ;;  %2684 = vmatmul.f32.gmra.mxu1 %v4982_v58  ;;  %v5679_v52 = vand.u32 4294901760, %v5196_v5 }
 0x303   : > { %3106 = vmatpush.msrb.mxu0 %v5214_v31 }
 0x304   : > { %v2970_v57 = vsub.f32 %v5196_v5, %v5679_v52 }
 0x306   : > { %v2971_v56 = vand.u32 4294901760, %v2970_v57 }
 0x307   : > { %v5190_v11 = vpop.f32.mrf.mxu0  ;;  %v5192_v20 = vpop.f32.mrf.mxu1 }
 0x308   : > { %5757 = vst [vmem:[#allocation14_spill] sm:$0xff] %v5190_v11  ;;  %2972 = vmatpush.msra.mxu3 %v2971_v56  ;;  %v2736_v56 = vld [vmem:[#allocation2 + $0x20] sm:$0xff]  ;;  %v5770_v11 = vand.u32 4294901760, %v5088_v8  ;;  %v5773_v8 = vand.u32 4294901760, %v5142_v1 }
 0x309   : > { %5758 = vst [vmem:[#allocation15_spill] sm:$0xff] %v5192_v20  ;;  %v5224_v43 = vand.u32 4294901760, %v2736_v56 }
 0x30a   : > { %2587 = vmatmul.f32.gmra.mxu0 %v4982_v58  ;;  %2688 = vmatmul.f32.gmra.mxu1 %v4989_v34  ;;  %v5683_v58 = vand.u32 4294901760, %v5214_v31 }
 0x30b   : > { %2775 = vmatpush.msra.mxu2 %v5224_v43  ;;  %v5232_v29 = vsub.f32 %v2736_v56, %v5224_v43  ;;  %3226 = vmatpush.msrb.mxu1 %v5224_v43 }
 0x30c   : > { %v2976_v57 = vsub.f32 %v5214_v31, %v5683_v58 }
 0x30d   : > { %3109 = vmatpush.msrb.mxu0 %v5232_v29 }
 0x30e   : > { %v2977_v52 = vand.u32 4294901760, %v2976_v57 }
 0x30f   : > { %v5208_v14 = vpop.f32.mrf.mxu0  ;;  %v5210_v15 = vpop.f32.mrf.mxu1 }
 0x310   : > { %5759 = vst [vmem:[#allocation16_spill] sm:$0xff] %v5208_v14  ;;  %2978 = vmatpush.msra.mxu3 %v2977_v52  ;;  %v2735_v52 = vld [vmem:[#allocation2 + $0x18] sm:$0xff] }
 0x311   : > { %5760 = vst [vmem:[#allocation17_spill] sm:$0xff] %v5210_v15  ;;  %v5242_v50 = vand.u32 4294901760, %v2735_v52 }
 0x312   : > { %2591 = vmatmul.f32.gmra.mxu0 %v4989_v34  ;;  %2692 = vmatmul.f32.gmra.mxu1 %v4996_v27  ;;  %v5688_v34 = vand.u32 4294901760, %v5232_v29 }
 0x313   : > { %2777 = vmatpush.msra.mxu2 %v5242_v50  ;;  %v5250_v25 = vsub.f32 %v2735_v52, %v5242_v50  ;;  %3228 = vmatpush.msrb.mxu1 %v5242_v50  ;;  %v2733_v52 = vld [vmem:[#allocation2 + $0x8] sm:$0xff] }
 0x314   : > { %v2982_v57 = vsub.f32 %v5232_v29, %v5688_v34  ;;  %v5259_v34 = vand.u32 4294901760, %v2734_v30  ;;  %v5268_v6 = vand.u32 4294901760, %v2733_v52 }
 0x315   : > { %3112 = vmatpush.msrb.mxu0 %v5250_v25 }
 0x316   : > { %v2983_v58 = vand.u32 4294901760, %v2982_v57  ;;  %v5255_v57 = vpop.f32.mrf.mxu2  ;;  %2779 = vmatpush.msra.mxu2 %v5259_v34  ;;  %v5266_v39 = vsub.f32 %v2734_v30, %v5259_v34  ;;  %3230 = vmatpush.msrb.mxu1 %v5259_v34 }
 0x317   : > { %v5226_v13 = vpop.f32.mrf.mxu0  ;;  %v5228_v36 = vpop.f32.mrf.mxu1 }
 0x318   : > { %5761 = vst [vmem:[#allocation18_spill] sm:$0xff] %v5226_v13  ;;  %2984 = vmatpush.msra.mxu3 %v2983_v58  ;;  %2781 = vmatpush.msra.mxu2 %v5268_v6 }
 0x319   : > { %5762 = vst [vmem:[#allocation8_spill] sm:$0xff] %v5228_v36  ;;  %v5271_v36 = vpop.f32.mrf.mxu3  ;;  %3115 = vmatpush.msrb.mxu0 %v5266_v39  ;;  %3232 = vmatpush.msrb.mxu1 %v5268_v6 }
 0x31a   : > { %2595 = vmatmul.f32.gmra.mxu0 %v4996_v27  ;;  %2696 = vmatmul.f32.gmra.mxu1 %v5003_v41  ;;  %v5691_v27 = vand.u32 4294901760, %v5250_v25 }
 0x31c   : > { %v2988_v58 = vsub.f32 %v5250_v25, %v5691_v27  ;;  %v5276_v27 = vsub.f32 %v2733_v52, %v5268_v6 }
 0x31e   : > { %v5693_v20 = vand.u32 4294901760, %v5276_v27  ;;  %3118 = vmatpush.msrb.mxu0 %v5276_v27  ;;  %v2288_v14 = vpop.f32.mrf.mxu2 }
 0x31f   : > { %v5244_v56 = vpop.f32.mrf.mxu0  ;;  %v5246_v17 = vpop.f32.mrf.mxu1 }
 0x320   : > { %5763 = vst [vmem:[#allocation10_spill] sm:$0xff] %v5244_v56  ;;  %v5692_v56 = vand.u32 4294901760, %v5266_v39 }
 0x321   : > { %5764 = vst [vmem:[#allocation9_spill] sm:$0xff] %v5246_v17  ;;  %v2989_v17 = vand.u32 4294901760, %v2988_v58  ;;  %v2403_v28 = vpop.f32.mrf.mxu3 }
 0x322   : > { %2599 = vmatmul.f32.gmra.mxu0 %v5003_v41  ;;  %2700 = vmatmul.f32.gmra.mxu1 %v5010_v38  ;;  %v2732_v41 = vld [vmem:[#allocation2] sm:$0xff]  ;;  %v2994_v58 = vsub.f32 %v5266_v39, %v5692_v56  ;;  %v3000_v56 = vsub.f32 %v5276_v27, %v5693_v20 }
 0x323   : > { %v5279_v15 = vand.u32 4294901760, %v2732_v41  ;;  %2990 = vmatpush.msra.mxu3 %v2989_v17 }
 0x324   : > { %v2995_v17 = vand.u32 4294901760, %v2994_v58 }
 0x325   : > { %v5291_v52 = vsub.f32 %v2732_v41, %v5279_v15  ;;  %2783 = vmatpush.msra.mxu2 %v5279_v15  ;;  %3234 = vmatpush.msrb.mxu1 %v5279_v15 }
 0x326   : > { %2996 = vmatpush.msra.mxu3 %v2995_v17 }
 0x327   : > { %v5281_v30 = vpop.f32.mrf.mxu0  ;;  %v5283_v13 = vpop.f32.mrf.mxu1  ;;  %v3005_v41 = vand.u32 4294901760, %v5291_v52  ;;  %3121 = vmatpush.msrb.mxu0 %v5291_v52 }
 0x328   : > { %5765 = vst [vmem:[#allocation11_spill] sm:$0xff] %v5281_v30  ;;  %v5768_v30 = vand.u32 4294901760, %v5052_v37  ;;  %v5771_v37 = vand.u32 4294901760, %v5106_v9  ;;  %v2293_v9 = vpop.f32.mrf.mxu2 }
 0x329   : > { %5766 = vst [vmem:[#allocation19_spill] sm:$0xff] %v5283_v13  ;;  %v5767_v13 = vand.u32 4294901760, %v5035_v7  ;;  %v3001_v7 = vand.u32 4294901760, %v3000_v56  ;;  %v2409_v1 = vpop.f32.mrf.mxu3 }
 0x32a   : > { %2603 = vmatmul.f32.gmra.mxu0 %v5010_v38  ;;  %2704 = vmatmul.f32.gmra.mxu1 %v5017_v4  ;;  %v5769_v38 = vand.u32 4294901760, %v5070_v45  ;;  %v5772_v45 = vand.u32 4294901760, %v5124_v60 }
 0x32b   : > { %3335 = vmatpush.msrb.mxu2 %v5767_v13  ;;  %v3006_v13 = vsub.f32 %v5291_v52, %v3005_v41  ;;  %3002 = vmatpush.msra.mxu3 %v3001_v7 }
 0x32d   : > { %3339 = vmatpush.msrb.mxu2 %v5768_v30  ;;  %v3007_v58 = vand.u32 4294901760, %v3006_v13 }
 0x32f   : > { %3343 = vmatpush.msrb.mxu2 %v5769_v38  ;;  %v5310_v62 = vpop.f32.mrf.mxu0  ;;  %v5312_v20 = vpop.f32.mrf.mxu1  ;;  %3008 = vmatpush.msra.mxu3 %v3007_v58 }
 0x330   : > { %v2298_v56 = vpop.f32.mrf.mxu2 }
 0x331   : > { %3347 = vmatpush.msrb.mxu2 %v5770_v11  ;;  %3462 = vmatpush.msrb.mxu3 %v5029_v19  ;;  %v5330_v19 = vld [vmem:[%s5646_s6] ss:$0 sm:$0xff] }
 0x332   : > { %2607 = vmatmul.f32.gmra.mxu0 %v5017_v4  ;;  %2708 = vmatmul.f32.gmra.mxu1 %v5021_v12  ;;  %v1949_v60 = vadd.f32 %v5330_v19, %v5046_v21 }
 0x333   : > { %3351 = vmatpush.msrb.mxu2 %v5771_v37  ;;  %3464 = vmatpush.msrb.mxu3 %v5044_v61  ;;  %v5774_v61 = vand.u32 4294901760, %v5160_v54 }
 0x334   : > { %v2170_v54 = vadd.f32 %v5031_v47, %v1949_v60  ;;  %v5780_v47 = vand.u32 4294901760, %v5266_v39 }
 0x335   : > { %3355 = vmatpush.msrb.mxu2 %v5772_v45  ;;  %3466 = vmatpush.msrb.mxu3 %v5062_v18  ;;  %v5775_v18 = vand.u32 4294901760, %v5178_v44 }
 0x337   : > { %3359 = vmatpush.msrb.mxu2 %v5773_v8  ;;  %v5332_v11 = vpop.f32.mrf.mxu0  ;;  %v5334_v4 = vpop.f32.mrf.mxu1  ;;  %3468 = vmatpush.msrb.mxu3 %v5080_v23  ;;  %v5776_v23 = vand.u32 4294901760, %v5196_v5  ;;  %v1957_v5 = vadd.f32 %v5330_v19, %v5064_v59  ;;  %v1965_v59 = vadd.f32 %v5330_v19, %v5082_v22 }
 0x339   : > { %3363 = vmatpush.msrb.mxu2 %v5774_v61  ;;  %3470 = vmatpush.msrb.mxu3 %v5098_v49  ;;  %v5777_v49 = vand.u32 4294901760, %v5214_v31 }
 0x33a   : > { %2611 = vmatmul.f32.gmra.mxu0 %v5021_v12  ;;  %2712 = vmatmul.f32.gmra.mxu1 %v5025_v33  ;;  %v5778_v12 = vand.u32 4294901760, %v5232_v29  ;;  %v2415_v29 = vpop.f32.mrf.mxu3 }
 0x33b   : > { %3367 = vmatpush.msrb.mxu2 %v5775_v18  ;;  %3472 = vmatpush.msrb.mxu3 %v5116_v40  ;;  %v5779_v40 = vand.u32 4294901760, %v5250_v25  ;;  %v1981_v18 = vadd.f32 %v5330_v19, %v5118_v35 }
 0x33d   : > { %3371 = vmatpush.msrb.mxu2 %v5776_v23  ;;  %3474 = vmatpush.msrb.mxu3 %v5134_v53  ;;  %v2284_v53 = vadd.f32 %v5255_v57, %v2170_v54  ;;  %v2186_v54 = vadd.f32 %v5102_v10, %v1981_v18 }
 0x33f   : > { %3375 = vmatpush.msrb.mxu2 %v5777_v49  ;;  %v5353_v44 = vpop.f32.mrf.mxu0  ;;  %v2653_v21 = vpop.f32.mrf.mxu1  ;;  %3476 = vmatpush.msrb.mxu3 %v5152_v55  ;;  %v5781_v55 = vand.u32 4294901760, %v5276_v27  ;;  %v2398_v25 = vadd.f32 %v5271_v36, %v2284_v53  ;;  %v2178_v36 = vadd.f32 %v5066_v51, %v1965_v59 }
 0x341   : > { %3379 = vmatpush.msrb.mxu2 %v5778_v12  ;;  %3478 = vmatpush.msrb.mxu3 %v5170_v48  ;;  %v2174_v48 = vadd.f32 %v5048_v42, %v1957_v5 }
 0x342   : > { %2615 = vmatmul.f32.gmra.mxu0 %v5025_v33  ;;  %v2421_v30 = vpop.f32.mrf.mxu3 }
 0x343   : > { %3383 = vmatpush.msrb.mxu2 %v5779_v40  ;;  %3480 = vmatpush.msrb.mxu3 %v5188_v3  ;;  %v2289_v39 = vadd.f32 %v2288_v14, %v2174_v48  ;;  %v2303_v3 = vpop.f32.mrf.mxu2  ;;  %v2294_v14 = vadd.f32 %v2293_v9, %v2178_v36 }
 0x345   : > { %3387 = vmatpush.msrb.mxu2 %v5780_v47  ;;  %3482 = vmatpush.msrb.mxu3 %v5206_v2  ;;  %v2404_v42 = vadd.f32 %v2403_v28, %v2289_v39  ;;  %v2410_v13 = vadd.f32 %v2409_v1, %v2294_v14 }
 0x347   : > { %3391 = vmatpush.msrb.mxu2 %v5781_v55  ;;  %v2556_v31 = vpop.f32.mrf.mxu0  ;;  %v2657_v57 = vpop.f32.mrf.mxu1  ;;  %3484 = vmatpush.msrb.mxu3 %v5224_v43  ;;  %v1989_v55 = vadd.f32 %v5330_v19, %v5136_v63 }
 0x348   : > { %v2557_v33 = vadd.f32 %v2556_v31, %v2398_v25 }
 0x349   : > { %3395 = vmatpush.msrb.mxu2 %v3005_v41  ;;  %3486 = vmatpush.msrb.mxu3 %v5242_v50 }
 0x34a   : > { %v2654_v2 = vadd.f32 %v2653_v21, %v2557_v33  ;;  %v2427_v8 = vpop.f32.mrf.mxu3  ;;  %v2190_v33 = vadd.f32 %v5120_v32, %v1989_v55 }
 0x34b   : > { %3488 = vmatpush.msrb.mxu3 %v5259_v34  ;;  %v1973_v34 = vadd.f32 %v5330_v19, %v5100_v26  ;;  %v2308_v51 = vpop.f32.mrf.mxu2 }
 0x34c   : > { %v2716_v27 = vmax.f32 %v2654_v2, 0.0  ;;  %v2309_v36 = vadd.f32 %v2308_v51, %v2190_v33 }
 0x34d   : > { %3490 = vmatpush.msrb.mxu3 %v5268_v6  ;;  %v2182_v38 = vadd.f32 %v5084_v24, %v1973_v34 }
 0x34e   : > { %v5380_v43 = vand.u32 4294901760, %v2716_v27  ;;  %v2428_v14 = vadd.f32 %v2427_v8, %v2309_v36 }
 0x34f   : > { %v2560_v52 = vpop.f32.mrf.mxu0  ;;  %v2661_v17 = vpop.f32.mrf.mxu1  ;;  %3492 = vmatpush.msrb.mxu3 %v5279_v15  ;;  %v2299_v61 = vadd.f32 %v2298_v56, %v2182_v38  ;;  %v2304_v56 = vadd.f32 %v2303_v3, %v2186_v54  ;;  %v2005_v38 = vadd.f32 %v5330_v19, %v5172_v0 }
 0x350   : > { %v2785_v50 = vsub.f32 %v2716_v27, %v5380_v43  ;;  %v2561_v22 = vadd.f32 %v2560_v52, %v2404_v42  ;;  %3010 = vmatmul.f32.vlgmr.msra.gmra.mxu3 %v5380_v43  ;;  %v1997_v52 = vadd.f32 %v5330_v19, %v5154_v46 }
 0x351   : > { %v2416_v49 = vadd.f32 %v2415_v29, %v2299_v61 }
 0x352   : > { %v2786_v6 = vand.u32 4294901760, %v2785_v50  ;;  %v2658_v28 = vadd.f32 %v2657_v57, %v2561_v22  ;;  %3124 = vmatmul.f32.vlgmr.msrb.gmra.mxu0 %v2785_v50  ;;  %v2433_v25 = vpop.f32.mrf.mxu3  ;;  %v2422_v57 = vadd.f32 %v2421_v30, %v2304_v56  ;;  %v2194_v34 = vadd.f32 %v5138_v16, %v1997_v52 }
 0x353   : > { %v2313_v21 = vpop.f32.mrf.mxu2 }
 0x354   : > { %v2787_v41 = vsub.f32 %v2785_v50, %v2786_v6  ;;  %v2717_v7 = vmax.f32 %v2658_v28, 0.0  ;;  %3238 = vmatmul.f32.vlgmr.msrb.gmra.mxu1 %v2786_v6  ;;  %v2314_v51 = vadd.f32 %v2313_v21, %v2194_v34  ;;  %v5783_v21 = vld [vmem:[#allocation14_spill] sm:$0xff] }
 0x356   : > { %v2788_v15 = vand.u32 4294901760, %v2787_v41  ;;  %v5388_v58 = vand.u32 4294901760, %v2717_v7 }
 0x357   : > { %v2564_v37 = vpop.f32.mrf.mxu0  ;;  %v2665_v45 = vpop.f32.mrf.mxu1 }
 0x358   : > { %v2565_v9 = vadd.f32 %v2564_v37, %v2410_v13  ;;  %2789 = vmatmul.f32.vlgmr.msra.gmra.mxu2 %v2788_v15  ;;  %3014 = vmatmul.f32.gmra.mxu3 %v5388_v58  ;;  %v2793_v26 = vsub.f32 %v2717_v7, %v5388_v58 }
 0x35a   : > { %v2662_v60 = vadd.f32 %v2661_v17, %v2565_v9  ;;  %3129 = vmatmul.f32.gmra.mxu0 %v2793_v26  ;;  %v2794_v1 = vand.u32 4294901760, %v2793_v26  ;;  %v2439_v32 = vpop.f32.mrf.mxu3  ;;  %v2434_v9 = vadd.f32 %v2433_v25, %v2314_v51  ;;  %v5784_v25 = vld [vmem:[#allocation13_spill] sm:$0xff]  ;;  %v5787_v51 = vld [vmem:[#allocation18_spill] sm:$0xff] }
 0x35b   : > { %v2318_v42 = vpop.f32.mrf.mxu2 }
 0x35c   : > { %v2718_v24 = vmax.f32 %v2662_v60, 0.0  ;;  %3244 = vmatmul.f32.gmra.mxu1 %v2794_v1  ;;  %v2795_v23 = vsub.f32 %v2793_v26, %v2794_v1  ;;  %v5782_v26 = vld [vmem:[#allocation12_spill] sm:$0xff] }
 0x35d   : > { %v2198_v61 = vadd.f32 %v5782_v26, %v2005_v38  ;;  %v2029_v38 = vadd.f32 %v5330_v19, %v5787_v51  ;;  %v5788_v26 = vld [vmem:[#allocation17_spill] sm:$0xff] }
 0x35e   : > { %v5395_v12 = vand.u32 4294901760, %v2718_v24  ;;  %v2796_v40 = vand.u32 4294901760, %v2795_v23 }
 0x35f   : > { %v2568_v53 = vpop.f32.mrf.mxu0  ;;  %v2669_v5 = vpop.f32.mrf.mxu1  ;;  %v2319_v54 = vadd.f32 %v2318_v42, %v2198_v61  ;;  %v5785_v42 = vld [vmem:[#allocation16_spill] sm:$0xff]  ;;  %v2210_v61 = vadd.f32 %v5788_v26, %v2029_v38 }
 0x360   : > { %v2569_v47 = vadd.f32 %v2568_v53, %v2416_v49  ;;  %2797 = vmatmul.f32.gmra.mxu2 %v2796_v40  ;;  %3018 = vmatmul.f32.gmra.mxu3 %v5395_v12  ;;  %v2801_v35 = vsub.f32 %v2718_v24, %v5395_v12  ;;  %v2013_v40 = vadd.f32 %v5330_v19, %v5783_v21 }
 0x361   : > { %v2440_v55 = vadd.f32 %v2439_v32, %v2319_v54  ;;  %v5786_v32 = vld [vmem:[#allocation15_spill] sm:$0xff] }
 0x362   : > { %v2666_v29 = vadd.f32 %v2665_v45, %v2569_v47  ;;  %3134 = vmatmul.f32.gmra.mxu0 %v2801_v35  ;;  %v2802_v10 = vand.u32 4294901760, %v2801_v35  ;;  %v2445_v18 = vpop.f32.mrf.mxu3 }
 0x363   : > { %v2323_v15 = vpop.f32.mrf.mxu2 }
 0x364   : > { %v2719_v48 = vmax.f32 %v2666_v29, 0.0  ;;  %3250 = vmatmul.f32.gmra.mxu1 %v2802_v10  ;;  %v2803_v31 = vsub.f32 %v2801_v35, %v2802_v10  ;;  %v2202_v29 = vadd.f32 %v5784_v25, %v2013_v40  ;;  %v5789_v40 = vld [vmem:[#allocation10_spill] sm:$0xff] }
 0x366   : > { %v5402_v39 = vand.u32 4294901760, %v2719_v48  ;;  %v2804_v59 = vand.u32 4294901760, %v2803_v31 }
 0x367   : > { %v2572_v2 = vpop.f32.mrf.mxu0  ;;  %v2673_v27 = vpop.f32.mrf.mxu1 }
 0x368   : > { %v2573_v3 = vadd.f32 %v2572_v2, %v2422_v57  ;;  %2805 = vmatmul.f32.gmra.mxu2 %v2804_v59  ;;  %3022 = vmatmul.f32.gmra.mxu3 %v5402_v39  ;;  %v2809_v63 = vsub.f32 %v2719_v48, %v5402_v39 }
 0x36a   : > { %v2670_v17 = vadd.f32 %v2669_v5, %v2573_v3  ;;  %3139 = vmatmul.f32.gmra.mxu0 %v2809_v63  ;;  %v2810_v30 = vand.u32 4294901760, %v2809_v63  ;;  %v2451_v2 = vpop.f32.mrf.mxu3  ;;  %v2021_v3 = vadd.f32 %v5330_v19, %v5785_v42 }
 0x36b   : > { %v2328_v47 = vpop.f32.mrf.mxu2 }
 0x36c   : > { %v2720_v50 = vmax.f32 %v2670_v17, 0.0  ;;  %3256 = vmatmul.f32.gmra.mxu1 %v2810_v30  ;;  %v2811_v22 = vsub.f32 %v2809_v63, %v2810_v30 }
 0x36e   : > { %v5409_v6 = vand.u32 4294901760, %v2720_v50  ;;  %v2812_v28 = vand.u32 4294901760, %v2811_v22 }
 0x36f   : > { %v2576_v41 = vpop.f32.mrf.mxu0  ;;  %v2677_v7 = vpop.f32.mrf.mxu1 }
 0x370   : > { %v2577_v13 = vadd.f32 %v2576_v41, %v2428_v14  ;;  %2813 = vmatmul.f32.gmra.mxu2 %v2812_v28  ;;  %3026 = vmatmul.f32.gmra.mxu3 %v5409_v6  ;;  %v2817_v46 = vsub.f32 %v2720_v50, %v5409_v6  ;;  %v2206_v50 = vadd.f32 %v5786_v32, %v2021_v3  ;;  %v5791_v3 = vld [vmem:[#allocation11_spill] sm:$0xff] }
 0x372   : > { %v2674_v37 = vadd.f32 %v2673_v27, %v2577_v13  ;;  %3144 = vmatmul.f32.gmra.mxu0 %v2817_v46  ;;  %v2818_v45 = vand.u32 4294901760, %v2817_v46  ;;  %v2324_v27 = vadd.f32 %v2323_v15, %v2202_v29  ;;  %v5790_v29 = vld [vmem:[#allocation8_spill] sm:$0xff] }
 0x373   : > { %v2333_v22 = vpop.f32.mrf.mxu2 }
 0x374   : > { %v2721_v16 = vmax.f32 %v2674_v37, 0.0  ;;  %3262 = vmatmul.f32.gmra.mxu1 %v2818_v45  ;;  %v2819_v8 = vsub.f32 %v2817_v46, %v2818_v45  ;;  %v2446_v30 = vadd.f32 %v2445_v18, %v2324_v27  ;;  %v2329_v46 = vadd.f32 %v2328_v47, %v2206_v50  ;;  %v2457_v45 = vpop.f32.mrf.mxu3 }
 0x375   : > { %v2334_v21 = vadd.f32 %v2333_v22, %v2210_v61  ;;  %v5792_v22 = vld [vmem:[#allocation9_spill] sm:$0xff] }
 0x376   : > { %v5416_v60 = vand.u32 4294901760, %v2721_v16  ;;  %v2820_v1 = vand.u32 4294901760, %v2819_v8 }
 0x377   : > { %v2580_v24 = vpop.f32.mrf.mxu0  ;;  %v2681_v23 = vpop.f32.mrf.mxu1  ;;  %v2458_v25 = vadd.f32 %v2457_v45, %v2334_v21 }
 0x378   : > { %v2581_v49 = vadd.f32 %v2580_v24, %v2434_v9  ;;  %2821 = vmatmul.f32.gmra.mxu2 %v2820_v1  ;;  %3030 = vmatmul.f32.gmra.mxu3 %v5416_v60  ;;  %v2825_v0 = vsub.f32 %v2721_v16, %v5416_v60  ;;  %v2452_v9 = vadd.f32 %v2451_v2, %v2329_v46 }
 0x37a   : > { %v2678_v53 = vadd.f32 %v2677_v7, %v2581_v49  ;;  %3149 = vmatmul.f32.gmra.mxu0 %v2825_v0  ;;  %v2826_v5 = vand.u32 4294901760, %v2825_v0 }
 0x37b   : > { %v2338_v54 = vpop.f32.mrf.mxu2 }
 0x37c   : > { %v2722_v35 = vmax.f32 %v2678_v53, 0.0  ;;  %3268 = vmatmul.f32.gmra.mxu1 %v2826_v5  ;;  %v2827_v56 = vsub.f32 %v2825_v0, %v2826_v5  ;;  %v2037_v53 = vadd.f32 %v5330_v19, %v5789_v40 }
 0x37e   : > { %v5423_v10 = vand.u32 4294901760, %v2722_v35  ;;  %v2828_v48 = vand.u32 4294901760, %v2827_v56 }
 0x37f   : > { %v2584_v31 = vpop.f32.mrf.mxu0  ;;  %v2685_v57 = vpop.f32.mrf.mxu1 }
 0x380   : > { %v2585_v33 = vadd.f32 %v2584_v31, %v2440_v55  ;;  %2829 = vmatmul.f32.gmra.mxu2 %v2828_v48  ;;  %3034 = vmatmul.f32.gmra.mxu3 %v5423_v10  ;;  %v2833_v59 = vsub.f32 %v2722_v35, %v5423_v10  ;;  %v2463_v55 = vpop.f32.mrf.mxu3  ;;  %v2214_v48 = vadd.f32 %v5790_v29, %v2037_v53 }
 0x381   : > { %v2061_v53 = vadd.f32 %v5330_v19, %v5332_v11 }
 0x382   : > { %v2682_v63 = vadd.f32 %v2681_v23, %v2585_v33  ;;  %3154 = vmatmul.f32.gmra.mxu0 %v2833_v59  ;;  %v2834_v36 = vand.u32 4294901760, %v2833_v59  ;;  %v2339_v42 = vadd.f32 %v2338_v54, %v2214_v48 }
 0x383   : > { %v2226_v29 = vadd.f32 %v5312_v20, %v2061_v53 }
 0x384   : > { %v2723_v52 = vmax.f32 %v2682_v63, 0.0  ;;  %3274 = vmatmul.f32.gmra.mxu1 %v2834_v36  ;;  %v2835_v17 = vsub.f32 %v2833_v59, %v2834_v36  ;;  %v2045_v63 = vadd.f32 %v5330_v19, %v5791_v3  ;;  %v2464_v50 = vadd.f32 %v2463_v55, %v2339_v42 }
 0x385   : > { %v2069_v42 = vadd.f32 %v5330_v19, %v5353_v44 }
 0x386   : > { %v5430_v14 = vand.u32 4294901760, %v2723_v52  ;;  %v2836_v34 = vand.u32 4294901760, %v2835_v17  ;;  %v2343_v17 = vpop.f32.mrf.mxu2 }
 0x387   : > { %v2588_v28 = vpop.f32.mrf.mxu0  ;;  %v2689_v41 = vpop.f32.mrf.mxu1 }
 0x388   : > { %v2589_v7 = vadd.f32 %v2588_v28, %v2446_v30  ;;  %2837 = vmatmul.f32.gmra.mxu2 %v2836_v34  ;;  %3038 = vmatmul.f32.gmra.mxu3 %v5430_v14  ;;  %v2841_v13 = vsub.f32 %v2723_v52, %v5430_v14  ;;  %v2218_v34 = vadd.f32 %v5792_v22, %v2045_v63 }
 0x38a   : > { %v2686_v15 = vadd.f32 %v2685_v57, %v2589_v7  ;;  %3159 = vmatmul.f32.gmra.mxu0 %v2841_v13  ;;  %v2842_v37 = vand.u32 4294901760, %v2841_v13  ;;  %v2469_v7 = vpop.f32.mrf.mxu3  ;;  %v2344_v38 = vadd.f32 %v2343_v17, %v2218_v34 }
 0x38c   : > { %v2724_v16 = vmax.f32 %v2686_v15, 0.0  ;;  %3280 = vmatmul.f32.gmra.mxu1 %v2842_v37  ;;  %v2843_v8 = vsub.f32 %v2841_v13, %v2842_v37  ;;  %v2053_v15 = vadd.f32 %v5330_v19, %v5310_v62  ;;  %v2470_v61 = vadd.f32 %v2469_v7, %v2344_v38 }
 0x38e   : > { %v5437_v18 = vand.u32 4294901760, %v2724_v16  ;;  %v2844_v1 = vand.u32 4294901760, %v2843_v8  ;;  %v2348_v26 = vpop.f32.mrf.mxu2 }
 0x38f   : > { %v2592_v24 = vpop.f32.mrf.mxu0  ;;  %v2693_v23 = vpop.f32.mrf.mxu1 }
 0x390   : > { %v2593_v49 = vadd.f32 %v2592_v24, %v2452_v9  ;;  %2845 = vmatmul.f32.gmra.mxu2 %v2844_v1  ;;  %3042 = vmatmul.f32.gmra.mxu3 %v5437_v18  ;;  %v2849_v0 = vsub.f32 %v2724_v16, %v5437_v18  ;;  %v5793_v1 = vld [vmem:[#allocation19_spill] sm:$0xff] }
 0x391   : > { %v2222_v24 = vadd.f32 %v5793_v1, %v2053_v15 }
 0x392   : > { %v2690_v5 = vadd.f32 %v2689_v41, %v2593_v49  ;;  %3164 = vmatmul.f32.gmra.mxu0 %v2849_v0  ;;  %v2850_v47 = vand.u32 4294901760, %v2849_v0  ;;  %v2475_v21 = vpop.f32.mrf.mxu3 }
 0x393   : > { %v2349_v40 = vadd.f32 %v2348_v26, %v2222_v24 }
 0x394   : > { %v2725_v35 = vmax.f32 %v2690_v5, 0.0  ;;  %3286 = vmatmul.f32.gmra.mxu1 %v2850_v47  ;;  %v2851_v56 = vsub.f32 %v2849_v0, %v2850_v47 }
 0x396   : > { %v5444_v31 = vand.u32 4294901760, %v2725_v35  ;;  %v2852_v57 = vand.u32 4294901760, %v2851_v56 }
 0x397   : > { %v2596_v33 = vpop.f32.mrf.mxu0  ;;  %v2697_v27 = vpop.f32.mrf.mxu1 }
 0x398   : > { %v2597_v59 = vadd.f32 %v2596_v33, %v2458_v25  ;;  %2853 = vmatmul.f32.gmra.mxu2 %v2852_v57  ;;  %3046 = vmatmul.f32.gmra.mxu3 %v5444_v31  ;;  %v2857_v2 = vsub.f32 %v2725_v35, %v5444_v31  ;;  %v2476_v25 = vadd.f32 %v2475_v21, %v2349_v40  ;;  %v2353_v33 = vpop.f32.mrf.mxu2 }
 0x39a   : > { %v2694_v36 = vadd.f32 %v2693_v23, %v2597_v59  ;;  %3169 = vmatmul.f32.gmra.mxu0 %v2857_v2  ;;  %v2858_v52 = vand.u32 4294901760, %v2857_v2 }
 0x39c   : > { %v2726_v30 = vmax.f32 %v2694_v36, 0.0  ;;  %3292 = vmatmul.f32.gmra.mxu1 %v2858_v52  ;;  %v2859_v32 = vsub.f32 %v2857_v2, %v2858_v52  ;;  %v2481_v36 = vpop.f32.mrf.mxu3 }
 0x39e   : > { %v5451_v28 = vand.u32 4294901760, %v2726_v30  ;;  %v2860_v41 = vand.u32 4294901760, %v2859_v32 }
 0x39f   : > { %v2600_v13 = vpop.f32.mrf.mxu0  ;;  %v2701_v16 = vpop.f32.mrf.mxu1 }
 0x3a0   : > { %v2601_v46 = vadd.f32 %v2600_v13, %v2464_v50  ;;  %2861 = vmatmul.f32.gmra.mxu2 %v2860_v41  ;;  %3050 = vmatmul.f32.gmra.mxu3 %v5451_v28  ;;  %v2865_v51 = vsub.f32 %v2726_v30, %v5451_v28  ;;  %v2230_v30 = vadd.f32 %v5334_v4, %v2069_v42  ;;  %v2358_v44 = vpop.f32.mrf.mxu2 }
 0x3a2   : > { %v2698_v37 = vadd.f32 %v2697_v27, %v2601_v46  ;;  %3174 = vmatmul.f32.gmra.mxu0 %v2865_v51  ;;  %v2866_v45 = vand.u32 4294901760, %v2865_v51  ;;  %v2354_v27 = vadd.f32 %v2353_v33, %v2226_v29  ;;  %v2359_v7 = vadd.f32 %v2358_v44, %v2230_v30 }
 0x3a4   : > { %v2727_v8 = vmax.f32 %v2698_v37, 0.0  ;;  %3298 = vmatmul.f32.gmra.mxu1 %v2866_v45  ;;  %v2867_v9 = vsub.f32 %v2865_v51, %v2866_v45  ;;  %v2482_v17 = vadd.f32 %v2481_v36, %v2354_v27  ;;  %v2487_v4 = vpop.f32.mrf.mxu3 }
 0x3a5   : > { %v2488_v15 = vadd.f32 %v2487_v4, %v2359_v7 }
 0x3a6   : > { %v5458_v23 = vand.u32 4294901760, %v2727_v8  ;;  %v2868_v49 = vand.u32 4294901760, %v2867_v9 }
 0x3a7   : > { %v2604_v0 = vpop.f32.mrf.mxu0  ;;  %v2705_v55 = vpop.f32.mrf.mxu1 }
 0x3a8   : > { %v2605_v54 = vadd.f32 %v2604_v0, %v2470_v61  ;;  %2869 = vmatmul.f32.gmra.mxu2 %v2868_v49  ;;  %3054 = vmatmul.f32.gmra.mxu3 %v5458_v23  ;;  %v2873_v62 = vsub.f32 %v2727_v8, %v5458_v23 }
 0x3aa   : > { %v2702_v5 = vadd.f32 %v2701_v16, %v2605_v54  ;;  %3179 = vmatmul.f32.gmra.mxu0 %v2873_v62  ;;  %v2874_v47 = vand.u32 4294901760, %v2873_v62 }
 0x3ac   : > { %v2728_v35 = vmax.f32 %v2702_v5, 0.0  ;;  %3304 = vmatmul.f32.gmra.mxu1 %v2874_v47  ;;  %v2875_v56 = vsub.f32 %v2873_v62, %v2874_v47  ;;  %v5490_v47 = vld [vmem:[%s5648_s8] ss:$0 sm:$0xff] }
 0x3ae   : > { %v5465_v48 = vand.u32 4294901760, %v2728_v35  ;;  %v2876_v57 = vand.u32 4294901760, %v2875_v56 }
 0x3af   : > { %v2608_v59 = vpop.f32.mrf.mxu0  ;;  %v2709_v22 = vpop.f32.mrf.mxu1 }
 0x3b0   : > { %v2609_v2 = vadd.f32 %v2608_v59, %v2476_v25  ;;  %2877 = vmatmul.f32.gmra.mxu2 %v2876_v57  ;;  %3058 = vmatmul.f32.gmra.mxu3 %v5465_v48  ;;  %v2881_v11 = vsub.f32 %v2728_v35, %v5465_v48 }
 0x3b2   : > { %v2706_v3 = vadd.f32 %v2705_v55, %v2609_v2  ;;  %3184 = vmatmul.f32.gmra.mxu0 %v2881_v11  ;;  %v2882_v63 = vand.u32 4294901760, %v2881_v11 }
 0x3b4   : > { %v2729_v20 = vmax.f32 %v2706_v3, 0.0  ;;  %3310 = vmatmul.f32.gmra.mxu1 %v2882_v63  ;;  %v2883_v52 = vsub.f32 %v2881_v11, %v2882_v63 }
 0x3b6   : > { %v5472_v32 = vand.u32 4294901760, %v2729_v20  ;;  %v2884_v50 = vand.u32 4294901760, %v2883_v52 }
 0x3b7   : > { %v2612_v34 = vpop.f32.mrf.mxu0  ;;  %v2713_v26 = vpop.f32.mrf.mxu1 }
 0x3b8   : > { %v2613_v41 = vadd.f32 %v2612_v34, %v2482_v17  ;;  %2885 = vmatmul.f32.gmra.mxu2 %v2884_v50  ;;  %3062 = vmatmul.f32.gmra.mxu3 %v5472_v32  ;;  %v2889_v19 = vsub.f32 %v2729_v20, %v5472_v32 }
 0x3ba   : > { %v2710_v13 = vadd.f32 %v2709_v22, %v2613_v41  ;;  %3189 = vmatmul.f32.gmra.mxu0 %v2889_v19  ;;  %v2890_v46 = vand.u32 4294901760, %v2889_v19 }
 0x3bc   : > { %v2730_v51 = vmax.f32 %v2710_v13, 0.0  ;;  %3316 = vmatmul.f32.gmra.mxu1 %v2890_v46  ;;  %v2891_v38 = vsub.f32 %v2889_v19, %v2890_v46 }
 0x3be   : > { %v5476_v37 = vand.u32 4294901760, %v2730_v51  ;;  %v2892_v45 = vand.u32 4294901760, %v2891_v38 }
 0x3bf   : > { %v2616_v16 = vpop.f32.mrf.mxu0 }
 0x3c0   : > { %v2617_v8 = vadd.f32 %v2616_v16, %v2488_v15  ;;  %2893 = vmatmul.f32.gmra.mxu2 %v2892_v45  ;;  %3066 = vmatmul.f32.gmra.mxu3 %v5476_v37  ;;  %v2897_v9 = vsub.f32 %v2730_v51, %v5476_v37 }
 0x3c2   : > { %v2714_v61 = vadd.f32 %v2713_v26, %v2617_v8  ;;  %3194 = vmatmul.f32.gmra.mxu0 %v2897_v9  ;;  %v2898_v1 = vand.u32 4294901760, %v2897_v9 }
 0x3c4   : > { %v2731_v24 = vmax.f32 %v2714_v61, 0.0  ;;  %3322 = vmatmul.f32.gmra.mxu1 %v2898_v1  ;;  %v2899_v49 = vsub.f32 %v2897_v9, %v2898_v1 }
 0x3c6   : > { %v5480_v0 = vand.u32 4294901760, %v2731_v24  ;;  %v2900_v54 = vand.u32 4294901760, %v2899_v49 }
 0x3c8   : > { %2901 = vmatmul.f32.gmra.mxu2 %v2900_v54  ;;  %3070 = vmatmul.f32.gmra.mxu3 %v5480_v0  ;;  %v2905_v62 = vsub.f32 %v2731_v24, %v5480_v0 }
 0x3ca   : > { %3199 = vmatmul.f32.gmra.mxu0 %v2905_v62  ;;  %v2906_v21 = vand.u32 4294901760, %v2905_v62 }
 0x3cc   : > { %3328 = vmatmul.f32.gmra.mxu1 %v2906_v21  ;;  %v2907_v40 = vsub.f32 %v2905_v62, %v2906_v21 }
 0x3ce   : > { %v2908_v53 = vand.u32 4294901760, %v2907_v40 }
 0x3cf   : > { %v3125_v61 = vpop.f32.mrf.mxu0 }
 0x3d0   : > { %2909 = vmatmul.f32.gmra.mxu2 %v2908_v53  ;;  %3494 = vmatmul.f32.vlgmr.msrb.gmra.mxu3 %v5380_v43 }
 0x3d3   : > { %v3011_v5 = vpop.f32.mrf.mxu3 }
 0x3d8   : > { %3397 = vmatmul.f32.vlgmr.msrb.gmra.mxu2 %v5380_v43  ;;  %3498 = vmatmul.f32.gmra.mxu3 %v5388_v58 }
 0x3db   : > { %v2790_v35 = vpop.f32.mrf.mxu2  ;;  %v3015_v56 = vpop.f32.mrf.mxu3 }
 0x3dc   : > { %v2791_v55 = vadd.f32 %v5490_v47, %v2790_v35 }
 0x3de   : > { %v5493_v25 = vadd.f32 %v3011_v5, %v2791_v55 }
 0x3e0   : > { %3401 = vmatmul.f32.gmra.mxu2 %v5388_v58  ;;  %3502 = vmatmul.f32.gmra.mxu3 %v5395_v12 }
 0x3e3   : > { %v2798_v29 = vpop.f32.mrf.mxu2  ;;  %v3019_v57 = vpop.f32.mrf.mxu3 }
 0x3e4   : > { %v2799_v43 = vadd.f32 %v5490_v47, %v2798_v29 }
 0x3e6   : > { %v5498_v33 = vadd.f32 %v3015_v56, %v2799_v43 }
 0x3e8   : > { %3405 = vmatmul.f32.gmra.mxu2 %v5395_v12  ;;  %3506 = vmatmul.f32.gmra.mxu3 %v5402_v39 }
 0x3eb   : > { %v2806_v59 = vpop.f32.mrf.mxu2  ;;  %v3023_v2 = vpop.f32.mrf.mxu3 }
 0x3ec   : > { %v2807_v11 = vadd.f32 %v5490_v47, %v2806_v59 }
 0x3ee   : > { %v5503_v27 = vadd.f32 %v3019_v57, %v2807_v11 }
 0x3f0   : > { %3409 = vmatmul.f32.gmra.mxu2 %v5402_v39  ;;  %3510 = vmatmul.f32.gmra.mxu3 %v5409_v6 }
 0x3f3   : > { %v2814_v58 = vpop.f32.mrf.mxu2  ;;  %v3027_v42 = vpop.f32.mrf.mxu3 }
 0x3f4   : > { %v2815_v3 = vadd.f32 %v5490_v47, %v2814_v58 }
 0x3f6   : > { %v5508_v63 = vadd.f32 %v3023_v2, %v2815_v3 }
 0x3f8   : > { %3413 = vmatmul.f32.gmra.mxu2 %v5409_v6  ;;  %3514 = vmatmul.f32.gmra.mxu3 %v5416_v60 }
 0x3fb   : > { %v2822_v12 = vpop.f32.mrf.mxu2  ;;  %v3031_v36 = vpop.f32.mrf.mxu3 }
 0x3fc   : > { %v2823_v20 = vadd.f32 %v5490_v47, %v2822_v12 }
 0x3fe   : > { %v5513_v52 = vadd.f32 %v3027_v42, %v2823_v20 }
 0x400   : > { %3417 = vmatmul.f32.gmra.mxu2 %v5416_v60  ;;  %3518 = vmatmul.f32.gmra.mxu3 %v5423_v10 }
 0x403   : > { %v2830_v39 = vpop.f32.mrf.mxu2  ;;  %v3035_v17 = vpop.f32.mrf.mxu3 }
 0x404   : > { %v2831_v30 = vadd.f32 %v5490_v47, %v2830_v39 }
 0x406   : > { %v5518_v50 = vadd.f32 %v3031_v36, %v2831_v30 }
 0x408   : > { %3421 = vmatmul.f32.gmra.mxu2 %v5423_v10  ;;  %3522 = vmatmul.f32.gmra.mxu3 %v5430_v14 }
 0x40b   : > { %v2838_v6 = vpop.f32.mrf.mxu2  ;;  %v3039_v22 = vpop.f32.mrf.mxu3 }
 0x40c   : > { %v2839_v34 = vadd.f32 %v5490_v47, %v2838_v6 }
 0x40e   : > { %v5523_v41 = vadd.f32 %v3035_v17, %v2839_v34 }
 0x410   : > { %3425 = vmatmul.f32.gmra.mxu2 %v5430_v14  ;;  %3526 = vmatmul.f32.gmra.mxu3 %v5437_v18 }
 0x413   : > { %v2846_v60 = vpop.f32.mrf.mxu2  ;;  %v3043_v19 = vpop.f32.mrf.mxu3 }
 0x414   : > { %v2847_v44 = vadd.f32 %v5490_v47, %v2846_v60 }
 0x416   : > { %v5528_v7 = vadd.f32 %v3039_v22, %v2847_v44 }
 0x418   : > { %3429 = vmatmul.f32.gmra.mxu2 %v5437_v18  ;;  %3530 = vmatmul.f32.gmra.mxu3 %v5444_v31 }
 0x41b   : > { %v2854_v10 = vpop.f32.mrf.mxu2  ;;  %v3047_v13 = vpop.f32.mrf.mxu3 }
 0x41c   : > { %v2855_v46 = vadd.f32 %v5490_v47, %v2854_v10 }
 0x41e   : > { %v5533_v51 = vadd.f32 %v3043_v19, %v2855_v46 }
 0x420   : > { %3433 = vmatmul.f32.gmra.mxu2 %v5444_v31  ;;  %3534 = vmatmul.f32.gmra.mxu3 %v5451_v28 }
 0x423   : > { %v2862_v14 = vpop.f32.mrf.mxu2  ;;  %v3051_v38 = vpop.f32.mrf.mxu3 }
 0x424   : > { %v2863_v4 = vadd.f32 %v5490_v47, %v2862_v14 }
 0x426   : > { %v5538_v15 = vadd.f32 %v3047_v13, %v2863_v4 }
 0x428   : > { %3437 = vmatmul.f32.gmra.mxu2 %v5451_v28  ;;  %3538 = vmatmul.f32.gmra.mxu3 %v5458_v23  ;;  %v3239_v28 = vpop.f32.mrf.mxu1 }
 0x42b   : > { %v2870_v18 = vpop.f32.mrf.mxu2  ;;  %v3055_v45 = vpop.f32.mrf.mxu3 }
 0x42c   : > { %v2871_v16 = vadd.f32 %v5490_v47, %v2870_v18 }
 0x42e   : > { %v5543_v8 = vadd.f32 %v3051_v38, %v2871_v16 }
 0x430   : > { %3441 = vmatmul.f32.gmra.mxu2 %v5458_v23  ;;  %3542 = vmatmul.f32.gmra.mxu3 %v5465_v48  ;;  %v3130_v23 = vpop.f32.mrf.mxu0  ;;  %v3245_v53 = vpop.f32.mrf.mxu1 }
 0x433   : > { %v2878_v31 = vpop.f32.mrf.mxu2  ;;  %v3059_v9 = vpop.f32.mrf.mxu3 }
 0x434   : > { %v2879_v26 = vadd.f32 %v5490_v47, %v2878_v31 }
 0x436   : > { %v5548_v1 = vadd.f32 %v3055_v45, %v2879_v26 }
 0x438   : > { %3445 = vmatmul.f32.gmra.mxu2 %v5465_v48  ;;  %3546 = vmatmul.f32.gmra.mxu3 %v5472_v32  ;;  %v3135_v35 = vpop.f32.mrf.mxu0  ;;  %v3251_v29 = vpop.f32.mrf.mxu1 }
 0x439   : > { %v3136_v60 = vadd.f32 %v3135_v35, %v5503_v27 }
 0x43b   : > { %v2886_v24 = vpop.f32.mrf.mxu2  ;;  %v3063_v49 = vpop.f32.mrf.mxu3  ;;  %v3252_v44 = vadd.f32 %v3251_v29, %v3136_v60 }
 0x43c   : > { %v2887_v54 = vadd.f32 %v5490_v47, %v2886_v24 }
 0x43e   : > { %v5553_v62 = vadd.f32 %v3059_v9, %v2887_v54 }
 0x440   : > { %3449 = vmatmul.f32.gmra.mxu2 %v5472_v32  ;;  %3550 = vmatmul.f32.gmra.mxu3 %v5476_v37  ;;  %v3140_v2 = vpop.f32.mrf.mxu0  ;;  %v3257_v42 = vpop.f32.mrf.mxu1 }
 0x441   : > { %v3141_v38 = vadd.f32 %v3140_v2, %v5508_v63 }
 0x443   : > { %v2894_v21 = vpop.f32.mrf.mxu2  ;;  %v3067_v40 = vpop.f32.mrf.mxu3  ;;  %v3258_v18 = vadd.f32 %v3257_v42, %v3141_v38 }
 0x444   : > { %v2895_v5 = vadd.f32 %v5490_v47, %v2894_v21 }
 0x446   : > { %v5558_v48 = vadd.f32 %v3063_v49, %v2895_v5 }
 0x448   : > { %3453 = vmatmul.f32.gmra.mxu2 %v5476_v37  ;;  %3554 = vmatmul.f32.gmra.mxu3 %v5480_v0  ;;  %v3126_v37 = vadd.f32 %v3125_v61, %v5493_v25  ;;  %v3145_v39 = vpop.f32.mrf.mxu0 }
 0x449   : > { %v3146_v26 = vadd.f32 %v3145_v39, %v5513_v52 }
 0x44a   : > { %v3240_v3 = vadd.f32 %v3239_v28, %v3126_v37 }
 0x44b   : > { %v2902_v56 = vpop.f32.mrf.mxu2  ;;  %v3071_v55 = vpop.f32.mrf.mxu3 }
 0x44c   : > { %v2903_v32 = vadd.f32 %v5490_v47, %v2902_v56 }
 0x44e   : > { %v5563_v57 = vadd.f32 %v3067_v40, %v2903_v32 }
 0x450   : > { %3457 = vmatmul.f32.gmra.mxu2 %v5480_v0  ;;  %v3131_v0 = vadd.f32 %v3130_v23, %v5498_v33  ;;  %v3150_v19 = vpop.f32.mrf.mxu0 }
 0x451   : > { %v3151_v63 = vadd.f32 %v3150_v19, %v5518_v50 }
 0x452   : > { %v3246_v25 = vadd.f32 %v3245_v53, %v3131_v0 }
 0x453   : > { %v2910_v43 = vpop.f32.mrf.mxu2  ;;  %v3495_v59 = vpop.f32.mrf.mxu3 }
 0x454   : > { %v2911_v11 = vadd.f32 %v5490_v47, %v2910_v43  ;;  %v3263_v47 = vpop.f32.mrf.mxu1 }
 0x455   : > { %v3264_v61 = vadd.f32 %v3263_v47, %v3146_v26 }
 0x456   : > { %v5567_v58 = vadd.f32 %v3071_v55, %v2911_v11 }
 0x458   : > { %v3155_v4 = vpop.f32.mrf.mxu0 }
 0x459   : > { %v3156_v52 = vadd.f32 %v3155_v4, %v5523_v41 }
 0x45b   : > { %v3398_v12 = vpop.f32.mrf.mxu2  ;;  %v3499_v36 = vpop.f32.mrf.mxu3 }
 0x45c   : > { %v3399_v20 = vadd.f32 %v3398_v12, %v3240_v3  ;;  %v3269_v13 = vpop.f32.mrf.mxu1 }
 0x45d   : > { %v3270_v40 = vadd.f32 %v3269_v13, %v3151_v63 }
 0x45e   : > { %v3496_v17 = vadd.f32 %v3495_v59, %v3399_v20 }
 0x460   : > { %3558 = vst [vmem:[%s5574_s25] sm:$0xff] %v3496_v17  ;;  %v3160_v49 = vpop.f32.mrf.mxu0 }
 0x461   : > { %v3161_v50 = vadd.f32 %v3160_v49, %v5528_v7 }
 0x463   : > { %v3402_v30 = vpop.f32.mrf.mxu2  ;;  %v3503_v6 = vpop.f32.mrf.mxu3 }
 0x464   : > { %v3403_v22 = vadd.f32 %v3402_v30, %v3246_v25  ;;  %v3275_v9 = vpop.f32.mrf.mxu1 }
 0x465   : > { %v3276_v29 = vadd.f32 %v3275_v9, %v3156_v52 }
 0x466   : > { %v3500_v34 = vadd.f32 %v3499_v36, %v3403_v22 }
 0x468   : > { %3559 = vst [vmem:[%s5574_s25 + $0x8] sm:$0xff] %v3500_v34  ;;  %v3165_v56 = vpop.f32.mrf.mxu0 }
 0x469   : > { %v3166_v41 = vadd.f32 %v3165_v56, %v5533_v51 }
 0x46b   : > { %v3406_v10 = vpop.f32.mrf.mxu2  ;;  %v3507_v33 = vpop.f32.mrf.mxu3 }
 0x46c   : > { %v3407_v46 = vadd.f32 %v3406_v10, %v3252_v44  ;;  %v3281_v21 = vpop.f32.mrf.mxu1 }
 0x46d   : > { %v3282_v42 = vadd.f32 %v3281_v21, %v3161_v50 }
 0x46e   : > { %v3504_v14 = vadd.f32 %v3503_v6, %v3407_v46 }
 0x470   : > { %3560 = vst [vmem:[%s5574_s25 + $0x10] sm:$0xff] %v3504_v14  ;;  %v3170_v37 = vpop.f32.mrf.mxu0 }
 0x471   : > { %v3171_v7 = vadd.f32 %v3170_v37, %v5538_v15 }
 0x473   : > { %v3410_v45 = vpop.f32.mrf.mxu2  ;;  %v3511_v16 = vpop.f32.mrf.mxu3 }
 0x474   : > { %v3411_v31 = vadd.f32 %v3410_v45, %v3258_v18  ;;  %v3287_v32 = vpop.f32.mrf.mxu1 }
 0x475   : > { %v3288_v0 = vadd.f32 %v3287_v32, %v3166_v41 }
 0x476   : > { %v3508_v27 = vadd.f32 %v3507_v33, %v3411_v31 }
 0x478   : > { %3561 = vst [vmem:[%s5574_s25 + $0x18] sm:$0xff] %v3508_v27  ;;  %v3175_v17 = vpop.f32.mrf.mxu0 }
 0x479   : > { %v3176_v51 = vadd.f32 %v3175_v17, %v5543_v8 }
 0x47b   : > { %v3414_v28 = vpop.f32.mrf.mxu2  ;;  %v3515_v24 = vpop.f32.mrf.mxu3 }
 0x47c   : > { %v3415_v54 = vadd.f32 %v3414_v28, %v3264_v61  ;;  %v3293_v20 = vpop.f32.mrf.mxu1 }
 0x47d   : > { %v3294_v34 = vadd.f32 %v3293_v20, %v3171_v7 }
 0x47e   : > { %v3512_v23 = vadd.f32 %v3511_v16, %v3415_v54 }
 0x480   : > { %3562 = vst [vmem:[%s5574_s25 + $0x20] sm:$0xff] %v3512_v23  ;;  %v3180_v10 = vpop.f32.mrf.mxu0 }
 0x481   : > { %v3181_v15 = vadd.f32 %v3180_v10, %v5548_v1 }
 0x483   : > { %v3418_v53 = vpop.f32.mrf.mxu2  ;;  %v3519_v5 = vpop.f32.mrf.mxu3 }
 0x484   : > { %v3419_v35 = vadd.f32 %v3418_v53, %v3270_v40  ;;  %v3299_v22 = vpop.f32.mrf.mxu1 }
 0x485   : > { %v3300_v46 = vadd.f32 %v3299_v22, %v3176_v51 }
 0x486   : > { %v3516_v55 = vadd.f32 %v3515_v24, %v3419_v35 }
 0x488   : > { %3563 = vst [vmem:[%s5574_s25 + $0x28] sm:$0xff] %v3516_v55  ;;  %v3185_v45 = vpop.f32.mrf.mxu0 }
 0x489   : > { %v3186_v8 = vadd.f32 %v3185_v45, %v5553_v62 }
 0x48b   : > { %v3422_v43 = vpop.f32.mrf.mxu2  ;;  %v3523_v59 = vpop.f32.mrf.mxu3 }
 0x48c   : > { %v3423_v2 = vadd.f32 %v3422_v43, %v3276_v29  ;;  %v3305_v13 = vpop.f32.mrf.mxu1 }
 0x48d   : > { %v3306_v16 = vadd.f32 %v3305_v13, %v3181_v15 }
 0x48e   : > { %v3520_v11 = vadd.f32 %v3519_v5, %v3423_v2 }
 0x490   : > { %3564 = vst [vmem:[%s5574_s25 + $0x30] sm:$0xff] %v3520_v11  ;;  %v3190_v28 = vpop.f32.mrf.mxu0 }
 0x491   : > { %v3191_v1 = vadd.f32 %v3190_v28, %v5558_v48 }
 0x493   : > { %v3426_v3 = vpop.f32.mrf.mxu2  ;;  %v3527_v12 = vpop.f32.mrf.mxu3 }
 0x494   : > { %v3427_v36 = vadd.f32 %v3426_v3, %v3282_v42  ;;  %v3311_v31 = vpop.f32.mrf.mxu1 }
 0x495   : > { %v3312_v24 = vadd.f32 %v3311_v31, %v3186_v8 }
 0x496   : > { %v3524_v39 = vadd.f32 %v3523_v59, %v3427_v36 }
 0x498   : > { %3565 = vst [vmem:[%s5574_s25 + $0x38] sm:$0xff] %v3524_v39  ;;  %v3195_v53 = vpop.f32.mrf.mxu0 }
 0x499   : > { %v3196_v56 = vadd.f32 %v3195_v53, %v5563_v57 }
 0x49b   : > { %v3430_v47 = vpop.f32.mrf.mxu2  ;;  %v3531_v25 = vpop.f32.mrf.mxu3 }
 0x49c   : > { %v3431_v30 = vadd.f32 %v3430_v47, %v3288_v0  ;;  %v3317_v23 = vpop.f32.mrf.mxu1 }
 0x49d   : > { %v3318_v40 = vadd.f32 %v3317_v23, %v3191_v1 }
 0x49e   : > { %v3528_v6 = vadd.f32 %v3527_v12, %v3431_v30 }
 0x4a0   : > { %3566 = vst [vmem:[%s5574_s25 + $0x40] sm:$0xff] %v3528_v6  ;;  %v3200_v48 = vpop.f32.mrf.mxu0 }
 0x4a1   : > { %v3201_v2 = vadd.f32 %v3200_v48, %v5567_v58 }
 0x4a3   : > { %v3434_v60 = vpop.f32.mrf.mxu2  ;;  %v3535_v19 = vpop.f32.mrf.mxu3 }
 0x4a4   : > { %v3435_v44 = vadd.f32 %v3434_v60, %v3294_v34  ;;  %v3323_v55 = vpop.f32.mrf.mxu1 }
 0x4a5   : > { %v3324_v52 = vadd.f32 %v3323_v55, %v3196_v56 }
 0x4a6   : > { %v3532_v33 = vadd.f32 %v3531_v25, %v3435_v44 }
 0x4a8   : > { %3567 = vst [vmem:[%s5574_s25 + $0x48] sm:$0xff] %v3532_v33 }
 0x4ab   : > { %v3438_v14 = vpop.f32.mrf.mxu2  ;;  %v3539_v4 = vpop.f32.mrf.mxu3 }
 0x4ac   : > { %v3439_v38 = vadd.f32 %v3438_v14, %v3300_v46  ;;  %v3329_v11 = vpop.f32.mrf.mxu1 }
 0x4ad   : > { %v3330_v57 = vadd.f32 %v3329_v11, %v3201_v2 }
 0x4ae   : > { %v3536_v18 = vadd.f32 %v3535_v19, %v3439_v38 }
 0x4b0   : > { %3568 = vst [vmem:[%s5574_s25 + $0x50] sm:$0xff] %v3536_v18 }
 0x4b3   : > { %v3442_v9 = vpop.f32.mrf.mxu2  ;;  %v3543_v61 = vpop.f32.mrf.mxu3 }
 0x4b4   : > { %v3443_v27 = vadd.f32 %v3442_v9, %v3306_v16 }
 0x4b6   : > { %v3540_v26 = vadd.f32 %v3539_v4, %v3443_v27 }
 0x4b8   : > { %3569 = vst [vmem:[%s5574_s25 + $0x58] sm:$0xff] %v3540_v26 }
 0x4bb   : > { %v3446_v49 = vpop.f32.mrf.mxu2  ;;  %v3547_v21 = vpop.f32.mrf.mxu3 }
 0x4bc   : > { %v3447_v54 = vadd.f32 %v3446_v49, %v3312_v24 }
 0x4be   : > { %v3544_v63 = vadd.f32 %v3543_v61, %v3447_v54 }
 0x4c0   : > { %3570 = vst [vmem:[%s5574_s25 + $0x60] sm:$0xff] %v3544_v63 }
 0x4c3   : > { %v3450_v5 = vpop.f32.mrf.mxu2  ;;  %v3551_v32 = vpop.f32.mrf.mxu3 }
 0x4c4   : > { %v3451_v35 = vadd.f32 %v3450_v5, %v3318_v40 }
 0x4c6   : > { %v3548_v62 = vadd.f32 %v3547_v21, %v3451_v35 }
 0x4c8   : > { %3571 = vst [vmem:[%s5574_s25 + $0x68] sm:$0xff] %v3548_v62 }
 0x4cb   : > { %v3454_v29 = vpop.f32.mrf.mxu2  ;;  %v3555_v42 = vpop.f32.mrf.mxu3 }
 0x4cc   : > { %v3455_v43 = vadd.f32 %v3454_v29, %v3324_v52 }
 0x4ce   : > { %v3552_v59 = vadd.f32 %v3551_v32, %v3455_v43 }
 0x4d0   : > { %3572 = vst [vmem:[%s5574_s25 + $0x70] sm:$0xff] %v3552_v59 }
 0x4d3   : > { %v3458_v50 = vpop.f32.mrf.mxu2 }
 0x4d4   : > { %v3459_v37 = vadd.f32 %v3458_v50, %v3330_v57 }
 0x4d6   : > { %v3556_v3 = vadd.f32 %v3555_v42, %v3459_v37 }
 0x4d8   : > { %3573 = vst [vmem:[%s5574_s25 + $0x78] sm:$0xff] %v3556_v3 }
 0x4d9   : > { %3794 = shalt.err (!%p3791_p8)
}
 0x4da   : > { %s3838_s23 = smov 128   ;;  %s3839_s25 = smov 8  }
 0x4db   : > { %3683 = dma.vmem_to_hbm [thread:$0]  (%p3928_p5), %s3588_s14, 2048, %s3590_s16, %s3575_s13, %s3838_s23, %s3838_s23, %s3839_s25  }
 0x4dc PF: > { %p3695_p9 = scmp.ge.s32.totalorder %s3833_s12, 2  ;;  %s3604_s29 = sand.u32 1, %s3821_s30  }
 0x4dd   : > { %s3605_s22 = scalar_lea.sflag [#allocation4], %s3604_s29 }
 0x4de   : > { %p3690_p10 = pnand %p3695_p9, %p3932_p6 }
 0x4e0   : > { %p3691_p11 = pneg %p3690_p10 }
 0x4e2   : > { %3816 = dma.done.wait (%p3691_p11), %s3605_s22, 2048  }
 0x4e3   : > { %3818 = vsyncadd (%p3691_p11), %s3605_s22, 4294965248  ;;  %p20_p12 = scmp.ge.s32.totalorder %s3915_s15, 4   ;;  %s5794_s30 = smov %s3825_s10 }
 0x4e4   : > { %s5795_s10 = smov %s3829_s11  ;;  %s5796_s11 = smov %s3926_s18 }
 0x4e5   : > { %s5797_s12 = smov %s3915_s15  ;;  %22 = sbr.rel (!%p20_p12) target bundleno = 4 (0x4), region = 96 }
 0x4ea   :  { %3611 = vsyncpa [#allocation3], 1 }
 0x4eb   :  { %3613 = vsyncpa [#allocation3 + $0x1], 1 }
 0x4ec   :  { %3614 = vsyncpa [#allocation4], 1 }
 0x4ed   :  { %3616 = vsyncpa [#allocation4 + $0x1], 1 }

</bundles_post_ra>
